<compile_context>
chip_gen: v7x
topology: tpu7x:2x2x1
jax: 0.10.0
libtpu: 0.0.40
codegen_flags: <defaults>
</compile_context>

<pallas_src>
import jax
import jax.numpy as jnp
from jax import lax
from jax.experimental import pallas as pl
from jax.experimental.pallas import tpu as pltpu


LEAKY_SLOPE = 0.2
BN_EPS = 1e-5


def _round_up(x, m):
    return ((x + m - 1) // m) * m


def _pick_tile(total, cap, candidates):
    for t in candidates:
        if t <= cap and total % t == 0:
            return t
    return total


def _pad_weight(weight, ci, copad):
    """OIHW -> [4, 4, ci, copad], zero-padded on both channel axes."""
    co, ci_real = weight.shape[0], weight.shape[1]
    wt = jnp.transpose(weight, (2, 3, 1, 0))                   # [4,4,ci_real,co]
    return jnp.pad(wt, ((0, 0), (0, 0), (0, ci - ci_real), (0, copad - co)))


def _bn_act(y2d, stats, count, copad):
    """Training-mode BatchNorm (gamma=1, beta=0) + LeakyReLU in plain JAX.

    XLA fuses this elementwise work into the pad/slice copies that build the
    next layer's im2col / parity views, so the activation makes only one
    round trip through HBM per BN layer (no separate Pallas apply pass).
    """
    ssum = jnp.sum(stats[:, 0, :], axis=0)                     # [copad] f32
    ssq = jnp.sum(stats[:, 1, :], axis=0)                      # [copad] f32
    mean = ssum / count
    var = jnp.maximum(ssq / count - mean * mean, 0.0)          # clamp cancellation
    invstd = lax.rsqrt(var + BN_EPS)
    scale = invstd.reshape(1, copad)                           # gamma = 1
    shift = (-mean * invstd).reshape(1, copad)                 # beta  = 0
    z = y2d.astype(jnp.float32) * scale + shift
    return jnp.where(z > 0.0, z, LEAKY_SLOPE * z).astype(jnp.bfloat16)


# ----------------------------------------------------------------------------
# Kernel A: plain GEMM over a wrapper-built im2col (layers 1, 3, 4)
# ----------------------------------------------------------------------------
def _make_gemm_kernel(use_bn):
    if use_bn:
        def kernel(a_ref, w_ref, b_ref, y_ref, stats_ref):
            y = jnp.dot(a_ref[...], w_ref[...],
                        preferred_element_type=jnp.float32) + b_ref[...]
            y_ref[...] = y.astype(y_ref.dtype)                 # bf16 writeback
            # BN partial sums from the f32 accumulator, single [2, co] store.
            s1 = jnp.sum(y, axis=0, keepdims=True)
            s2 = jnp.sum(y * y, axis=0, keepdims=True)
            stats_ref[0] = jnp.concatenate([s1, s2], axis=0)
    else:
        def kernel(a_ref, w_ref, b_ref, y_ref):
            y = jnp.dot(a_ref[...], w_ref[...],
                        preferred_element_type=jnp.float32) + b_ref[...]
            y_ref[...] = jnp.where(y > 0.0, y, LEAKY_SLOPE * y).astype(y_ref.dtype)
    return kernel


def _conv4x4_s2_gemm(x, weight, bias, use_bn, *, co_tile_max=256, m_tile_max=256):
    """4x4 / stride 2 / pad 1 conv as one big GEMM over a wrapper im2col.

    Layer 1: K = 16*ci0 = 128 (full-depth contraction instead of 16 K=8 dots).
    Layers 3/4: batch folded into M so the MXU row fill is >=128 per step.

    x      : [N, H, W, Ci] bf16 (Ci may contain trailing zero-padded channels)
    weight : [Co, Ci_real, 4, 4] f32 (PyTorch OIHW);  bias : [Co] f32
    returns: [N, H/2, W/2, Copad] bf16 (bias [+BN] + LeakyReLU applied),
             Copad = round_up(Co, 128); padded channels are exactly zero.
    """
    n, h, w, ci = x.shape
    co = weight.shape[0]
    ho, wo = h // 2, w // 2
    copad = _round_up(co, 128)
    co_tile = _pick_tile(copad, co_tile_max, (256, 128))
    n_co = copad // co_tile
    m_total = n * ho * wo
    m_tile = _pick_tile(m_total, m_tile_max, (256, 128, 64, 32, 16, 8))
    n_m = m_total // m_tile
    k = 16 * ci

    # im2col [N*Ho*Wo, 16*Ci], tap-major then channel (matches weight reshape).
    # Built with pad + 16 strided slices + concat; XLA fuses the previous
    # layer's BN/LeakyReLU elementwise into these copies.
    xp = jnp.pad(x, ((0, 0), (1, 1), (1, 1), (0, 0)))
    cols = [xp[:, kh:kh + h:2, kw:kw + w:2, :]
            for kh in range(4) for kw in range(4)]
    a = jnp.concatenate(cols, axis=-1).reshape(m_total, k).astype(jnp.bfloat16)

    wt = _pad_weight(weight, ci, copad).reshape(k, copad).astype(jnp.bfloat16)
    b_row = jnp.pad(bias, (0, copad - co)).astype(jnp.float32).reshape(1, copad)

    # cout tiles OUTERMOST, M tiles innermost: weight block index depends only
    # on the outer axis -> fetched n_co times total, resident across M steps.
    in_specs = [
        pl.BlockSpec((m_tile, k), lambda j, i: (i, 0)),
        pl.BlockSpec((k, co_tile), lambda j, i: (0, j)),
        pl.BlockSpec((1, co_tile), lambda j, i: (0, j)),
    ]
    out_shape = [jax.ShapeDtypeStruct((m_total, copad), jnp.bfloat16)]
    out_specs = [pl.BlockSpec((m_tile, co_tile), lambda j, i: (i, j))]
    if use_bn:
        out_shape.append(jax.ShapeDtypeStruct((n_m, 2, copad), jnp.float32))
        out_specs.append(pl.BlockSpec((1, 2, co_tile), lambda j, i: (i, 0, j)))

    outs = pl.pallas_call(
        _make_gemm_kernel(use_bn),
        out_shape=tuple(out_shape),
        grid_spec=pltpu.PrefetchScalarGridSpec(
            num_scalar_prefetch=0,
            grid=(n_co, n_m),
            in_specs=in_specs,
            out_specs=tuple(out_specs),
        ),
        compiler_params=pltpu.CompilerParams(
            dimension_semantics=("parallel", "parallel")),
    )(a, wt, b_row)

    if not use_bn:
        return outs[0].reshape(n, ho, wo, copad)
    y, stats = outs
    act = _bn_act(y, stats, m_total, copad)
    return act.reshape(n, ho, wo, copad)


# ----------------------------------------------------------------------------
# Kernel B: in-kernel im2col via 8 parity/shift views (layer 2)
# ----------------------------------------------------------------------------
def _make_tap_kernel(m_rows, wo):
    def kernel(*refs):
        x_refs = refs[0:8]        # 8 views, each [1, (Ho+1)*Wo, Ci] bf16
        wt_ref = refs[8]          # [16, Ci, co_tile] bf16 (VMEM-resident)
        b_ref = refs[9]           # [1, co_tile] f32
        y_ref = refs[10]          # [1, m_rows, co_tile] bf16
        stats_ref = refs[11]      # [1, 2, co_tile] f32

        acc = None                # local f32 accumulation (no VMEM scratch)
        for kh in range(4):
            p, a = kh % 2, kh // 2
            for kw in range(4):
                q, b = kw % 2, kw // 2
                xr = x_refs[p * 4 + q * 2 + b]
                # contiguous, unit-stride tap slice: rows [a*Wo, a*Wo+Ho*Wo)
                tap = xr[0, pl.ds(a * wo, m_rows), :]          # [m_rows, Ci]
                contrib = jnp.dot(tap, wt_ref[kh * 4 + kw],
                                  preferred_element_type=jnp.float32)
                acc = contrib if acc is None else acc + contrib

        y = acc + b_ref[...]                                   # f32
        y_ref[0] = y.astype(y_ref.dtype)                       # bf16 writeback
        s1 = jnp.sum(y, axis=0, keepdims=True)
        s2 = jnp.sum(y * y, axis=0, keepdims=True)
        stats_ref[0] = jnp.concatenate([s1, s2], axis=0)       # single store
    return kernel


def _conv4x4_s2_tap(x, weight, bias, *, co_tile_max=256):
    """4x4 / stride 2 / pad 1 conv + bias + BN-stats + (JAX-side) BN + act.

    Used for layer 2: the 8 parity/column-shift views cost ~2x activation
    bytes (half of a full im2col) and every tap is a contiguous, unit-stride
    2-D slice inside the kernel; per-sample M = Ho*Wo = 256 fills the MXU.
    """
    n, h, w, ci = x.shape
    co = weight.shape[0]
    ho, wo = h // 2, w // 2
    m_rows = ho * wo
    r_rows = (ho + 1) * wo
    copad = _round_up(co, 128)
    co_tile = _pick_tile(copad, co_tile_max, (256, 128))
    n_co = copad // co_tile

    wt = _pad_weight(weight, ci, copad).reshape(16, ci, copad).astype(jnp.bfloat16)
    b_row = jnp.pad(bias, (0, copad - co)).astype(jnp.float32).reshape(1, copad)

    # 8 parity / column-shift views of the zero-padded input, flattened so
    # that tap (kh, kw) is rows [(kh//2)*Wo, (kh//2)*Wo + Ho*Wo) of view
    # (kh%2, kw%2, kw//2).
    xp = jnp.pad(x, ((0, 0), (1, 1), (1, 1), (0, 0)))          # [N, H+2, W+2, Ci]
    xviews = []
    for p in (0, 1):
        for q in (0, 1):
            xpq = xp[:, p::2, q::2, :]                         # [N, Ho+1, Wo+1, Ci]
            for b in (0, 1):
                xviews.append(xpq[:, :, b:b + wo, :].reshape(n, r_rows, ci))

    # cout tiles OUTERMOST, batch innermost -> weight tile DMA'd once.
    x_spec = pl.BlockSpec((1, r_rows, ci), lambda j, i: (i, 0, 0))
    in_specs = [x_spec] * 8 + [
        pl.BlockSpec((16, ci, co_tile), lambda j, i: (0, 0, j)),
        pl.BlockSpec((1, co_tile), lambda j, i: (0, j)),
    ]
    out_shape = (jax.ShapeDtypeStruct((n, m_rows, copad), jnp.bfloat16),
                 jax.ShapeDtypeStruct((n, 2, copad), jnp.float32))
    out_specs = (pl.BlockSpec((1, m_rows, co_tile), lambda j, i: (i, 0, j)),
                 pl.BlockSpec((1, 2, co_tile), lambda j, i: (i, 0, j)))

    y, stats = pl.pallas_call(
        _make_tap_kernel(m_rows, wo),
        out_shape=out_shape,
        grid_spec=pltpu.PrefetchScalarGridSpec(
            num_scalar_prefetch=0,
            grid=(n_co, n),
            in_specs=in_specs,
            out_specs=out_specs,
        ),
        compiler_params=pltpu.CompilerParams(
            dimension_semantics=("parallel", "parallel")),
    )(*xviews, wt, b_row)

    act = _bn_act(y.reshape(n * m_rows, copad), stats, n * m_rows, copad)
    return act.reshape(n, ho, wo, copad)


# ----------------------------------------------------------------------------
# Discriminator forward
# ----------------------------------------------------------------------------
def _forward(x_nchw, params):
    (w1, b1), (w2, b2), (w3, b3), (w4, b4), (w5, b5) = params
    n, c, h, w = x_nchw.shape

    # NCHW -> NHWC once at the boundary; pad image channels to 8 so layer 1's
    # im2col contraction depth is 16*8 = 128 (full lanes).
    ci0 = max(c, 8)
    x = jnp.transpose(x_nchw, (0, 2, 3, 1))
    x = jnp.pad(x, ((0, 0), (0, 0), (0, 0), (0, ci0 - c))).astype(jnp.bfloat16)

    x = _conv4x4_s2_gemm(x, w1, b1, use_bn=False)   # layer 1: GEMM, K=128
    x = _conv4x4_s2_tap(x, w2, b2)                  # layer 2: tap path + BN
    x = _conv4x4_s2_gemm(x, w3, b3, use_bn=True)    # layer 3: GEMM (batch in M) + BN
    x = _conv4x4_s2_gemm(x, w4, b4, use_bn=True)    # layer 4: GEMM (batch in M) + BN

    # conv5 (4x4, stride 1, pad 0 on a 4x4 map) + sigmoid: one dot per sample;
    # a dedicated pallas_call here would be pure launch overhead.
    n2, ho, wo, cpad = x.shape
    assert (ho, wo) == (w5.shape[2], w5.shape[3]), (ho, wo, w5.shape)
    ci5 = w5.shape[1]
    w5t = jnp.transpose(w5, (2, 3, 1, 0))[..., 0]              # [4, 4, ci5]
    w5t = jnp.pad(w5t, ((0, 0), (0, 0), (0, cpad - ci5)))      # align padded chans
    w5_flat = w5t.reshape(ho * wo * cpad).astype(jnp.float32)
    logits = x.reshape(n2, ho * wo * cpad).astype(jnp.float32) @ w5_flat + b5[0]
    return jax.nn.sigmoid(logits).reshape(n2, 1, 1, 1)


discriminator_forward = jax.jit(_forward)


# ----------------------------------------------------------------------------
# Params (mirrors weight_init(mean=0, std=0.02); BN params stay at defaults)
# ----------------------------------------------------------------------------
def init_params(key, d=16, channels=1):
    shapes = [
        (d, channels, 4, 4),
        (2 * d, d, 4, 4),
        (4 * d, 2 * d, 4, 4),
        (8 * d, 4 * d, 4, 4),
        (1, 8 * d, 4, 4),
    ]
    params = []
    for i, s in enumerate(shapes):
        k = jax.random.fold_in(key, i)
        w = 0.02 * jax.random.normal(k, s, dtype=jnp.float32)
        b = jnp.zeros((s[0],), dtype=jnp.float32)
        params.append((w, b))
    return params


# ----------------------------------------------------------------------------
# Pure-JAX f32 reference (for verification)
# ----------------------------------------------------------------------------
def _ref_conv(x, w, b, stride, pad):
    y = lax.conv_general_dilated(
        x, w, window_strides=(stride, stride),
        padding=[(pad, pad), (pad, pad)],
        dimension_numbers=("NCHW", "OIHW", "NCHW"))
    return y + b.reshape(1, -1, 1, 1)


def _ref_bn(x):
    mean = jnp.mean(x, axis=(0, 2, 3), keepdims=True)
    var = jnp.mean((x - mean) ** 2, axis=(0, 2, 3), keepdims=True)
    return (x - mean) * lax.rsqrt(var + BN_EPS)


def reference_forward(x, params):
    (w1, b1), (w2, b2), (w3, b3), (w4, b4), (w5, b5) = params
    lrelu = lambda t: jnp.where(t > 0, t, LEAKY_SLOPE * t)
    x = lrelu(_ref_conv(x, w1, b1, 2, 1))
    x = lrelu(_ref_bn(_ref_conv(x, w2, b2, 2, 1)))
    x = lrelu(_ref_bn(_ref_conv(x, w3, b3, 2, 1)))
    x = lrelu(_ref_bn(_ref_conv(x, w4, b4, 2, 1)))
    x = jax.nn.sigmoid(_ref_conv(x, w5, b5, 1, 0))
    return x


if __name__ == "__main__":
    key = jax.random.PRNGKey(0)
    d = 16         # shrunken width (original default d=128)
    channels = 1
    batch = 2
    spatial = 64   # DCGAN discriminator expects 64x64 input (conv5 -> 1x1)

    x = jax.random.normal(
        jax.random.fold_in(key, 100), (batch, channels, spatial, spatial),
        dtype=jnp.float32)
    params = init_params(jax.random.fold_in(key, 200), d=d, channels=channels)

    out = jax.block_until_ready(discriminator_forward(x, params))
    assert out.shape == (batch, 1, 1, 1), out.shape

    # bf16 matmul operands / bf16 conv outputs (f32 accumulation and f32 BN
    # statistics) => compare against the f32 reference with relaxed tolerance.
    ref = reference_forward(x, params)
    assert jnp.allclose(out, ref, atol=3e-2, rtol=3e-2), (out, ref)

    print("KERNEL_OK")
</pallas_src>

<mosaic_0001>
module attributes {stable_mosaic.version = 11 : i64} {
  func.func @kernel(%arg0: i32, %arg1: i32, %arg2: memref<256x128xbf16, #tpu.memory_space<vmem>>, %arg3: memref<128x128xbf16, #tpu.memory_space<vmem>>, %arg4: memref<1x128xf32, #tpu.memory_space<vmem>>, %arg5: memref<256x128xbf16, #tpu.memory_space<vmem>>) attributes {dimension_semantics = [#tpu.dimension_semantics<parallel>, #tpu.dimension_semantics<parallel>], iteration_bounds = array<i64: 1, 8>, scalar_prefetch = 0 : i64, scratch_operands = 0 : i64, tpu.core_type = #tpu.core_type<tc>, window_params = [{transform_indices = @transform_0, window_bounds = array<i64: 256, 128>}, {transform_indices = @transform_1, window_bounds = array<i64: 128, 128>}, {transform_indices = @transform_2, window_bounds = array<i64: 1, 128>}, {transform_indices = @transform_3, window_bounds = array<i64: 256, 128>}]} {
    %c0 = arith.constant 0 : index
    %c0_0 = arith.constant 0 : index
    %0 = vector.load %arg2[%c0, %c0_0] : memref<256x128xbf16, #tpu.memory_space<vmem>>, vector<256x128xbf16>
    %c0_1 = arith.constant 0 : index
    %c0_2 = arith.constant 0 : index
    %1 = vector.load %arg3[%c0_1, %c0_2] : memref<128x128xbf16, #tpu.memory_space<vmem>>, vector<128x128xbf16>
    %cst = arith.constant dense<0.000000e+00> : vector<256x128xf32>
    %2 = tpu.matmul %0, %1, %cst {dimension_numbers = #tpu.dot_dimension_numbers<[1], [0], [0], [1], [0, 0, 1, 1], [], []>} : vector<256x128xbf16>, vector<128x128xbf16>, vector<256x128xf32> -> vector<256x128xf32>
    %c0_3 = arith.constant 0 : index
    %c0_4 = arith.constant 0 : index
    %3 = vector.load %arg4[%c0_3, %c0_4] : memref<1x128xf32, #tpu.memory_space<vmem>>, vector<1x128xf32>
    %4 = vector.broadcast %3 : vector<1x128xf32> to vector<256x128xf32>
    %5 = arith.addf %2, %4 : vector<256x128xf32>
    %cst_5 = arith.constant 0.000000e+00 : f32
    %6 = vector.broadcast %cst_5 : f32 to vector<256x128xf32>
    %7 = arith.cmpf ogt, %5, %6 : vector<256x128xf32>
    %cst_6 = arith.constant 2.000000e-01 : f32
    %8 = vector.broadcast %cst_6 : f32 to vector<256x128xf32>
    %9 = arith.mulf %8, %5 : vector<256x128xf32>
    %10 = arith.select %7, %5, %9 : vector<256x128xi1>, vector<256x128xf32>
    %11 = arith.truncf %10 : vector<256x128xf32> to vector<256x128xbf16>
    %c0_7 = arith.constant 0 : index
    %c0_8 = arith.constant 0 : index
    %12 = vector.load %arg5[%c0_7, %c0_8] : memref<256x128xbf16, #tpu.memory_space<vmem>>, vector<256x128xbf16>
    tpu.vector_store %arg5[%c0_7, %c0_8], %11 {strides = array<i32>} : memref<256x128xbf16, #tpu.memory_space<vmem>>, vector<256x128xbf16>,
    return
  }
  func.func @transform_0(%arg0: i32, %arg1: i32) -> (i32, i32) {
    %c0_i32 = arith.constant 0 : i32
    %c0_i32_0 = arith.constant 0 : i32
    return %arg1, %c0_i32 : i32, i32
  }
  func.func @transform_1(%arg0: i32, %arg1: i32) -> (i32, i32) {
    %c0_i32 = arith.constant 0 : i32
    %c0_i32_0 = arith.constant 0 : i32
    return %c0_i32, %arg0 : i32, i32
  }
  func.func @transform_2(%arg0: i32, %arg1: i32) -> (i32, i32) {
    %c0_i32 = arith.constant 0 : i32
    %c0_i32_0 = arith.constant 0 : i32
    return %c0_i32, %arg0 : i32, i32
  }
  func.func @transform_3(%arg0: i32, %arg1: i32) -> (i32, i32) {
    %c0_i32 = arith.constant 0 : i32
    return %arg1, %arg0 : i32, i32
  }
}

module attributes {stable_mosaic.version = 11 : i64} {
  func.func @kernel(%arg0: i32, %arg1: i32, %arg2: memref<1x272x128xbf16, #tpu.memory_space<vmem>>, %arg3: memref<1x272x128xbf16, #tpu.memory_space<vmem>>, %arg4: memref<1x272x128xbf16, #tpu.memory_space<vmem>>, %arg5: memref<1x272x128xbf16, #tpu.memory_space<vmem>>, %arg6: memref<1x272x128xbf16, #tpu.memory_space<vmem>>, %arg7: memref<1x272x128xbf16, #tpu.memory_space<vmem>>, %arg8: memref<1x272x128xbf16, #tpu.memory_space<vmem>>, %arg9: memref<1x272x128xbf16, #tpu.memory_space<vmem>>, %arg10: memref<16x128x128xbf16, #tpu.memory_space<vmem>>, %arg11: memref<1x128xf32, #tpu.memory_space<vmem>>, %arg12: memref<1x256x128xbf16, #tpu.memory_space<vmem>>, %arg13: memref<1x2x128xf32, #tpu.memory_space<vmem>>) attributes {dimension_semantics = [#tpu.dimension_semantics<parallel>, #tpu.dimension_semantics<parallel>], iteration_bounds = array<i64: 1, 2>, scalar_prefetch = 0 : i64, scratch_operands = 0 : i64, tpu.core_type = #tpu.core_type<tc>, window_params = [{transform_indices = @transform_0, window_bounds = array<i64: 1, 272, 128>}, {transform_indices = @transform_1, window_bounds = array<i64: 1, 272, 128>}, {transform_indices = @transform_2, window_bounds = array<i64: 1, 272, 128>}, {transform_indices = @transform_3, window_bounds = array<i64: 1, 272, 128>}, {transform_indices = @transform_4, window_bounds = array<i64: 1, 272, 128>}, {transform_indices = @transform_5, window_bounds = array<i64: 1, 272, 128>}, {transform_indices = @transform_6, window_bounds = array<i64: 1, 272, 128>}, {transform_indices = @transform_7, window_bounds = array<i64: 1, 272, 128>}, {transform_indices = @transform_8, window_bounds = array<i64: 16, 128, 128>}, {transform_indices = @transform_9, window_bounds = array<i64: 1, 128>}, {transform_indices = @transform_10, window_bounds = array<i64: 1, 256, 128>}, {transform_indices = @transform_11, window_bounds = array<i64: 1, 2, 128>}]} {
    %c0 = arith.constant 0 : index
    %c0_0 = arith.constant 0 : index
    %c0_1 = arith.constant 0 : index
    %0 = vector.load %arg2[%c0, %c0_0, %c0_1] : memref<1x272x128xbf16, #tpu.memory_space<vmem>>, vector<1x256x128xbf16>
    %1 = vector.shape_cast %0 : vector<1x256x128xbf16> to vector<256x128xbf16>
    %c0_2 = arith.constant 0 : index
    %c0_3 = arith.constant 0 : index
    %c0_4 = arith.constant 0 : index
    %2 = vector.load %arg10[%c0_2, %c0_3, %c0_4] : memref<16x128x128xbf16, #tpu.memory_space<vmem>>, vector<1x128x128xbf16>
    %3 = vector.shape_cast %2 : vector<1x128x128xbf16> to vector<128x128xbf16>
    %cst = arith.constant dense<0.000000e+00> : vector<256x128xf32>
    %4 = tpu.matmul %1, %3, %cst {dimension_numbers = #tpu.dot_dimension_numbers<[1], [0], [0], [1], [0, 0, 1, 1], [], []>} : vector<256x128xbf16>, vector<128x128xbf16>, vector<256x128xf32> -> vector<256x128xf32>
    %c0_5 = arith.constant 0 : index
    %c0_6 = arith.constant 0 : index
    %c0_7 = arith.constant 0 : index
    %5 = vector.load %arg4[%c0_5, %c0_6, %c0_7] : memref<1x272x128xbf16, #tpu.memory_space<vmem>>, vector<1x256x128xbf16>
    %6 = vector.shape_cast %5 : vector<1x256x128xbf16> to vector<256x128xbf16>
    %c1 = arith.constant 1 : index
    %c0_8 = arith.constant 0 : index
    %c0_9 = arith.constant 0 : index
    %7 = vector.load %arg10[%c1, %c0_8, %c0_9] : memref<16x128x128xbf16, #tpu.memory_space<vmem>>, vector<1x128x128xbf16>
    %8 = vector.shape_cast %7 : vector<1x128x128xbf16> to vector<128x128xbf16>
    %cst_10 = arith.constant dense<0.000000e+00> : vector<256x128xf32>
    %9 = tpu.matmul %6, %8, %cst_10 {dimension_numbers = #tpu.dot_dimension_numbers<[1], [0], [0], [1], [0, 0, 1, 1], [], []>} : vector<256x128xbf16>, vector<128x128xbf16>, vector<256x128xf32> -> vector<256x128xf32>
    %10 = arith.addf %4, %9 : vector<256x128xf32>
    %c0_11 = arith.constant 0 : index
    %c0_12 = arith.constant 0 : index
    %c0_13 = arith.constant 0 : index
    %11 = vector.load %arg3[%c0_11, %c0_12, %c0_13] : memref<1x272x128xbf16, #tpu.memory_space<vmem>>, vector<1x256x128xbf16>
    %12 = vector.shape_cast %11 : vector<1x256x128xbf16> to vector<256x128xbf16>
    %c2 = arith.constant 2 : index
    %c0_14 = arith.constant 0 : index
    %c0_15 = arith.constant 0 : index
    %13 = vector.load %arg10[%c2, %c0_14, %c0_15] : memref<16x128x128xbf16, #tpu.memory_space<vmem>>, vector<1x128x128xbf16>
    %14 = vector.shape_cast %13 : vector<1x128x128xbf16> to vector<128x128xbf16>
    %cst_16 = arith.constant dense<0.000000e+00> : vector<256x128xf32>
    %15 = tpu.matmul %12, %14, %cst_16 {dimension_numbers = #tpu.dot_dimension_numbers<[1], [0], [0], [1], [0, 0, 1, 1], [], []>} : vector<256x128xbf16>, vector<128x128xbf16>, vector<256x128xf32> -> vector<256x128xf32>
    %16 = arith.addf %10, %15 : vector<256x128xf32>
    %c0_17 = arith.constant 0 : index
    %c0_18 = arith.constant 0 : index
    %c0_19 = arith.constant 0 : index
    %17 = vector.load %arg5[%c0_17, %c0_18, %c0_19] : memref<1x272x128xbf16, #tpu.memory_space<vmem>>, vector<1x256x128xbf16>
    %18 = vector.shape_cast %17 : vector<1x256x128xbf16> to vector<256x128xbf16>
    %c3 = arith.constant 3 : index
    %c0_20 = arith.constant 0 : index
    %c0_21 = arith.constant 0 : index
    %19 = vector.load %arg10[%c3, %c0_20, %c0_21] : memref<16x128x128xbf16, #tpu.memory_space<vmem>>, vector<1x128x128xbf16>
    %20 = vector.shape_cast %19 : vector<1x128x128xbf16> to vector<128x128xbf16>
    %cst_22 = arith.constant dense<0.000000e+00> : vector<256x128xf32>
    %21 = tpu.matmul %18, %20, %cst_22 {dimension_numbers = #tpu.dot_dimension_numbers<[1], [0], [0], [1], [0, 0, 1, 1], [], []>} : vector<256x128xbf16>, vector<128x128xbf16>, vector<256x128xf32> -> vector<256x128xf32>
    %22 = arith.addf %16, %21 : vector<256x128xf32>
    %c0_23 = arith.constant 0 : index
    %c0_24 = arith.constant 0 : index
    %c0_25 = arith.constant 0 : index
    %23 = vector.load %arg6[%c0_23, %c0_24, %c0_25] : memref<1x272x128xbf16, #tpu.memory_space<vmem>>, vector<1x256x128xbf16>
    %24 = vector.shape_cast %23 : vector<1x256x128xbf16> to vector<256x128xbf16>
    %c4 = arith.constant 4 : index
    %c0_26 = arith.constant 0 : index
    %c0_27 = arith.constant 0 : index
    %25 = vector.load %arg10[%c4, %c0_26, %c0_27] : memref<16x128x128xbf16, #tpu.memory_space<vmem>>, vector<1x128x128xbf16>
    %26 = vector.shape_cast %25 : vector<1x128x128xbf16> to vector<128x128xbf16>
    %cst_28 = arith.constant dense<0.000000e+00> : vector<256x128xf32>
    %27 = tpu.matmul %24, %26, %cst_28 {dimension_numbers = #tpu.dot_dimension_numbers<[1], [0], [0], [1], [0, 0, 1, 1], [], []>} : vector<256x128xbf16>, vector<128x128xbf16>, vector<256x128xf32> -> vector<256x128xf32>
    %28 = arith.addf %22, %27 : vector<256x128xf32>
    %c0_29 = arith.constant 0 : index
    %c0_30 = arith.constant 0 : index
    %c0_31 = arith.constant 0 : index
    %29 = vector.load %arg8[%c0_29, %c0_30, %c0_31] : memref<1x272x128xbf16, #tpu.memory_space<vmem>>, vector<1x256x128xbf16>
    %30 = vector.shape_cast %29 : vector<1x256x128xbf16> to vector<256x128xbf16>
    %c5 = arith.constant 5 : index
    %c0_32 = arith.constant 0 : index
    %c0_33 = arith.constant 0 : index
    %31 = vector.load %arg10[%c5, %c0_32, %c0_33] : memref<16x128x128xbf16, #tpu.memory_space<vmem>>, vector<1x128x128xbf16>
    %32 = vector.shape_cast %31 : vector<1x128x128xbf16> to vector<128x128xbf16>
    %cst_34 = arith.constant dense<0.000000e+00> : vector<256x128xf32>
    %33 = tpu.matmul %30, %32, %cst_34 {dimension_numbers = #tpu.dot_dimension_numbers<[1], [0], [0], [1], [0, 0, 1, 1], [], []>} : vector<256x128xbf16>, vector<128x128xbf16>, vector<256x128xf32> -> vector<256x128xf32>
    %34 = arith.addf %28, %33 : vector<256x128xf32>
    %c0_35 = arith.constant 0 : index
    %c0_36 = arith.constant 0 : index
    %c0_37 = arith.constant 0 : index
    %35 = vector.load %arg7[%c0_35, %c0_36, %c0_37] : memref<1x272x128xbf16, #tpu.memory_space<vmem>>, vector<1x256x128xbf16>
    %36 = vector.shape_cast %35 : vector<1x256x128xbf16> to vector<256x128xbf16>
    %c6 = arith.constant 6 : index
    %c0_38 = arith.constant 0 : index
    %c0_39 = arith.constant 0 : index
    %37 = vector.load %arg10[%c6, %c0_38, %c0_39] : memref<16x128x128xbf16, #tpu.memory_space<vmem>>, vector<1x128x128xbf16>
    %38 = vector.shape_cast %37 : vector<1x128x128xbf16> to vector<128x128xbf16>
    %cst_40 = arith.constant dense<0.000000e+00> : vector<256x128xf32>
    %39 = tpu.matmul %36, %38, %cst_40 {dimension_numbers = #tpu.dot_dimension_numbers<[1], [0], [0], [1], [0, 0, 1, 1], [], []>} : vector<256x128xbf16>, vector<128x128xbf16>, vector<256x128xf32> -> vector<256x128xf32>
    %40 = arith.addf %34, %39 : vector<256x128xf32>
    %c0_41 = arith.constant 0 : index
    %c0_42 = arith.constant 0 : index
    %c0_43 = arith.constant 0 : index
    %41 = vector.load %arg9[%c0_41, %c0_42, %c0_43] : memref<1x272x128xbf16, #tpu.memory_space<vmem>>, vector<1x256x128xbf16>
    %42 = vector.shape_cast %41 : vector<1x256x128xbf16> to vector<256x128xbf16>
    %c7 = arith.constant 7 : index
    %c0_44 = arith.constant 0 : index
    %c0_45 = arith.constant 0 : index
    %43 = vector.load %arg10[%c7, %c0_44, %c0_45] : memref<16x128x128xbf16, #tpu.memory_space<vmem>>, vector<1x128x128xbf16>
    %44 = vector.shape_cast %43 : vector<1x128x128xbf16> to vector<128x128xbf16>
    %cst_46 = arith.constant dense<0.000000e+00> : vector<256x128xf32>
    %45 = tpu.matmul %42, %44, %cst_46 {dimension_numbers = #tpu.dot_dimension_numbers<[1], [0], [0], [1], [0, 0, 1, 1], [], []>} : vector<256x128xbf16>, vector<128x128xbf16>, vector<256x128xf32> -> vector<256x128xf32>
    %46 = arith.addf %40, %45 : vector<256x128xf32>
    %c0_47 = arith.constant 0 : index
    %c16 = arith.constant 16 : index
    %c0_48 = arith.constant 0 : index
    %47 = vector.load %arg2[%c0_47, %c16, %c0_48] : memref<1x272x128xbf16, #tpu.memory_space<vmem>>, vector<1x256x128xbf16>
    %48 = vector.shape_cast %47 : vector<1x256x128xbf16> to vector<256x128xbf16>
    %c8 = arith.constant 8 : index
    %c0_49 = arith.constant 0 : index
    %c0_50 = arith.constant 0 : index
    %49 = vector.load %arg10[%c8, %c0_49, %c0_50] : memref<16x128x128xbf16, #tpu.memory_space<vmem>>, vector<1x128x128xbf16>
    %50 = vector.shape_cast %49 : vector<1x128x128xbf16> to vector<128x128xbf16>
    %cst_51 = arith.constant dense<0.000000e+00> : vector<256x128xf32>
    %51 = tpu.matmul %48, %50, %cst_51 {dimension_numbers = #tpu.dot_dimension_numbers<[1], [0], [0], [1], [0, 0, 1, 1], [], []>} : vector<256x128xbf16>, vector<128x128xbf16>, vector<256x128xf32> -> vector<256x128xf32>
    %52 = arith.addf %46, %51 : vector<256x128xf32>
    %c0_52 = arith.constant 0 : index
    %c16_53 = arith.constant 16 : index
    %c0_54 = arith.constant 0 : index
    %53 = vector.load %arg4[%c0_52, %c16_53, %c0_54] : memref<1x272x128xbf16, #tpu.memory_space<vmem>>, vector<1x256x128xbf16>
    %54 = vector.shape_cast %53 : vector<1x256x128xbf16> to vector<256x128xbf16>
    %c9 = arith.constant 9 : index
    %c0_55 = arith.constant 0 : index
    %c0_56 = arith.constant 0 : index
    %55 = vector.load %arg10[%c9, %c0_55, %c0_56] : memref<16x128x128xbf16, #tpu.memory_space<vmem>>, vector<1x128x128xbf16>
    %56 = vector.shape_cast %55 : vector<1x128x128xbf16> to vector<128x128xbf16>
    %cst_57 = arith.constant dense<0.000000e+00> : vector<256x128xf32>
    %57 = tpu.matmul %54, %56, %cst_57 {dimension_numbers = #tpu.dot_dimension_numbers<[1], [0], [0], [1], [0, 0, 1, 1], [], []>} : vector<256x128xbf16>, vector<128x128xbf16>, vector<256x128xf32> -> vector<256x128xf32>
    %58 = arith.addf %52, %57 : vector<256x128xf32>
    %c0_58 = arith.constant 0 : index
    %c16_59 = arith.constant 16 : index
    %c0_60 = arith.constant 0 : index
    %59 = vector.load %arg3[%c0_58, %c16_59, %c0_60] : memref<1x272x128xbf16, #tpu.memory_space<vmem>>, vector<1x256x128xbf16>
    %60 = vector.shape_cast %59 : vector<1x256x128xbf16> to vector<256x128xbf16>
    %c10 = arith.constant 10 : index
    %c0_61 = arith.constant 0 : index
    %c0_62 = arith.constant 0 : index
    %61 = vector.load %arg10[%c10, %c0_61, %c0_62] : memref<16x128x128xbf16, #tpu.memory_space<vmem>>, vector<1x128x128xbf16>
    %62 = vector.shape_cast %61 : vector<1x128x128xbf16> to vector<128x128xbf16>
    %cst_63 = arith.constant dense<0.000000e+00> : vector<256x128xf32>
    %63 = tpu.matmul %60, %62, %cst_63 {dimension_numbers = #tpu.dot_dimension_numbers<[1], [0], [0], [1], [0, 0, 1, 1], [], []>} : vector<256x128xbf16>, vector<128x128xbf16>, vector<256x128xf32> -> vector<256x128xf32>
    %64 = arith.addf %58, %63 : vector<256x128xf32>
    %c0_64 = arith.constant 0 : index
    %c16_65 = arith.constant 16 : index
    %c0_66 = arith.constant 0 : index
    %65 = vector.load %arg5[%c0_64, %c16_65, %c0_66] : memref<1x272x128xbf16, #tpu.memory_space<vmem>>, vector<1x256x128xbf16>
    %66 = vector.shape_cast %65 : vector<1x256x128xbf16> to vector<256x128xbf16>
    %c11 = arith.constant 11 : index
    %c0_67 = arith.constant 0 : index
    %c0_68 = arith.constant 0 : index
    %67 = vector.load %arg10[%c11, %c0_67, %c0_68] : memref<16x128x128xbf16, #tpu.memory_space<vmem>>, vector<1x128x128xbf16>
    %68 = vector.shape_cast %67 : vector<1x128x128xbf16> to vector<128x128xbf16>
    %cst_69 = arith.constant dense<0.000000e+00> : vector<256x128xf32>
    %69 = tpu.matmul %66, %68, %cst_69 {dimension_numbers = #tpu.dot_dimension_numbers<[1], [0], [0], [1], [0, 0, 1, 1], [], []>} : vector<256x128xbf16>, vector<128x128xbf16>, vector<256x128xf32> -> vector<256x128xf32>
    %70 = arith.addf %64, %69 : vector<256x128xf32>
    %c0_70 = arith.constant 0 : index
    %c16_71 = arith.constant 16 : index
    %c0_72 = arith.constant 0 : index
    %71 = vector.load %arg6[%c0_70, %c16_71, %c0_72] : memref<1x272x128xbf16, #tpu.memory_space<vmem>>, vector<1x256x128xbf16>
    %72 = vector.shape_cast %71 : vector<1x256x128xbf16> to vector<256x128xbf16>
    %c12 = arith.constant 12 : index
    %c0_73 = arith.constant 0 : index
    %c0_74 = arith.constant 0 : index
    %73 = vector.load %arg10[%c12, %c0_73, %c0_74] : memref<16x128x128xbf16, #tpu.memory_space<vmem>>, vector<1x128x128xbf16>
    %74 = vector.shape_cast %73 : vector<1x128x128xbf16> to vector<128x128xbf16>
    %cst_75 = arith.constant dense<0.000000e+00> : vector<256x128xf32>
    %75 = tpu.matmul %72, %74, %cst_75 {dimension_numbers = #tpu.dot_dimension_numbers<[1], [0], [0], [1], [0, 0, 1, 1], [], []>} : vector<256x128xbf16>, vector<128x128xbf16>, vector<256x128xf32> -> vector<256x128xf32>
    %76 = arith.addf %70, %75 : vector<256x128xf32>
    %c0_76 = arith.constant 0 : index
    %c16_77 = arith.constant 16 : index
    %c0_78 = arith.constant 0 : index
    %77 = vector.load %arg8[%c0_76, %c16_77, %c0_78] : memref<1x272x128xbf16, #tpu.memory_space<vmem>>, vector<1x256x128xbf16>
    %78 = vector.shape_cast %77 : vector<1x256x128xbf16> to vector<256x128xbf16>
    %c13 = arith.constant 13 : index
    %c0_79 = arith.constant 0 : index
    %c0_80 = arith.constant 0 : index
    %79 = vector.load %arg10[%c13, %c0_79, %c0_80] : memref<16x128x128xbf16, #tpu.memory_space<vmem>>, vector<1x128x128xbf16>
    %80 = vector.shape_cast %79 : vector<1x128x128xbf16> to vector<128x128xbf16>
    %cst_81 = arith.constant dense<0.000000e+00> : vector<256x128xf32>
    %81 = tpu.matmul %78, %80, %cst_81 {dimension_numbers = #tpu.dot_dimension_numbers<[1], [0], [0], [1], [0, 0, 1, 1], [], []>} : vector<256x128xbf16>, vector<128x128xbf16>, vector<256x128xf32> -> vector<256x128xf32>
    %82 = arith.addf %76, %81 : vector<256x128xf32>
    %c0_82 = arith.constant 0 : index
    %c16_83 = arith.constant 16 : index
    %c0_84 = arith.constant 0 : index
    %83 = vector.load %arg7[%c0_82, %c16_83, %c0_84] : memref<1x272x128xbf16, #tpu.memory_space<vmem>>, vector<1x256x128xbf16>
    %84 = vector.shape_cast %83 : vector<1x256x128xbf16> to vector<256x128xbf16>
    %c14 = arith.constant 14 : index
    %c0_85 = arith.constant 0 : index
    %c0_86 = arith.constant 0 : index
    %85 = vector.load %arg10[%c14, %c0_85, %c0_86] : memref<16x128x128xbf16, #tpu.memory_space<vmem>>, vector<1x128x128xbf16>
    %86 = vector.shape_cast %85 : vector<1x128x128xbf16> to vector<128x128xbf16>
    %cst_87 = arith.constant dense<0.000000e+00> : vector<256x128xf32>
    %87 = tpu.matmul %84, %86, %cst_87 {dimension_numbers = #tpu.dot_dimension_numbers<[1], [0], [0], [1], [0, 0, 1, 1], [], []>} : vector<256x128xbf16>, vector<128x128xbf16>, vector<256x128xf32> -> vector<256x128xf32>
    %88 = arith.addf %82, %87 : vector<256x128xf32>
    %c0_88 = arith.constant 0 : index
    %c16_89 = arith.constant 16 : index
    %c0_90 = arith.constant 0 : index
    %89 = vector.load %arg9[%c0_88, %c16_89, %c0_90] : memref<1x272x128xbf16, #tpu.memory_space<vmem>>, vector<1x256x128xbf16>
    %90 = vector.shape_cast %89 : vector<1x256x128xbf16> to vector<256x128xbf16>
    %c15 = arith.constant 15 : index
    %c0_91 = arith.constant 0 : index
    %c0_92 = arith.constant 0 : index
    %91 = vector.load %arg10[%c15, %c0_91, %c0_92] : memref<16x128x128xbf16, #tpu.memory_space<vmem>>, vector<1x128x128xbf16>
    %92 = vector.shape_cast %91 : vector<1x128x128xbf16> to vector<128x128xbf16>
    %cst_93 = arith.constant dense<0.000000e+00> : vector<256x128xf32>
    %93 = tpu.matmul %90, %92, %cst_93 {dimension_numbers = #tpu.dot_dimension_numbers<[1], [0], [0], [1], [0, 0, 1, 1], [], []>} : vector<256x128xbf16>, vector<128x128xbf16>, vector<256x128xf32> -> vector<256x128xf32>
    %94 = arith.addf %88, %93 : vector<256x128xf32>
    %c0_94 = arith.constant 0 : index
    %c0_95 = arith.constant 0 : index
    %95 = vector.load %arg11[%c0_94, %c0_95] : memref<1x128xf32, #tpu.memory_space<vmem>>, vector<1x128xf32>
    %96 = vector.broadcast %95 : vector<1x128xf32> to vector<256x128xf32>
    %97 = arith.addf %94, %96 : vector<256x128xf32>
    %98 = arith.truncf %97 : vector<256x128xf32> to vector<256x128xbf16>
    %c0_96 = arith.constant 0 : index
    %c0_97 = arith.constant 0 : index
    %c0_98 = arith.constant 0 : index
    %99 = vector.load %arg12[%c0_96, %c0_97, %c0_98] : memref<1x256x128xbf16, #tpu.memory_space<vmem>>, vector<1x256x128xbf16>
    %100 = vector.shape_cast %99 : vector<1x256x128xbf16> to vector<256x128xbf16>
    %101 = vector.shape_cast %98 : vector<256x128xbf16> to vector<1x256x128xbf16>
    tpu.vector_store %arg12[%c0_96, %c0_97, %c0_98], %101 {strides = array<i32>} : memref<1x256x128xbf16, #tpu.memory_space<vmem>>, vector<1x256x128xbf16>,
    %cst_99 = arith.constant dense<0.000000e+00> : vector<128xf32>
    %102 = vector.multi_reduction <add>, %97, %cst_99 [0] : vector<256x128xf32> to vector<128xf32>
    %103 = vector.shape_cast %102 : vector<128xf32> to vector<1x128xf32>
    %104 = arith.mulf %97, %97 : vector<256x128xf32>
    %cst_100 = arith.constant dense<0.000000e+00> : vector<128xf32>
    %105 = vector.multi_reduction <add>, %104, %cst_100 [0] : vector<256x128xf32> to vector<128xf32>
    %106 = vector.shape_cast %105 : vector<128xf32> to vector<1x128xf32>
    %107 = tpu.concatenate %103, %106 in 0 : vector<1x128xf32>, vector<1x128xf32> -> vector<2x128xf32>
    %c0_101 = arith.constant 0 : index
    %c0_102 = arith.constant 0 : index
    %c0_103 = arith.constant 0 : index
    %108 = vector.load %arg13[%c0_101, %c0_102, %c0_103] : memref<1x2x128xf32, #tpu.memory_space<vmem>>, vector<1x2x128xf32>
    %109 = vector.shape_cast %108 : vector<1x2x128xf32> to vector<2x128xf32>
    %110 = vector.shape_cast %107 : vector<2x128xf32> to vector<1x2x128xf32>
    tpu.vector_store %arg13[%c0_101, %c0_102, %c0_103], %110 {strides = array<i32>} : memref<1x2x128xf32, #tpu.memory_space<vmem>>, vector<1x2x128xf32>,
    return
  }
  func.func @transform_0(%arg0: i32, %arg1: i32) -> (i32, i32, i32) {
    %c0_i32 = arith.constant 0 : i32
    %c0_i32_0 = arith.constant 0 : i32
    %c0_i32_1 = arith.constant 0 : i32
    return %arg1, %c0_i32, %c0_i32_0 : i32, i32, i32
  }
  func.func @transform_1(%arg0: i32, %arg1: i32) -> (i32, i32, i32) {
    %c0_i32 = arith.constant 0 : i32
    %c0_i32_0 = arith.constant 0 : i32
    %c0_i32_1 = arith.constant 0 : i32
    return %arg1, %c0_i32, %c0_i32_0 : i32, i32, i32
  }
  func.func @transform_2(%arg0: i32, %arg1: i32) -> (i32, i32, i32) {
    %c0_i32 = arith.constant 0 : i32
    %c0_i32_0 = arith.constant 0 : i32
    %c0_i32_1 = arith.constant 0 : i32
    return %arg1, %c0_i32, %c0_i32_0 : i32, i32, i32
  }
  func.func @transform_3(%arg0: i32, %arg1: i32) -> (i32, i32, i32) {
    %c0_i32 = arith.constant 0 : i32
    %c0_i32_0 = arith.constant 0 : i32
    %c0_i32_1 = arith.constant 0 : i32
    return %arg1, %c0_i32, %c0_i32_0 : i32, i32, i32
  }
  func.func @transform_4(%arg0: i32, %arg1: i32) -> (i32, i32, i32) {
    %c0_i32 = arith.constant 0 : i32
    %c0_i32_0 = arith.constant 0 : i32
    %c0_i32_1 = arith.constant 0 : i32
    return %arg1, %c0_i32, %c0_i32_0 : i32, i32, i32
  }
  func.func @transform_5(%arg0: i32, %arg1: i32) -> (i32, i32, i32) {
    %c0_i32 = arith.constant 0 : i32
    %c0_i32_0 = arith.constant 0 : i32
    %c0_i32_1 = arith.constant 0 : i32
    return %arg1, %c0_i32, %c0_i32_0 : i32, i32, i32
  }
  func.func @transform_6(%arg0: i32, %arg1: i32) -> (i32, i32, i32) {
    %c0_i32 = arith.constant 0 : i32
    %c0_i32_0 = arith.constant 0 : i32
    %c0_i32_1 = arith.constant 0 : i32
    return %arg1, %c0_i32, %c0_i32_0 : i32, i32, i32
  }
  func.func @transform_7(%arg0: i32, %arg1: i32) -> (i32, i32, i32) {
    %c0_i32 = arith.constant 0 : i32
    %c0_i32_0 = arith.constant 0 : i32
    %c0_i32_1 = arith.constant 0 : i32
    return %arg1, %c0_i32, %c0_i32_0 : i32, i32, i32
  }
  func.func @transform_8(%arg0: i32, %arg1: i32) -> (i32, i32, i32) {
    %c0_i32 = arith.constant 0 : i32
    %c0_i32_0 = arith.constant 0 : i32
    %c0_i32_1 = arith.constant 0 : i32
    return %c0_i32, %c0_i32_0, %arg0 : i32, i32, i32
  }
  func.func @transform_9(%arg0: i32, %arg1: i32) -> (i32, i32) {
    %c0_i32 = arith.constant 0 : i32
    %c0_i32_0 = arith.constant 0 : i32
    return %c0_i32, %arg0 : i32, i32
  }
  func.func @transform_10(%arg0: i32, %arg1: i32) -> (i32, i32, i32) {
    %c0_i32 = arith.constant 0 : i32
    %c0_i32_0 = arith.constant 0 : i32
    return %arg1, %c0_i32, %arg0 : i32, i32, i32
  }
  func.func @transform_11(%arg0: i32, %arg1: i32) -> (i32, i32, i32) {
    %c0_i32 = arith.constant 0 : i32
    %c0_i32_0 = arith.constant 0 : i32
    return %arg1, %c0_i32, %arg0 : i32, i32, i32
  }
}

module attributes {stable_mosaic.version = 11 : i64} {
  func.func @kernel(%arg0: i32, %arg1: i32, %arg2: memref<128x2048xbf16, #tpu.memory_space<vmem>>, %arg3: memref<2048x128xbf16, #tpu.memory_space<vmem>>, %arg4: memref<1x128xf32, #tpu.memory_space<vmem>>, %arg5: memref<128x128xbf16, #tpu.memory_space<vmem>>, %arg6: memref<1x2x128xf32, #tpu.memory_space<vmem>>) attributes {dimension_semantics = [#tpu.dimension_semantics<parallel>, #tpu.dimension_semantics<parallel>], iteration_bounds = array<i64: 1, 1>, scalar_prefetch = 0 : i64, scratch_operands = 0 : i64, tpu.core_type = #tpu.core_type<tc>, window_params = [{transform_indices = @transform_0, window_bounds = array<i64: 128, 2048>}, {transform_indices = @transform_1, window_bounds = array<i64: 2048, 128>}, {transform_indices = @transform_2, window_bounds = array<i64: 1, 128>}, {transform_indices = @transform_3, window_bounds = array<i64: 128, 128>}, {transform_indices = @transform_4, window_bounds = array<i64: 1, 2, 128>}]} {
    %c0 = arith.constant 0 : index
    %c0_0 = arith.constant 0 : index
    %0 = vector.load %arg2[%c0, %c0_0] : memref<128x2048xbf16, #tpu.memory_space<vmem>>, vector<128x2048xbf16>
    %c0_1 = arith.constant 0 : index
    %c0_2 = arith.constant 0 : index
    %1 = vector.load %arg3[%c0_1, %c0_2] : memref<2048x128xbf16, #tpu.memory_space<vmem>>, vector<2048x128xbf16>
    %cst = arith.constant dense<0.000000e+00> : vector<128x128xf32>
    %2 = tpu.matmul %0, %1, %cst {dimension_numbers = #tpu.dot_dimension_numbers<[1], [0], [0], [1], [0, 0, 1, 1], [], []>} : vector<128x2048xbf16>, vector<2048x128xbf16>, vector<128x128xf32> -> vector<128x128xf32>
    %c0_3 = arith.constant 0 : index
    %c0_4 = arith.constant 0 : index
    %3 = vector.load %arg4[%c0_3, %c0_4] : memref<1x128xf32, #tpu.memory_space<vmem>>, vector<1x128xf32>
    %4 = vector.broadcast %3 : vector<1x128xf32> to vector<128x128xf32>
    %5 = arith.addf %2, %4 : vector<128x128xf32>
    %6 = arith.truncf %5 : vector<128x128xf32> to vector<128x128xbf16>
    %c0_5 = arith.constant 0 : index
    %c0_6 = arith.constant 0 : index
    %7 = vector.load %arg5[%c0_5, %c0_6] : memref<128x128xbf16, #tpu.memory_space<vmem>>, vector<128x128xbf16>
    tpu.vector_store %arg5[%c0_5, %c0_6], %6 {strides = array<i32>} : memref<128x128xbf16, #tpu.memory_space<vmem>>, vector<128x128xbf16>,
    %cst_7 = arith.constant dense<0.000000e+00> : vector<128xf32>
    %8 = vector.multi_reduction <add>, %5, %cst_7 [0] : vector<128x128xf32> to vector<128xf32>
    %9 = vector.shape_cast %8 : vector<128xf32> to vector<1x128xf32>
    %10 = arith.mulf %5, %5 : vector<128x128xf32>
    %cst_8 = arith.constant dense<0.000000e+00> : vector<128xf32>
    %11 = vector.multi_reduction <add>, %10, %cst_8 [0] : vector<128x128xf32> to vector<128xf32>
    %12 = vector.shape_cast %11 : vector<128xf32> to vector<1x128xf32>
    %13 = tpu.concatenate %9, %12 in 0 : vector<1x128xf32>, vector<1x128xf32> -> vector<2x128xf32>
    %c0_9 = arith.constant 0 : index
    %c0_10 = arith.constant 0 : index
    %c0_11 = arith.constant 0 : index
    %14 = vector.load %arg6[%c0_9, %c0_10, %c0_11] : memref<1x2x128xf32, #tpu.memory_space<vmem>>, vector<1x2x128xf32>
    %15 = vector.shape_cast %14 : vector<1x2x128xf32> to vector<2x128xf32>
    %16 = vector.shape_cast %13 : vector<2x128xf32> to vector<1x2x128xf32>
    tpu.vector_store %arg6[%c0_9, %c0_10, %c0_11], %16 {strides = array<i32>} : memref<1x2x128xf32, #tpu.memory_space<vmem>>, vector<1x2x128xf32>,
    return
  }
  func.func @transform_0(%arg0: i32, %arg1: i32) -> (i32, i32) {
    %c0_i32 = arith.constant 0 : i32
    %c0_i32_0 = arith.constant 0 : i32
    return %arg1, %c0_i32 : i32, i32
  }
  func.func @transform_1(%arg0: i32, %arg1: i32) -> (i32, i32) {
    %c0_i32 = arith.constant 0 : i32
    %c0_i32_0 = arith.constant 0 : i32
    return %c0_i32, %arg0 : i32, i32
  }
  func.func @transform_2(%arg0: i32, %arg1: i32) -> (i32, i32) {
    %c0_i32 = arith.constant 0 : i32
    %c0_i32_0 = arith.constant 0 : i32
    return %c0_i32, %arg0 : i32, i32
  }
  func.func @transform_3(%arg0: i32, %arg1: i32) -> (i32, i32) {
    %c0_i32 = arith.constant 0 : i32
    return %arg1, %arg0 : i32, i32
  }
  func.func @transform_4(%arg0: i32, %arg1: i32) -> (i32, i32, i32) {
    %c0_i32 = arith.constant 0 : i32
    %c0_i32_0 = arith.constant 0 : i32
    return %arg1, %c0_i32, %arg0 : i32, i32, i32
  }
}

module attributes {stable_mosaic.version = 11 : i64} {
  func.func @kernel(%arg0: i32, %arg1: i32, %arg2: memref<32x2048xbf16, #tpu.memory_space<vmem>>, %arg3: memref<2048x128xbf16, #tpu.memory_space<vmem>>, %arg4: memref<1x128xf32, #tpu.memory_space<vmem>>, %arg5: memref<32x128xbf16, #tpu.memory_space<vmem>>, %arg6: memref<1x2x128xf32, #tpu.memory_space<vmem>>) attributes {dimension_semantics = [#tpu.dimension_semantics<parallel>, #tpu.dimension_semantics<parallel>], iteration_bounds = array<i64: 1, 1>, scalar_prefetch = 0 : i64, scratch_operands = 0 : i64, tpu.core_type = #tpu.core_type<tc>, window_params = [{transform_indices = @transform_0, window_bounds = array<i64: 32, 2048>}, {transform_indices = @transform_1, window_bounds = array<i64: 2048, 128>}, {transform_indices = @transform_2, window_bounds = array<i64: 1, 128>}, {transform_indices = @transform_3, window_bounds = array<i64: 32, 128>}, {transform_indices = @transform_4, window_bounds = array<i64: 1, 2, 128>}]} {
    %c0 = arith.constant 0 : index
    %c0_0 = arith.constant 0 : index
    %0 = vector.load %arg2[%c0, %c0_0] : memref<32x2048xbf16, #tpu.memory_space<vmem>>, vector<32x2048xbf16>
    %c0_1 = arith.constant 0 : index
    %c0_2 = arith.constant 0 : index
    %1 = vector.load %arg3[%c0_1, %c0_2] : memref<2048x128xbf16, #tpu.memory_space<vmem>>, vector<2048x128xbf16>
    %cst = arith.constant dense<0.000000e+00> : vector<32x128xf32>
    %2 = tpu.matmul %0, %1, %cst {dimension_numbers = #tpu.dot_dimension_numbers<[1], [0], [0], [1], [0, 0, 1, 1], [], []>} : vector<32x2048xbf16>, vector<2048x128xbf16>, vector<32x128xf32> -> vector<32x128xf32>
    %c0_3 = arith.constant 0 : index
    %c0_4 = arith.constant 0 : index
    %3 = vector.load %arg4[%c0_3, %c0_4] : memref<1x128xf32, #tpu.memory_space<vmem>>, vector<1x128xf32>
    %4 = vector.broadcast %3 : vector<1x128xf32> to vector<32x128xf32>
    %5 = arith.addf %2, %4 : vector<32x128xf32>
    %6 = arith.truncf %5 : vector<32x128xf32> to vector<32x128xbf16>
    %c0_5 = arith.constant 0 : index
    %c0_6 = arith.constant 0 : index
    %7 = vector.load %arg5[%c0_5, %c0_6] : memref<32x128xbf16, #tpu.memory_space<vmem>>, vector<32x128xbf16>
    tpu.vector_store %arg5[%c0_5, %c0_6], %6 {strides = array<i32>} : memref<32x128xbf16, #tpu.memory_space<vmem>>, vector<32x128xbf16>,
    %cst_7 = arith.constant dense<0.000000e+00> : vector<128xf32>
    %8 = vector.multi_reduction <add>, %5, %cst_7 [0] : vector<32x128xf32> to vector<128xf32>
    %9 = vector.shape_cast %8 : vector<128xf32> to vector<1x128xf32>
    %10 = arith.mulf %5, %5 : vector<32x128xf32>
    %cst_8 = arith.constant dense<0.000000e+00> : vector<128xf32>
    %11 = vector.multi_reduction <add>, %10, %cst_8 [0] : vector<32x128xf32> to vector<128xf32>
    %12 = vector.shape_cast %11 : vector<128xf32> to vector<1x128xf32>
    %13 = tpu.concatenate %9, %12 in 0 : vector<1x128xf32>, vector<1x128xf32> -> vector<2x128xf32>
    %c0_9 = arith.constant 0 : index
    %c0_10 = arith.constant 0 : index
    %c0_11 = arith.constant 0 : index
    %14 = vector.load %arg6[%c0_9, %c0_10, %c0_11] : memref<1x2x128xf32, #tpu.memory_space<vmem>>, vector<1x2x128xf32>
    %15 = vector.shape_cast %14 : vector<1x2x128xf32> to vector<2x128xf32>
    %16 = vector.shape_cast %13 : vector<2x128xf32> to vector<1x2x128xf32>
    tpu.vector_store %arg6[%c0_9, %c0_10, %c0_11], %16 {strides = array<i32>} : memref<1x2x128xf32, #tpu.memory_space<vmem>>, vector<1x2x128xf32>,
    return
  }
  func.func @transform_0(%arg0: i32, %arg1: i32) -> (i32, i32) {
    %c0_i32 = arith.constant 0 : i32
    %c0_i32_0 = arith.constant 0 : i32
    return %arg1, %c0_i32 : i32, i32
  }
  func.func @transform_1(%arg0: i32, %arg1: i32) -> (i32, i32) {
    %c0_i32 = arith.constant 0 : i32
    %c0_i32_0 = arith.constant 0 : i32
    return %c0_i32, %arg0 : i32, i32
  }
  func.func @transform_2(%arg0: i32, %arg1: i32) -> (i32, i32) {
    %c0_i32 = arith.constant 0 : i32
    %c0_i32_0 = arith.constant 0 : i32
    return %c0_i32, %arg0 : i32, i32
  }
  func.func @transform_3(%arg0: i32, %arg1: i32) -> (i32, i32) {
    %c0_i32 = arith.constant 0 : i32
    return %arg1, %arg0 : i32, i32
  }
  func.func @transform_4(%arg0: i32, %arg1: i32) -> (i32, i32, i32) {
    %c0_i32 = arith.constant 0 : i32
    %c0_i32_0 = arith.constant 0 : i32
    return %arg1, %c0_i32, %arg0 : i32, i32, i32
  }
}

</mosaic_0001>

<bundles_post_ra>
// kernel: _forward.4
= control target key start
LH: loop header
LB: loop body
LE: loop exit
PB: predicated region body
PF: predicated region fallthrough
CT: control target
= control target key end

     0   :  { %s1321_s12 = smov 0   ;;  %s1323_s13 = smov 0   ;;  %s1464_s0 = inlined_call_operand.vmem [shape: bf16[2048,128], index: 0, kind: input, shape index: {}]   ;;  %s1465_s1 = inlined_call_operand.vmem [shape: bf16[128,128], index: 1, kind: input, shape index: {}]   ;;  %s1466_s2 = inlined_call_operand.vmem [shape: f32[1,128], index: 2, kind: input, shape index: {}]   ;;  %s1467_s3 = inlined_call_operand.vmem [shape: bf16[2048,128], index: 3, kind: output, shape index: {}]  }
   0x1   :  { %s1325_s14 = smov 0  }
   0x2 LB: > { %s22_s15 = sadd.s32 1, %s1295_s13  ;;  %p950_p0 = scmp.ge.s32.totalorder %s1299_s14, 1  ;;  %s1299_s14 = sphi %s1325_s14, %s13_s14   ;;  %s1295_s13 = sphi %s1323_s13, %s1469_s13   ;;  %s1291_s12 = sphi %s1321_s12, %s1468_s12  }
   0x3   : > { %p23_p1 = scmp.ge.s32.totalorder %s22_s15, 8  ;;  %p169_p2 = scmp.lt.s32.totalorder %s1299_s14, 9 }
   0x5   : > { %s1471_s15 = smov (%p23_p1, %s22_s15), 0  ;;  %p170_p3 = pnand %p950_p0, %p169_p2 }
   0x6   : > { %v1253_v0 = vld [vmem:[%s1465_s1] sm:$0xff] (!%p170_p3)   ;;  %s951_s18 = sshll.u32 (!%p170_p3), %s1291_s12, 5  ;;  %v1254_v1 = vld [vmem:[%s1465_s1 + $0x8] sm:$0xff] (!%p170_p3)   ;;  %v1255_v2 = vld [vmem:[%s1465_s1 + $0x10] sm:$0xff] (!%p170_p3)  }
   0x7   : > { %173 = sbr.rel (%p170_p3) target bundleno = 294 (0x126), region = 32  ;;  %p204_p4 = scmp.lt.s32.totalorder (!%p170_p3), %s951_s18, 255  ;;  %1165 = vmatprep.subr.bf16.mxu0 (!%p170_p3), %v1253_v0  ;;  %1213 = vmatprep.subr.bf16.mxu1 (!%p170_p3), %v1253_v0  ;;  %v1256_v3 = vld [vmem:[%s1465_s1 + $0x18] sm:$0xff] (!%p170_p3)   ;;  %v1257_v6 = vld [vmem:[%s1465_s1 + $0x20] sm:$0xff] (!%p170_p3)   ;;  %v1258_v7 = vld [vmem:[%s1465_s1 + $0x28] sm:$0xff] (!%p170_p3)  }
   0x8   : > { %1166 = vmatpush3.bf16.msra.mxu0 (!%p170_p3), %v1253_v0  ;;  %1221 = vmatpush3.bf16.msra.mxu1 (!%p170_p3), %v1253_v0  ;;  %v1259_v8 = vld [vmem:[%s1465_s1 + $0x30] sm:$0xff] (!%p170_p3)   ;;  %v1260_v9 = vld [vmem:[%s1465_s1 + $0x38] sm:$0xff] (!%p170_p3)   ;;  %v1392_v24 = vld [vmem:[%s1466_s2] ss:$0 sm:$0xff] (!%p170_p3) }
   0x9   : > { %1167 = vmatprep.subr.bf16.mxu0 (!%p170_p3), %v1254_v1  ;;  %1214 = vmatprep.subr.bf16.mxu1 (!%p170_p3), %v1254_v1 }
   0xc   : > { %1168 = vmatpush3.bf16.msra.mxu0 (!%p170_p3), %v1254_v1  ;;  %1222 = vmatpush3.bf16.msra.mxu1 (!%p170_p3), %v1254_v1 }
   0xd   : > { %1169 = vmatprep.subr.bf16.mxu0 (!%p170_p3), %v1255_v2  ;;  %1215 = vmatprep.subr.bf16.mxu1 (!%p170_p3), %v1255_v2 }
   0xe   : > { %s1473_s18 = smov (!%p204_p4, %s951_s18), 255 }
   0xf   : > { %s952_s23 = sshll.u32 %s1473_s18, 2 }
  0x10   : > { %s1356_s26 = scalar_lea.vmem %s1464_s0, %s952_s23  ;;  %1170 = vmatpush3.bf16.msra.mxu0 %v1255_v2  ;;  %1223 = vmatpush3.bf16.msra.mxu1 %v1255_v2  ;;  %s1409_s17 = scalar_lea.vmem %s1467_s3, %s952_s23 }
  0x11   : > { %v1261_v4 = vld [vmem:[%s1356_s26] sm:$0xff]   ;;  %1171 = vmatprep.subr.bf16.mxu0 %v1256_v3  ;;  %1216 = vmatprep.subr.bf16.mxu1 %v1256_v3  ;;  %v1263_v10 = vld [vmem:[%s1356_s26 + $0x8] sm:$0xff]   ;;  %v1265_v12 = vld [vmem:[%s1356_s26 + $0x10] sm:$0xff]  }
  0x12   : > { %v1262_v5 = vld [vmem:[%s1356_s26 + $0x40] sm:$0xff]   ;;  %1181 = vmatprep.mubr.bf16.mxu0 %v1261_v4  ;;  %v1264_v11 = vld [vmem:[%s1356_s26 + $0x48] sm:$0xff]   ;;  %v1266_v13 = vld [vmem:[%s1356_s26 + $0x50] sm:$0xff]  }
  0x13   : > { %1197 = vmatprep.mubr.bf16.mxu1 %v1262_v5  ;;  %v1267_v14 = vld [vmem:[%s1356_s26 + $0x18] sm:$0xff]   ;;  %v1269_v16 = vld [vmem:[%s1356_s26 + $0x20] sm:$0xff]   ;;  %v1271_v18 = vld [vmem:[%s1356_s26 + $0x28] sm:$0xff]  }
  0x14   : > { %1172 = vmatpush3.bf16.msra.mxu0 %v1256_v3  ;;  %1224 = vmatpush3.bf16.msra.mxu1 %v1256_v3  ;;  %v1268_v15 = vld [vmem:[%s1356_s26 + $0x58] sm:$0xff]   ;;  %v1270_v17 = vld [vmem:[%s1356_s26 + $0x60] sm:$0xff]   ;;  %v1272_v19 = vld [vmem:[%s1356_s26 + $0x68] sm:$0xff]  }
  0x15   : > { %1173 = vmatprep.subr.bf16.mxu0 %v1257_v6  ;;  %1217 = vmatprep.subr.bf16.mxu1 %v1257_v6  ;;  %v1273_v20 = vld [vmem:[%s1356_s26 + $0x30] sm:$0xff]   ;;  %v1275_v22 = vld [vmem:[%s1356_s26 + $0x38] sm:$0xff]  }
  0x16   : > { %v1274_v21 = vld [vmem:[%s1356_s26 + $0x70] sm:$0xff]   ;;  %v1276_v23 = vld [vmem:[%s1356_s26 + $0x78] sm:$0xff]  }
  0x18   : > { %1174 = vmatpush3.bf16.msra.mxu0 %v1257_v6  ;;  %1225 = vmatpush3.bf16.msra.mxu1 %v1257_v6 }
  0x19   : > { %1175 = vmatprep.subr.bf16.mxu0 %v1258_v7  ;;  %1218 = vmatprep.subr.bf16.mxu1 %v1258_v7 }
  0x1c   : > { %1176 = vmatpush3.bf16.msra.mxu0 %v1258_v7  ;;  %1226 = vmatpush3.bf16.msra.mxu1 %v1258_v7 }
  0x1d   : > { %1177 = vmatprep.subr.bf16.mxu0 %v1259_v8  ;;  %1219 = vmatprep.subr.bf16.mxu1 %v1259_v8 }
  0x20   : > { %1178 = vmatpush3.bf16.msra.mxu0 %v1259_v8  ;;  %1227 = vmatpush3.bf16.msra.mxu1 %v1259_v8 }
  0x21   : > { %1179 = vmatprep.subr.bf16.mxu0 %v1260_v9  ;;  %1220 = vmatprep.subr.bf16.mxu1 %v1260_v9 }
  0x24   : > { %1180 = vmatpush3.bf16.msra.mxu0 %v1260_v9  ;;  %1228 = vmatpush3.bf16.msra.mxu1 %v1260_v9 }
  0x27   : > { %1182 = vmatmul.mubr.bf16.vlgmr.msra.gmra.mrb[0].mxu0 %v1263_v10  ;;  %1198 = vmatmul.mubr.bf16.vlgmr.msra.gmra.mrb[0].mxu1 %v1264_v11 }
  0x28   : > { %1185 = vmatprep.mubr.bf16.mxu0 %v1265_v12  ;;  %1201 = vmatprep.mubr.bf16.mxu1 %v1266_v13 }
  0x2f   : > { %1186 = vmatmul.mubr.bf16.gmra.mrb[4].mxu0 %v1267_v14  ;;  %1202 = vmatmul.mubr.bf16.gmra.mrb[4].mxu1 %v1268_v15 }
  0x30   : > { %1189 = vmatprep.mubr.bf16.mxu0 %v1269_v16  ;;  %1205 = vmatprep.mubr.bf16.mxu1 %v1270_v17 }
  0x37   : > { %1190 = vmatmul.mubr.bf16.gmra.mrb[8].mxu0 %v1271_v18  ;;  %1206 = vmatmul.mubr.bf16.gmra.mrb[8].mxu1 %v1272_v19 }
  0x38   : > { %1193 = vmatprep.mubr.bf16.mxu0 %v1273_v20  ;;  %1209 = vmatprep.mubr.bf16.mxu1 %v1274_v21 }
  0x3f   : > { %1194 = vmatmul.mubr.bf16.gmra.mrb[12].mxu0 %v1275_v22  ;;  %1210 = vmatmul.mubr.bf16.gmra.mrb[12].mxu1 %v1276_v23 }
  0xfa   : > { %v1183_v25 = vpop.f32.mrb[0].mxu0  ;;  %v1199_v26 = vpop.f32.mrb[0].mxu1 }
  0xfb   : > { %v468_v27 = vadd.f32 %v1183_v25, %v1392_v24  ;;  %v532_v28 = vadd.f32 %v1199_v26, %v1392_v24  ;;  %v459_v29 = vpop.f32.mrb[1].mxu0  ;;  %v523_v30 = vpop.f32.mrb[1].mxu1 }
  0xfc   : > { %v460_v31 = vadd.f32 %v1392_v24, %v459_v29  ;;  %v524_v32 = vadd.f32 %v1392_v24, %v523_v30  ;;  %v1184_v33 = vpop.f32.mrb[2].mxu0  ;;  %v1200_v34 = vpop.f32.mrb[2].mxu1 }
  0xfd   : > { %vm588_vm0 = vcmp.gt.f32.partialorder %v468_v27, 0.0  ;;  %v620_v35 = vmul.f32 0.2, %v468_v27  ;;  %vm604_vm1 = vcmp.gt.f32.partialorder %v532_v28, 0.0  ;;  %v636_v36 = vmul.f32 0.2, %v532_v28 }
  0xfe   : > { %vm586_vm2 = vcmp.gt.f32.partialorder %v460_v31, 0.0  ;;  %v618_v37 = vmul.f32 0.2, %v460_v31  ;;  %vm602_vm3 = vcmp.gt.f32.partialorder %v524_v32, 0.0  ;;  %v634_v38 = vmul.f32 0.2, %v524_v32 }
  0xff   : > { %v471_v39 = vadd.f32 %v1184_v33, %v1392_v24  ;;  %v535_v40 = vadd.f32 %v1200_v34, %v1392_v24  ;;  %v462_v41 = vpop.f32.mrb[3].mxu0  ;;  %v526_v42 = vpop.f32.mrb[3].mxu1  ;;  %v652_v43 = vsel %vm588_vm0, %v468_v27, %v620_v35  ;;  %v668_v44 = vsel %vm604_vm1, %v532_v28, %v636_v36 }
 0x100   : > { %v463_v45 = vadd.f32 %v1392_v24, %v462_v41  ;;  %v527_v46 = vadd.f32 %v1392_v24, %v526_v42  ;;  %v650_v51 = vsel %vm586_vm2, %v460_v31, %v618_v37  ;;  %v666_v52 = vsel %vm602_vm3, %v524_v32, %v634_v38 }
 0x101   : > { %vm589_vm4 = vcmp.gt.f32.partialorder %v471_v39, 0.0  ;;  %v621_v47 = vmul.f32 0.2, %v471_v39  ;;  %vm605_vm5 = vcmp.gt.f32.partialorder %v535_v40, 0.0  ;;  %v637_v48 = vmul.f32 0.2, %v535_v40 }
 0x102   : > { %vm587_vm6 = vcmp.gt.f32.partialorder %v463_v45, 0.0  ;;  %v619_v49 = vmul.f32 0.2, %v463_v45  ;;  %vm603_vm7 = vcmp.gt.f32.partialorder %v527_v46, 0.0  ;;  %v635_v50 = vmul.f32 0.2, %v527_v46 }
 0x103   : > { %v653_v53 = vsel %vm589_vm4, %v471_v39, %v621_v47  ;;  %v669_v54 = vsel %vm605_vm5, %v535_v40, %v637_v48  ;;  %v1187_v55 = vpop.f32.mrb[4].mxu0  ;;  %v1203_v56 = vpop.f32.mrb[4].mxu1 }
 0x104   : > { %v1054_v57 = vpack.c.bf16 %v653_v53, %v652_v43  ;;  %v1094_v58 = vpack.c.bf16 %v669_v54, %v668_v44  ;;  %v651_v59 = vsel %vm587_vm6, %v463_v45, %v619_v49  ;;  %v667_v60 = vsel %vm603_vm7, %v527_v46, %v635_v50  ;;  %v475_v61 = vpop.f32.mrb[5].mxu0  ;;  %v539_v62 = vpop.f32.mrb[5].mxu1 }
 0x105   : > { %v1049_v63 = vpack.c.bf16 %v651_v59, %v650_v51  ;;  %v1089_v0 = vpack.c.bf16 %v667_v60, %v666_v52  ;;  %v484_v1 = vadd.f32 %v1187_v55, %v1392_v24  ;;  %v548_v2 = vadd.f32 %v1203_v56, %v1392_v24  ;;  %v1188_v3 = vpop.f32.mrb[6].mxu0  ;;  %v1204_v4 = vpop.f32.mrb[6].mxu1 }
 0x106   : > { %1126 = vst [vmem:[%s1409_s17 + $0x8] sm:$0xff] %v1054_v57   ;;  %1134 = vst [vmem:[%s1409_s17 + $0x48] sm:$0xff] %v1094_v58   ;;  %v476_v5 = vadd.f32 %v1392_v24, %v475_v61  ;;  %v540_v6 = vadd.f32 %v1392_v24, %v539_v62  ;;  %v487_v7 = vadd.f32 %v1188_v3, %v1392_v24  ;;  %v478_v9 = vpop.f32.mrb[7].mxu0  ;;  %v542_v10 = vpop.f32.mrb[7].mxu1 }
 0x107   : > { %v551_v8 = vadd.f32 %v1204_v4, %v1392_v24  ;;  %1050 = vst [vmem:[%s1409_s17] sm:$0xff] %v1049_v63   ;;  %1133 = vst [vmem:[%s1409_s17 + $0x40] sm:$0xff] %v1089_v0   ;;  %vm592_vm8 = vcmp.gt.f32.partialorder %v484_v1, 0.0  ;;  %v624_v11 = vmul.f32 0.2, %v484_v1  ;;  %vm608_vm9 = vcmp.gt.f32.partialorder %v548_v2, 0.0 }
 0x108   : > { %v640_v12 = vmul.f32 0.2, %v548_v2  ;;  %vm590_vm10 = vcmp.gt.f32.partialorder %v476_v5, 0.0  ;;  %v622_v13 = vmul.f32 0.2, %v476_v5  ;;  %vm606_vm11 = vcmp.gt.f32.partialorder %v540_v6, 0.0 }
 0x109   : > { %v656_v14 = vsel %vm592_vm8, %v484_v1, %v624_v11  ;;  %v638_v15 = vmul.f32 0.2, %v540_v6  ;;  %vm593_vm12 = vcmp.gt.f32.partialorder %v487_v7, 0.0  ;;  %v625_v16 = vmul.f32 0.2, %v487_v7 }
 0x10a   : > { %v672_v17 = vsel %vm608_vm9, %v548_v2, %v640_v12  ;;  %v654_v18 = vsel %vm590_vm10, %v476_v5, %v622_v13  ;;  %vm609_vm13 = vcmp.gt.f32.partialorder %v551_v8, 0.0  ;;  %v641_v19 = vmul.f32 0.2, %v551_v8  ;;  %v1191_v20 = vpop.f32.mrb[8].mxu0  ;;  %v1207_v21 = vpop.f32.mrb[8].mxu1 }
 0x10b   : > { %v657_v22 = vsel %vm593_vm12, %v487_v7, %v625_v16  ;;  %v479_v23 = vadd.f32 %v1392_v24, %v478_v9  ;;  %v543_v25 = vadd.f32 %v1392_v24, %v542_v10  ;;  %v500_v26 = vadd.f32 %v1191_v20, %v1392_v24  ;;  %v491_v27 = vpop.f32.mrb[9].mxu0  ;;  %v555_v28 = vpop.f32.mrb[9].mxu1 }
 0x10c   : > { %v1064_v29 = vpack.c.bf16 %v657_v22, %v656_v14  ;;  %v673_v30 = vsel %vm609_vm13, %v551_v8, %v641_v19  ;;  %v564_v31 = vadd.f32 %v1207_v21, %v1392_v24  ;;  %v492_v32 = vadd.f32 %v1392_v24, %v491_v27  ;;  %v1192_v33 = vpop.f32.mrb[10].mxu0  ;;  %v1208_v34 = vpop.f32.mrb[10].mxu1 }
 0x10d   : > { %v1104_v35 = vpack.c.bf16 %v673_v30, %v672_v17  ;;  %vm591_vm14 = vcmp.gt.f32.partialorder %v479_v23, 0.0  ;;  %v623_v36 = vmul.f32 0.2, %v479_v23  ;;  %vm607_vm15 = vcmp.gt.f32.partialorder %v543_v25, 0.0  ;;  %v494_v37 = vpop.f32.mrb[11].mxu0  ;;  %v558_v38 = vpop.f32.mrb[11].mxu1 }
 0x10e   : > { %1128 = vst [vmem:[%s1409_s17 + $0x18] sm:$0xff] %v1064_v29   ;;  %v639_v39 = vmul.f32 0.2, %v543_v25  ;;  %vm596_vm0 = vcmp.gt.f32.partialorder %v500_v26, 0.0  ;;  %v628_v40 = vmul.f32 0.2, %v500_v26  ;;  %v670_v41 = vsel %vm606_vm11, %v540_v6, %v638_v15 }
 0x10f   : > { %vm612_vm1 = vcmp.gt.f32.partialorder %v564_v31, 0.0  ;;  %1136 = vst [vmem:[%s1409_s17 + $0x58] sm:$0xff] %v1104_v35   ;;  %v655_v42 = vsel %vm591_vm14, %v479_v23, %v623_v36  ;;  %v644_v43 = vmul.f32 0.2, %v564_v31  ;;  %vm594_vm2 = vcmp.gt.f32.partialorder %v492_v32, 0.0 }
 0x110   : > { %v1059_v44 = vpack.c.bf16 %v655_v42, %v654_v18  ;;  %v671_v45 = vsel %vm607_vm15, %v543_v25, %v639_v39  ;;  %v626_v46 = vmul.f32 0.2, %v492_v32  ;;  %v556_v47 = vadd.f32 %v1392_v24, %v555_v28 }
 0x111   : > { %v1099_v48 = vpack.c.bf16 %v671_v45, %v670_v41  ;;  %v660_v49 = vsel %vm596_vm0, %v500_v26, %v628_v40  ;;  %v676_v50 = vsel %vm612_vm1, %v564_v31, %v644_v43  ;;  %v503_v51 = vadd.f32 %v1192_v33, %v1392_v24 }
 0x112   : > { %1127 = vst [vmem:[%s1409_s17 + $0x10] sm:$0xff] %v1059_v44   ;;  %vm610_vm3 = vcmp.gt.f32.partialorder %v556_v47, 0.0  ;;  %v642_v52 = vmul.f32 0.2, %v556_v47  ;;  %v567_v53 = vadd.f32 %v1208_v34, %v1392_v24  ;;  %v495_v54 = vadd.f32 %v1392_v24, %v494_v37  ;;  %v1195_v55 = vpop.f32.mrb[12].mxu0  ;;  %v1211_v56 = vpop.f32.mrb[12].mxu1 }
 0x113   : > { %1135 = vst [vmem:[%s1409_s17 + $0x50] sm:$0xff] %v1099_v48   ;;  %vm597_vm4 = vcmp.gt.f32.partialorder %v503_v51, 0.0  ;;  %v629_v57 = vmul.f32 0.2, %v503_v51  ;;  %v559_v58 = vadd.f32 %v1392_v24, %v558_v38  ;;  %v516_v59 = vadd.f32 %v1195_v55, %v1392_v24  ;;  %v507_v60 = vpop.f32.mrb[13].mxu0  ;;  %v571_v61 = vpop.f32.mrb[13].mxu1 }
 0x114   : > { %v658_v62 = vsel %vm594_vm2, %v492_v32, %v626_v46  ;;  %vm613_vm5 = vcmp.gt.f32.partialorder %v567_v53, 0.0  ;;  %v645_v63 = vmul.f32 0.2, %v567_v53  ;;  %vm595_vm6 = vcmp.gt.f32.partialorder %v495_v54, 0.0  ;;  %v1196_v0 = vpop.f32.mrb[14].mxu0  ;;  %v1212_v1 = vpop.f32.mrb[14].mxu1 }
 0x115   : > { %v661_v2 = vsel %vm597_vm4, %v503_v51, %v629_v57  ;;  %v627_v3 = vmul.f32 0.2, %v495_v54  ;;  %vm611_vm7 = vcmp.gt.f32.partialorder %v559_v58, 0.0  ;;  %v643_v4 = vmul.f32 0.2, %v559_v58  ;;  %v510_v5 = vpop.f32.mrb[15].mxu0 }
 0x116   : > { %v674_v6 = vsel %vm610_vm3, %v556_v47, %v642_v52  ;;  %v1074_v7 = vpack.c.bf16 %v661_v2, %v660_v49  ;;  %v677_v8 = vsel %vm613_vm5, %v567_v53, %v645_v63  ;;  %v632_v9 = vmul.f32 0.2, %v516_v59  ;;  %v574_v10 = vpop.f32.mrb[15].mxu1 }
 0x117   : > { %v1114_v11 = vpack.c.bf16 %v677_v8, %v676_v50  ;;  %v659_v12 = vsel %vm595_vm6, %v495_v54, %v627_v3  ;;  %v675_v13 = vsel %vm611_vm7, %v559_v58, %v643_v4  ;;  %v580_v14 = vadd.f32 %v1211_v56, %v1392_v24 }
 0x118   : > { %1130 = vst [vmem:[%s1409_s17 + $0x28] sm:$0xff] %v1074_v7   ;;  %v1069_v15 = vpack.c.bf16 %v659_v12, %v658_v62  ;;  %v1109_v16 = vpack.c.bf16 %v675_v13, %v674_v6  ;;  %vm600_vm8 = vcmp.gt.f32.partialorder %v516_v59, 0.0  ;;  %v508_v17 = vadd.f32 %v1392_v24, %v507_v60 }
 0x119   : > { %1138 = vst [vmem:[%s1409_s17 + $0x68] sm:$0xff] %v1114_v11   ;;  %vm616_vm9 = vcmp.gt.f32.partialorder %v580_v14, 0.0  ;;  %v648_v18 = vmul.f32 0.2, %v580_v14  ;;  %v572_v19 = vadd.f32 %v1392_v24, %v571_v61  ;;  %v519_v20 = vadd.f32 %v1196_v0, %v1392_v24 }
 0x11a   : > { %1129 = vst [vmem:[%s1409_s17 + $0x20] sm:$0xff] %v1069_v15   ;;  %1137 = vst [vmem:[%s1409_s17 + $0x60] sm:$0xff] %v1109_v16   ;;  %v630_v21 = vmul.f32 0.2, %v508_v17  ;;  %v583_v22 = vadd.f32 %v1212_v1, %v1392_v24  ;;  %v511_v23 = vadd.f32 %v1392_v24, %v510_v5  ;;  %v664_v25 = vsel %vm600_vm8, %v516_v59, %v632_v9 }
 0x11b   : > { %vm598_vm10 = vcmp.gt.f32.partialorder %v508_v17, 0.0  ;;  %vm601_vm11 = vcmp.gt.f32.partialorder %v519_v20, 0.0  ;;  %v680_v26 = vsel %vm616_vm9, %v580_v14, %v648_v18  ;;  %v633_v27 = vmul.f32 0.2, %v519_v20 }
 0x11c   : > { %vm617_vm12 = vcmp.gt.f32.partialorder %v583_v22, 0.0  ;;  %v649_v28 = vmul.f32 0.2, %v583_v22  ;;  %vm614_vm13 = vcmp.gt.f32.partialorder %v572_v19, 0.0  ;;  %vm599_vm14 = vcmp.gt.f32.partialorder %v511_v23, 0.0 }
 0x11d   : > { %v631_v29 = vmul.f32 0.2, %v511_v23  ;;  %v575_v30 = vadd.f32 %v1392_v24, %v574_v10  ;;  %v662_v31 = vsel %vm598_vm10, %v508_v17, %v630_v21  ;;  %v646_v32 = vmul.f32 0.2, %v572_v19 }
 0x11e   : > { %v665_v33 = vsel %vm601_vm11, %v519_v20, %v633_v27  ;;  %v681_v34 = vsel %vm617_vm12, %v583_v22, %v649_v28 }
 0x11f   : > { %v1084_v35 = vpack.c.bf16 %v665_v33, %v664_v25  ;;  %v1124_v36 = vpack.c.bf16 %v681_v34, %v680_v26  ;;  %v663_v37 = vsel %vm599_vm14, %v511_v23, %v631_v29  ;;  %vm615_vm15 = vcmp.gt.f32.partialorder %v575_v30, 0.0 }
 0x120   : > { %v1079_v38 = vpack.c.bf16 %v663_v37, %v662_v31  ;;  %v647_v39 = vmul.f32 0.2, %v575_v30  ;;  %v678_v40 = vsel %vm614_vm13, %v572_v19, %v646_v32 }
 0x121   : > { %1132 = vst [vmem:[%s1409_s17 + $0x38] sm:$0xff] %v1084_v35   ;;  %1140 = vst [vmem:[%s1409_s17 + $0x78] sm:$0xff] %v1124_v36  }
 0x122   : > { %1131 = vst [vmem:[%s1409_s17 + $0x30] sm:$0xff] %v1079_v38   ;;  %v679_v41 = vsel %vm615_vm15, %v575_v30, %v647_v39 }
 0x123   : > { %v1119_v42 = vpack.c.bf16 %v679_v41, %v678_v40 }
 0x125   : > { %1139 = vst [vmem:[%s1409_s17 + $0x70] sm:$0xff] %v1119_v42  }
 0x126 PF: > { %s13_s14 = sadd.s32 1, %s1299_s14   ;;  %s1468_s12 = smov %s1295_s13 }
 0x127   : > { %p10_p5 = scmp.ge.s32.totalorder %s13_s14, 10   ;;  %s1469_s13 = smov %s1471_s15 }
 0x129   :  { %12 = sbr.rel (!%p10_p5) target bundleno = 2 (0x2), region = 68 }

// kernel: _forward.5
= control target key start
LH: loop header
LB: loop body
LE: loop exit
PB: predicated region body
PF: predicated region fallthrough
CT: control target
= control target key end

     0   :  { %s10177_s17 = smov 0   ;;  %s10179_s18 = smov 0   ;;  %s10960_s0 = inlined_call_operand.vmem [shape: bf16[2,272,128], index: 0, kind: input, shape index: {}]   ;;  %s10961_s1 = inlined_call_operand.vmem [shape: bf16[2,272,128], index: 1, kind: input, shape index: {}]   ;;  %s10962_s2 = inlined_call_operand.vmem [shape: bf16[2,272,128], index: 2, kind: input, shape index: {}]   ;;  %s10963_s3 = inlined_call_operand.vmem [shape: bf16[2,272,128], index: 3, kind: input, shape index: {}]   ;;  %s10964_s4 = inlined_call_operand.vmem [shape: bf16[2,272,128], index: 4, kind: input, shape index: {}]   ;;  %s10965_s5 = inlined_call_operand.vmem [shape: bf16[2,272,128], index: 5, kind: input, shape index: {}]   ;;  %s10966_s6 = inlined_call_operand.vmem [shape: bf16[2,272,128], index: 6, kind: input, shape index: {}]   ;;  %s10967_s7 = inlined_call_operand.vmem [shape: bf16[2,272,128], index: 7, kind: input, shape index: {}]   ;;  %s10968_s8 = inlined_call_operand.vmem [shape: bf16[16,128,128], index: 8, kind: input, shape index: {}]   ;;  %s10969_s9 = inlined_call_operand.vmem [shape: f32[1,128], index: 9, kind: input, shape index: {}]   ;;  %s10970_s10 = inlined_call_operand.vmem [shape: bf16[2,256,128], index: 10, kind: output, shape index: {0}]   ;;  %s10971_s11 = inlined_call_operand.vmem [shape: f32[2,2,128], index: 11, kind: output, shape index: {1}]  }
   0x1   :  { %s10181_s19 = smov 0  }
   0x2 LB: > { %s31_s20 = sadd.s32 1, %s10111_s18  ;;  %p7253_p0 = scmp.ge.s32.totalorder %s10115_s19, 1  ;;  %s10115_s19 = sphi %s10181_s19, %s22_s19   ;;  %s10111_s18 = sphi %s10179_s18, %s10973_s18   ;;  %s10107_s17 = sphi %s10177_s17, %s10972_s17  }
   0x3   : > { %p32_p1 = scmp.ge.s32.totalorder %s31_s20, 2  ;;  %p443_p2 = scmp.lt.s32.totalorder %s10115_s19, 3 }
   0x5   : > { %s10975_s20 = smov (%p32_p1, %s31_s20), 0  ;;  %p444_p3 = pnand %p7253_p0, %p443_p2 }
   0x6   : > { %v9709_v0 = vld [vmem:[%s10968_s8 + $0x40] sm:$0xff] (!%p444_p3)   ;;  %p535_p4 = scmp.lt.s32.totalorder (!%p444_p3), %s10107_s17, 1  ;;  %v9711_v2 = vld [vmem:[%s10968_s8 + $0x48] sm:$0xff] (!%p444_p3)   ;;  %v9713_v4 = vld [vmem:[%s10968_s8 + $0x50] sm:$0xff] (!%p444_p3)   ;;  %vm7014_vm0 = vcmask (!%p444_p3), 1040384  }
   0x7   : > { %447 = sbr.rel (%p444_p3) target bundleno = 785 (0x311), region = 60  ;;  %v9710_v1 = vld [vmem:[%s10968_s8 + $0x200] sm:$0xff] (!%p444_p3)   ;;  %8436 = vmatprep.subr.bf16.mxu1 (!%p444_p3), %v9709_v0  ;;  %v9712_v3 = vld [vmem:[%s10968_s8 + $0x208] sm:$0xff] (!%p444_p3)   ;;  %v9714_v5 = vld [vmem:[%s10968_s8 + $0x210] sm:$0xff] (!%p444_p3)  }
   0x8   : > { %8820 = vmatprep.subr.bf16.mxu0 (!%p444_p3), %v9710_v1  ;;  %8437 = vmatpush3.bf16.msra.mxu1 (!%p444_p3), %v9709_v0  ;;  %v9715_v6 = vld [vmem:[%s10968_s8 + $0x58] sm:$0xff] (!%p444_p3)   ;;  %v9717_v8 = vld [vmem:[%s10968_s8 + $0x60] sm:$0xff] (!%p444_p3)   ;;  %v9719_v10 = vld [vmem:[%s10968_s8 + $0x68] sm:$0xff] (!%p444_p3)  }
   0x9   : > { %8821 = vmatpush3.bf16.msra.mxu0 (!%p444_p3), %v9710_v1  ;;  %8438 = vmatprep.subr.bf16.mxu1 (!%p444_p3), %v9711_v2  ;;  %v9716_v7 = vld [vmem:[%s10968_s8 + $0x218] sm:$0xff] (!%p444_p3)   ;;  %v9718_v9 = vld [vmem:[%s10968_s8 + $0x220] sm:$0xff] (!%p444_p3)   ;;  %v9720_v11 = vld [vmem:[%s10968_s8 + $0x228] sm:$0xff] (!%p444_p3)  }
   0xa   : > { %8822 = vmatprep.subr.bf16.mxu0 (!%p444_p3), %v9712_v3  ;;  %v9721_v14 = vld [vmem:[%s10968_s8 + $0x70] sm:$0xff] (!%p444_p3)   ;;  %v9723_v16 = vld [vmem:[%s10968_s8 + $0x78] sm:$0xff] (!%p444_p3)   ;;  %v9728_v19 = vld [vmem:[%s10968_s8] sm:$0xff] (!%p444_p3)  }
   0xb   : > { %v9722_v15 = vld [vmem:[%s10968_s8 + $0x230] sm:$0xff] (!%p444_p3)   ;;  %v9724_v17 = vld [vmem:[%s10968_s8 + $0x238] sm:$0xff] (!%p444_p3)   ;;  %v9730_v20 = vld [vmem:[%s10968_s8 + $0x240] sm:$0xff] (!%p444_p3)  }
   0xc   : > { %8439 = vmatpush3.bf16.msra.mxu1 (!%p444_p3), %v9711_v2  ;;  %v9734_v24 = vld [vmem:[%s10968_s8 + $0x8] sm:$0xff] (!%p444_p3)   ;;  %v9740_v27 = vld [vmem:[%s10968_s8 + $0x10] sm:$0xff] (!%p444_p3)   ;;  %v9746_v32 = vld [vmem:[%s10968_s8 + $0x18] sm:$0xff] (!%p444_p3)  }
   0xd   : > { %8823 = vmatpush3.bf16.msra.mxu0 (!%p444_p3), %v9712_v3  ;;  %8440 = vmatprep.subr.bf16.mxu1 (!%p444_p3), %v9713_v4  ;;  %v9736_v25 = vld [vmem:[%s10968_s8 + $0x248] sm:$0xff] (!%p444_p3)   ;;  %v9742_v28 = vld [vmem:[%s10968_s8 + $0x250] sm:$0xff] (!%p444_p3)   ;;  %v9748_v33 = vld [vmem:[%s10968_s8 + $0x258] sm:$0xff] (!%p444_p3)  }
   0xe   : > { %s10977_s17 = smov (!%p535_p4, %s10107_s17), 1  ;;  %8824 = vmatprep.subr.bf16.mxu0 %v9714_v5  ;;  %v9752_v36 = vld [vmem:[%s10968_s8 + $0x20] sm:$0xff]   ;;  %v9758_v40 = vld [vmem:[%s10968_s8 + $0x28] sm:$0xff]   ;;  %v9764_v45 = vld [vmem:[%s10968_s8 + $0x30] sm:$0xff]  }
   0xf   : > { %s10222_s22 = smul.u32 136, %s10977_s17  ;;  %v9754_v37 = vld [vmem:[%s10968_s8 + $0x260] sm:$0xff]   ;;  %v9760_v41 = vld [vmem:[%s10968_s8 + $0x268] sm:$0xff]   ;;  %v9766_v47 = vld [vmem:[%s10968_s8 + $0x270] sm:$0xff]  }
  0x10   : > { %8441 = vmatpush3.bf16.msra.mxu1 %v9713_v4  ;;  %v9770_v50 = vld [vmem:[%s10968_s8 + $0x38] sm:$0xff]   ;;  %v9776_v54 = vld [vmem:[%s10968_s8 + $0x80] sm:$0xff]  }
  0x11   : > { %8825 = vmatpush3.bf16.msra.mxu0 %v9714_v5  ;;  %8442 = vmatprep.subr.bf16.mxu1 %v9715_v6  ;;  %s10234_s29 = scalar_lea.vmem %s10962_s2, %s10222_s22  ;;  %s10243_s15 = scalar_lea.vmem %s10960_s0, %s10222_s22  ;;  %v9772_v52 = vld [vmem:[%s10968_s8 + $0x278] sm:$0xff]   ;;  %v9778_v56 = vld [vmem:[%s10968_s8 + $0x280] sm:$0xff]  }
  0x12   : > { %8826 = vmatprep.subr.bf16.mxu0 %v9716_v7  ;;  %v9725_v12 = vld [vmem:[%s10234_s29] sm:$0xff]   ;;  %v9726_v13 = vld [vmem:[%s10243_s15 + $0x8] sm:$0xff]   ;;  %v9729_v21 = vld [vmem:[%s10243_s15 + $0x10] sm:$0xff]   ;;  %s10387_s25 = scalar_lea.vmem %s10961_s1, %s10222_s22  ;;  %s10441_s16 = scalar_lea.vmem %s10963_s3, %s10222_s22 }
  0x13   : > { %8452 = vmatprep.mubr.bf16.mxu1 %v9725_v12  ;;  %8836 = vmatprep.mubr.bf16.mxu0 %v9726_v13  ;;  %v9727_v18 = vld [vmem:[%s10234_s29 + $0x8] sm:$0xff]   ;;  %v9731_v22 = vld [vmem:[%s10234_s29 + $0x10] sm:$0xff]   ;;  %v9732_v23 = vld [vmem:[%s10243_s15 + $0x18] sm:$0xff]   ;;  %s10519_s13 = scalar_lea.vmem %s10964_s4, %s10222_s22  ;;  %s10597_s30 = scalar_lea.vmem %s10966_s6, %s10222_s22 }
  0x14   : > { %8443 = vmatpush3.bf16.msra.mxu1 %v9715_v6  ;;  %v9733_v26 = vld [vmem:[%s10234_s29 + $0x18] sm:$0xff]   ;;  %v9735_v29 = vld [vmem:[%s10243_s15 + $0x20] sm:$0xff]   ;;  %v9738_v31 = vld [vmem:[%s10243_s15 + $0x28] sm:$0xff]   ;;  %s10705_s21 = scalar_lea.vmem %s10967_s7, %s10222_s22 }
  0x15   : > { %8827 = vmatpush3.bf16.msra.mxu0 %v9716_v7  ;;  %8444 = vmatprep.subr.bf16.mxu1 %v9717_v8  ;;  %v9737_v30 = vld [vmem:[%s10234_s29 + $0x20] sm:$0xff]   ;;  %v9739_v34 = vld [vmem:[%s10234_s29 + $0x28] sm:$0xff]   ;;  %v9741_v35 = vld [vmem:[%s10243_s15 + $0x30] sm:$0xff]  }
  0x16   : > { %8828 = vmatprep.subr.bf16.mxu0 %v9718_v9  ;;  %v9743_v38 = vld [vmem:[%s10234_s29 + $0x30] sm:$0xff]   ;;  %v9744_v39 = vld [vmem:[%s10243_s15 + $0x38] sm:$0xff]   ;;  %v9747_v43 = vld [vmem:[%s10243_s15 + $0x40] sm:$0xff]  }
  0x17   : > { %v9745_v42 = vld [vmem:[%s10234_s29 + $0x38] sm:$0xff]   ;;  %v9749_v44 = vld [vmem:[%s10234_s29 + $0x40] sm:$0xff]   ;;  %v9750_v46 = vld [vmem:[%s10243_s15 + $0x48] sm:$0xff]  }
  0x18   : > { %8445 = vmatpush3.bf16.msra.mxu1 %v9717_v8  ;;  %v9751_v48 = vld [vmem:[%s10234_s29 + $0x48] sm:$0xff]   ;;  %v9753_v49 = vld [vmem:[%s10243_s15 + $0x50] sm:$0xff]   ;;  %v9756_v53 = vld [vmem:[%s10243_s15 + $0x58] sm:$0xff]  }
  0x19   : > { %8829 = vmatpush3.bf16.msra.mxu0 %v9718_v9  ;;  %8446 = vmatprep.subr.bf16.mxu1 %v9719_v10  ;;  %v9755_v51 = vld [vmem:[%s10234_s29 + $0x50] sm:$0xff]   ;;  %v9757_v55 = vld [vmem:[%s10234_s29 + $0x58] sm:$0xff]   ;;  %v9759_v57 = vld [vmem:[%s10243_s15 + $0x60] sm:$0xff]  }
  0x1a   : > { %8830 = vmatprep.subr.bf16.mxu0 %v9720_v11  ;;  %v9761_v58 = vld [vmem:[%s10234_s29 + $0x60] sm:$0xff]   ;;  %v9762_v59 = vld [vmem:[%s10243_s15 + $0x68] sm:$0xff]   ;;  %v9765_v61 = vld [vmem:[%s10243_s15 + $0x70] sm:$0xff]  }
  0x1b   : > { %v9763_v60 = vld [vmem:[%s10234_s29 + $0x68] sm:$0xff]   ;;  %v9767_v62 = vld [vmem:[%s10234_s29 + $0x70] sm:$0xff]   ;;  %v9768_v63 = vld [vmem:[%s10243_s15 + $0x78] sm:$0xff]  }
  0x1c   : > { %8447 = vmatpush3.bf16.msra.mxu1 %v9719_v10  ;;  %v9769_v0 = vld [vmem:[%s10234_s29 + $0x78] sm:$0xff]   ;;  %v9771_v1 = vld [vmem:[%s10243_s15 + $0x80] sm:$0xff]   ;;  %v9774_v3 = vld [vmem:[%s10234_s29 + $0x8] sm:$0xff]  }
  0x1d   : > { %8831 = vmatpush3.bf16.msra.mxu0 %v9720_v11  ;;  %8448 = vmatprep.subr.bf16.mxu1 %v9721_v14  ;;  %v9773_v2 = vld [vmem:[%s10243_s15] sm:$0xff]   ;;  %v9775_v4 = vld [vmem:[%s10243_s15 + $0x8] sm:$0xff]   ;;  %v9777_v5 = vld [vmem:[%s10234_s29 + $0x10] sm:$0xff]  }
  0x1e   : > { %8832 = vmatprep.subr.bf16.mxu0 %v9722_v15  ;;  %v9779_v6 = vld [vmem:[%s10243_s15 + $0x10] sm:$0xff]   ;;  %v9780_v7 = vld [vmem:[%s10234_s29 + $0x18] sm:$0xff]   ;;  %v9782_v8 = vld [vmem:[%s10968_s8 + $0x88] sm:$0xff]  }
  0x1f   : > { %v9784_v9 = vld [vmem:[%s10968_s8 + $0x288] sm:$0xff]   ;;  %v9781_v10 = vld [vmem:[%s10243_s15 + $0x18] sm:$0xff]   ;;  %v9788_v11 = vld [vmem:[%s10968_s8 + $0x90] sm:$0xff]  }
  0x20   : > { %8449 = vmatpush3.bf16.msra.mxu1 %v9721_v14  ;;  %v9790_v12 = vld [vmem:[%s10968_s8 + $0x290] sm:$0xff]   ;;  %v9783_v13 = vld [vmem:[%s10234_s29 + $0x20] sm:$0xff]  }
  0x21   : > { %8833 = vmatpush3.bf16.msra.mxu0 %v9722_v15  ;;  %8450 = vmatprep.subr.bf16.mxu1 %v9723_v16  ;;  %v9785_v14 = vld [vmem:[%s10243_s15 + $0x20] sm:$0xff]   ;;  %v9786_v15 = vld [vmem:[%s10234_s29 + $0x28] sm:$0xff]  }
  0x22   : > { %8834 = vmatprep.subr.bf16.mxu0 %v9724_v17 }
  0x24   : > { %8451 = vmatpush3.bf16.msra.mxu1 %v9723_v16  ;;  %v9794_v16 = vld [vmem:[%s10968_s8 + $0x98] sm:$0xff]  }
  0x25   : > { %8835 = vmatpush3.bf16.msra.mxu0 %v9724_v17  ;;  %8484 = vmatprep.subr.bf16.mxu1 %v9728_v19  ;;  %v9796_v17 = vld [vmem:[%s10968_s8 + $0x298] sm:$0xff]  }
  0x26   : > { %8868 = vmatprep.subr.bf16.mxu0 %v9730_v20 }
  0x27   : > { %8453 = vmatmul.mubr.bf16.vlgmr.msra.gmra.mrb[0].mxu1 %v9727_v18  ;;  %v9787_v18 = vld [vmem:[%s10243_s15 + $0x28] sm:$0xff]  }
  0x28   : > { %8837 = vmatmul.mubr.bf16.vlgmr.msra.gmra.mrb[0].mxu0 %v9729_v21  ;;  %8485 = vmatpush3.bf16.msra.mxu1 %v9728_v19  ;;  %v9789_v19 = vld [vmem:[%s10234_s29 + $0x30] sm:$0xff]   ;;  %v9802_v21 = vld [vmem:[%s10968_s8 + $0x2a0] sm:$0xff]  }
  0x29   : > { %8869 = vmatpush3.bf16.msra.mxu0 %v9730_v20  ;;  %8456 = vmatprep.mubr.bf16.mxu1 %v9731_v22  ;;  %v9800_v20 = vld [vmem:[%s10968_s8 + $0xa0] sm:$0xff]   ;;  %v9791_v22 = vld [vmem:[%s10243_s15 + $0x30] sm:$0xff]  }
  0x2a   : > { %8840 = vmatprep.mubr.bf16.mxu0 %v9732_v23  ;;  %8486 = vmatprep.subr.bf16.mxu1 %v9734_v24  ;;  %v9792_v23 = vld [vmem:[%s10234_s29 + $0x38] sm:$0xff]  }
  0x2b   : > { %8870 = vmatprep.subr.bf16.mxu0 %v9736_v25 }
  0x2c   : > { %8487 = vmatpush3.bf16.msra.mxu1 %v9734_v24  ;;  %v9806_v24 = vld [vmem:[%s10968_s8 + $0xa8] sm:$0xff]  }
  0x2d   : > { %8871 = vmatpush3.bf16.msra.mxu0 %v9736_v25  ;;  %8488 = vmatprep.subr.bf16.mxu1 %v9740_v27  ;;  %v9808_v25 = vld [vmem:[%s10968_s8 + $0x2a8] sm:$0xff]  }
  0x2e   : > { %8872 = vmatprep.subr.bf16.mxu0 %v9742_v28 }
  0x2f   : > { %8457 = vmatmul.mubr.bf16.gmra.mrb[4].mxu1 %v9733_v26  ;;  %v9793_v26 = vld [vmem:[%s10243_s15 + $0x38] sm:$0xff]  }
  0x30   : > { %8841 = vmatmul.mubr.bf16.gmra.mrb[4].mxu0 %v9735_v29  ;;  %8460 = vmatprep.mubr.bf16.mxu1 %v9737_v30  ;;  %v9814_v29 = vld [vmem:[%s10968_s8 + $0x2b0] sm:$0xff]   ;;  %v9797_v30 = vld [vmem:[%s10243_s15 + $0x40] sm:$0xff]  }
  0x31   : > { %8844 = vmatprep.mubr.bf16.mxu0 %v9738_v31  ;;  %8489 = vmatpush3.bf16.msra.mxu1 %v9740_v27  ;;  %v9795_v27 = vld [vmem:[%s10234_s29 + $0x40] sm:$0xff]   ;;  %v9798_v31 = vld [vmem:[%s10234_s29 + $0x48] sm:$0xff]  }
  0x32   : > { %8873 = vmatpush3.bf16.msra.mxu0 %v9742_v28  ;;  %8490 = vmatprep.subr.bf16.mxu1 %v9746_v32  ;;  %v9812_v28 = vld [vmem:[%s10968_s8 + $0xb0] sm:$0xff]  }
  0x33   : > { %8874 = vmatprep.subr.bf16.mxu0 %v9748_v33 }
  0x35   : > { %8491 = vmatpush3.bf16.msra.mxu1 %v9746_v32  ;;  %v9818_v32 = vld [vmem:[%s10968_s8 + $0xb8] sm:$0xff]  }
  0x36   : > { %8875 = vmatpush3.bf16.msra.mxu0 %v9748_v33  ;;  %8492 = vmatprep.subr.bf16.mxu1 %v9752_v36  ;;  %v9820_v33 = vld [vmem:[%s10968_s8 + $0x2b8] sm:$0xff]  }
  0x37   : > { %8461 = vmatmul.mubr.bf16.gmra.mrb[8].mxu1 %v9739_v34  ;;  %8876 = vmatprep.subr.bf16.mxu0 %v9754_v37  ;;  %v9799_v34 = vld [vmem:[%s10243_s15 + $0x48] sm:$0xff]  }
  0x38   : > { %8845 = vmatmul.mubr.bf16.gmra.mrb[8].mxu0 %v9741_v35  ;;  %8464 = vmatprep.mubr.bf16.mxu1 %v9743_v38  ;;  %v9801_v35 = vld [vmem:[%s10234_s29 + $0x50] sm:$0xff]  }
  0x39   : > { %8848 = vmatprep.mubr.bf16.mxu0 %v9744_v39  ;;  %8493 = vmatpush3.bf16.msra.mxu1 %v9752_v36  ;;  %v9824_v36 = vld [vmem:[%s10968_s8 + $0xc0] sm:$0xff]   ;;  %v9803_v38 = vld [vmem:[%s10243_s15 + $0x50] sm:$0xff]   ;;  %v9804_v39 = vld [vmem:[%s10234_s29 + $0x58] sm:$0xff]  }
  0x3a   : > { %8877 = vmatpush3.bf16.msra.mxu0 %v9754_v37  ;;  %8494 = vmatprep.subr.bf16.mxu1 %v9758_v40  ;;  %v9826_v37 = vld [vmem:[%s10968_s8 + $0x2c0] sm:$0xff]  }
  0x3b   : > { %8878 = vmatprep.subr.bf16.mxu0 %v9760_v41 }
  0x3d   : > { %8495 = vmatpush3.bf16.msra.mxu1 %v9758_v40  ;;  %v9805_v40 = vld [vmem:[%s10243_s15 + $0x58] sm:$0xff]  }
  0x3e   : > { %8879 = vmatpush3.bf16.msra.mxu0 %v9760_v41  ;;  %8496 = vmatprep.subr.bf16.mxu1 %v9764_v45  ;;  %v9807_v41 = vld [vmem:[%s10234_s29 + $0x60] sm:$0xff]  }
  0x3f   : > { %8465 = vmatmul.mubr.bf16.gmra.mrb[12].mxu1 %v9745_v42  ;;  %8880 = vmatprep.subr.bf16.mxu0 %v9766_v47  ;;  %v9809_v42 = vld [vmem:[%s10243_s15 + $0x60] sm:$0xff]  }
  0x40   : > { %8849 = vmatmul.mubr.bf16.gmra.mrb[12].mxu0 %v9747_v43  ;;  %8468 = vmatprep.mubr.bf16.mxu1 %v9749_v44  ;;  %v9810_v43 = vld [vmem:[%s10234_s29 + $0x68] sm:$0xff]  }
  0x41   : > { %8852 = vmatprep.mubr.bf16.mxu0 %v9750_v46  ;;  %8497 = vmatpush3.bf16.msra.mxu1 %v9764_v45  ;;  %v9811_v44 = vld [vmem:[%s10243_s15 + $0x68] sm:$0xff]   ;;  %v9813_v45 = vld [vmem:[%s10234_s29 + $0x70] sm:$0xff]  }
  0x42   : > { %8881 = vmatpush3.bf16.msra.mxu0 %v9766_v47  ;;  %8498 = vmatprep.subr.bf16.mxu1 %v9770_v50  ;;  %v9815_v46 = vld [vmem:[%s10243_s15 + $0x70] sm:$0xff]   ;;  %v9816_v47 = vld [vmem:[%s10234_s29 + $0x78] sm:$0xff]  }
  0x43   : > { %8882 = vmatprep.subr.bf16.mxu0 %v9772_v52 }
  0x45   : > { %8499 = vmatpush3.bf16.msra.mxu1 %v9770_v50  ;;  %v9821_v50 = vld [vmem:[%s10387_s25] sm:$0xff]  }
  0x46   : > { %8883 = vmatpush3.bf16.msra.mxu0 %v9772_v52  ;;  %8532 = vmatprep.subr.bf16.mxu1 %v9776_v54  ;;  %v9823_v52 = vld [vmem:[%s10387_s25 + $0x8] sm:$0xff]  }
  0x47   : > { %8469 = vmatmul.mubr.bf16.gmra.mrb[16].mxu1 %v9751_v48  ;;  %8916 = vmatprep.subr.bf16.mxu0 %v9778_v56  ;;  %v9817_v48 = vld [vmem:[%s10243_s15 + $0x78] sm:$0xff]  }
  0x48   : > { %8853 = vmatmul.mubr.bf16.gmra.mrb[16].mxu0 %v9753_v49  ;;  %8472 = vmatprep.mubr.bf16.mxu1 %v9755_v51  ;;  %v9819_v49 = vld [vmem:[%s10234_s29 + $0x80] sm:$0xff]   ;;  %v9822_v51 = vld [vmem:[%s10387_s25 + $0x8] sm:$0xff]   ;;  %s10651_s29 = scalar_lea.vmem %s10965_s5, %s10222_s22 }
  0x49   : > { %8856 = vmatprep.mubr.bf16.mxu0 %v9756_v53  ;;  %v9825_v53 = vld [vmem:[%s10387_s25 + $0x10] sm:$0xff]  }
  0x4f   : > { %8473 = vmatmul.mubr.bf16.gmra.mrb[20].mxu1 %v9757_v55  ;;  %v9828_v55 = vld [vmem:[%s10387_s25 + $0x18] sm:$0xff]  }
  0x50   : > { %8857 = vmatmul.mubr.bf16.gmra.mrb[20].mxu0 %v9759_v57  ;;  %8476 = vmatprep.mubr.bf16.mxu1 %v9761_v58  ;;  %v9832_v57 = vld [vmem:[%s10968_s8 + $0x2c8] sm:$0xff]   ;;  %v9829_v58 = vld [vmem:[%s10387_s25 + $0x18] sm:$0xff]  }
  0x51   : > { %8860 = vmatprep.mubr.bf16.mxu0 %v9762_v59  ;;  %v9836_v59 = vld [vmem:[%s10968_s8 + $0xd0] sm:$0xff]  }
  0x57   : > { %8477 = vmatmul.mubr.bf16.gmra.mrb[24].mxu1 %v9763_v60  ;;  %v9838_v60 = vld [vmem:[%s10968_s8 + $0x2d0] sm:$0xff]  }
  0x58   : > { %8861 = vmatmul.mubr.bf16.gmra.mrb[24].mxu0 %v9765_v61  ;;  %8480 = vmatprep.mubr.bf16.mxu1 %v9767_v62  ;;  %v9831_v61 = vld [vmem:[%s10387_s25 + $0x20] sm:$0xff]  }
  0x59   : > { %8864 = vmatprep.mubr.bf16.mxu0 %v9768_v63  ;;  %v9833_v62 = vld [vmem:[%s10387_s25 + $0x20] sm:$0xff]   ;;  %v9834_v63 = vld [vmem:[%s10387_s25 + $0x28] sm:$0xff]  }
  0x5f   : > { %8481 = vmatmul.mubr.bf16.gmra.mrb[28].mxu1 %v9769_v0  ;;  %v9842_v0 = vld [vmem:[%s10968_s8 + $0xd8] sm:$0xff]  }
  0x60   : > { %8865 = vmatmul.mubr.bf16.gmra.mrb[28].mxu0 %v9771_v1  ;;  %8500 = vmatprep.mubr.bf16.mxu1 %v9773_v2  ;;  %v9844_v1 = vld [vmem:[%s10968_s8 + $0x2d8] sm:$0xff]   ;;  %v9835_v2 = vld [vmem:[%s10387_s25 + $0x28] sm:$0xff]  }
  0x61   : > { %8884 = vmatprep.mubr.bf16.mxu0 %v9774_v3  ;;  %v9837_v3 = vld [vmem:[%s10387_s25 + $0x30] sm:$0xff]  }
  0x67   : > { %8501 = vmatmul.mubr.bf16.vlgmr.msra.gmra.mrb[0].mxu1 %v9775_v4  ;;  %v9848_v4 = vld [vmem:[%s10968_s8 + $0xe0] sm:$0xff]  }
  0x68   : > { %8885 = vmatmul.mubr.bf16.vlgmr.msra.gmra.mrb[0].mxu0 %v9777_v5  ;;  %8533 = vmatpush3.bf16.msra.mxu1 %v9776_v54  ;;  %v9827_v54 = vld [vmem:[%s10387_s25 + $0x10] sm:$0xff]   ;;  %v9850_v5 = vld [vmem:[%s10968_s8 + $0x2e0] sm:$0xff]  }
  0x69   : > { %8917 = vmatpush3.bf16.msra.mxu0 %v9778_v56  ;;  %8504 = vmatprep.mubr.bf16.mxu1 %v9779_v6  ;;  %v9830_v56 = vld [vmem:[%s10968_s8 + $0xc8] sm:$0xff]   ;;  %v9839_v6 = vld [vmem:[%s10387_s25 + $0x30] sm:$0xff]  }
  0x6a   : > { %8888 = vmatprep.mubr.bf16.mxu0 %v9780_v7  ;;  %8534 = vmatprep.subr.bf16.mxu1 %v9782_v8  ;;  %v9840_v7 = vld [vmem:[%s10387_s25 + $0x38] sm:$0xff]  }
  0x6b   : > { %8918 = vmatprep.subr.bf16.mxu0 %v9784_v9 }
  0x6c   : > { %8535 = vmatpush3.bf16.msra.mxu1 %v9782_v8  ;;  %v9854_v8 = vld [vmem:[%s10968_s8 + $0xe8] sm:$0xff]  }
  0x6d   : > { %8919 = vmatpush3.bf16.msra.mxu0 %v9784_v9  ;;  %8536 = vmatprep.subr.bf16.mxu1 %v9788_v11  ;;  %v9856_v9 = vld [vmem:[%s10968_s8 + $0x2e8] sm:$0xff]  }
  0x6e   : > { %8920 = vmatprep.subr.bf16.mxu0 %v9790_v12 }
  0x6f   : > { %8505 = vmatmul.mubr.bf16.gmra.mrb[4].mxu1 %v9781_v10  ;;  %v9841_v10 = vld [vmem:[%s10387_s25 + $0x38] sm:$0xff]  }
  0x70   : > { %8889 = vmatmul.mubr.bf16.gmra.mrb[4].mxu0 %v9783_v13  ;;  %8508 = vmatprep.mubr.bf16.mxu1 %v9785_v14  ;;  %v9862_v13 = vld [vmem:[%s10968_s8 + $0x2f0] sm:$0xff]   ;;  %v9845_v14 = vld [vmem:[%s10387_s25 + $0x40] sm:$0xff]  }
  0x71   : > { %8892 = vmatprep.mubr.bf16.mxu0 %v9786_v15  ;;  %8537 = vmatpush3.bf16.msra.mxu1 %v9788_v11  ;;  %v9843_v11 = vld [vmem:[%s10387_s25 + $0x40] sm:$0xff]   ;;  %v9846_v15 = vld [vmem:[%s10387_s25 + $0x48] sm:$0xff]  }
  0x72   : > { %8921 = vmatpush3.bf16.msra.mxu0 %v9790_v12  ;;  %8538 = vmatprep.subr.bf16.mxu1 %v9794_v16  ;;  %v9860_v12 = vld [vmem:[%s10968_s8 + $0xf0] sm:$0xff]  }
  0x73   : > { %8922 = vmatprep.subr.bf16.mxu0 %v9796_v17 }
  0x75   : > { %8539 = vmatpush3.bf16.msra.mxu1 %v9794_v16  ;;  %v9866_v16 = vld [vmem:[%s10968_s8 + $0xf8] sm:$0xff]  }
  0x76   : > { %8923 = vmatpush3.bf16.msra.mxu0 %v9796_v17  ;;  %8540 = vmatprep.subr.bf16.mxu1 %v9800_v20  ;;  %v9868_v17 = vld [vmem:[%s10968_s8 + $0x2f8] sm:$0xff]  }
  0x77   : > { %8509 = vmatmul.mubr.bf16.gmra.mrb[8].mxu1 %v9787_v18  ;;  %8924 = vmatprep.subr.bf16.mxu0 %v9802_v21  ;;  %v9847_v18 = vld [vmem:[%s10387_s25 + $0x48] sm:$0xff]  }
  0x78   : > { %8893 = vmatmul.mubr.bf16.gmra.mrb[8].mxu0 %v9789_v19  ;;  %8512 = vmatprep.mubr.bf16.mxu1 %v9791_v22  ;;  %v9849_v19 = vld [vmem:[%s10387_s25 + $0x50] sm:$0xff]  }
  0x79   : > { %8896 = vmatprep.mubr.bf16.mxu0 %v9792_v23  ;;  %8541 = vmatpush3.bf16.msra.mxu1 %v9800_v20  ;;  %v9872_v20 = vld [vmem:[%s10968_s8 + $0x100] sm:$0xff]   ;;  %v9851_v22 = vld [vmem:[%s10387_s25 + $0x50] sm:$0xff]   ;;  %v9852_v23 = vld [vmem:[%s10387_s25 + $0x58] sm:$0xff]  }
  0x7a   : > { %8925 = vmatpush3.bf16.msra.mxu0 %v9802_v21  ;;  %8542 = vmatprep.subr.bf16.mxu1 %v9806_v24  ;;  %v9874_v21 = vld [vmem:[%s10968_s8 + $0x300] sm:$0xff]  }
  0x7b   : > { %8926 = vmatprep.subr.bf16.mxu0 %v9808_v25 }
  0x7d   : > { %8543 = vmatpush3.bf16.msra.mxu1 %v9806_v24  ;;  %v9853_v24 = vld [vmem:[%s10387_s25 + $0x58] sm:$0xff]  }
  0x7e   : > { %8927 = vmatpush3.bf16.msra.mxu0 %v9808_v25  ;;  %8544 = vmatprep.subr.bf16.mxu1 %v9812_v28  ;;  %v9855_v25 = vld [vmem:[%s10387_s25 + $0x60] sm:$0xff]  }
  0x7f   : > { %8513 = vmatmul.mubr.bf16.gmra.mrb[12].mxu1 %v9793_v26  ;;  %8928 = vmatprep.subr.bf16.mxu0 %v9814_v29  ;;  %v9857_v26 = vld [vmem:[%s10387_s25 + $0x60] sm:$0xff]  }
  0x80   : > { %8897 = vmatmul.mubr.bf16.gmra.mrb[12].mxu0 %v9795_v27  ;;  %8516 = vmatprep.mubr.bf16.mxu1 %v9797_v30  ;;  %v9858_v27 = vld [vmem:[%s10387_s25 + $0x68] sm:$0xff]   ;;  %v9863_v30 = vld [vmem:[%s10387_s25 + $0x70] sm:$0xff]  }
  0x81   : > { %8900 = vmatprep.mubr.bf16.mxu0 %v9798_v31  ;;  %8545 = vmatpush3.bf16.msra.mxu1 %v9812_v28  ;;  %v9859_v28 = vld [vmem:[%s10387_s25 + $0x68] sm:$0xff]   ;;  %v9864_v31 = vld [vmem:[%s10387_s25 + $0x78] sm:$0xff]  }
  0x82   : > { %8929 = vmatpush3.bf16.msra.mxu0 %v9814_v29  ;;  %8546 = vmatprep.subr.bf16.mxu1 %v9818_v32  ;;  %v9861_v29 = vld [vmem:[%s10387_s25 + $0x70] sm:$0xff]  }
  0x83   : > { %8930 = vmatprep.subr.bf16.mxu0 %v9820_v33 }
  0x85   : > { %8547 = vmatpush3.bf16.msra.mxu1 %v9818_v32  ;;  %v9865_v32 = vld [vmem:[%s10387_s25 + $0x78] sm:$0xff]  }
  0x86   : > { %8931 = vmatpush3.bf16.msra.mxu0 %v9820_v33  ;;  %8580 = vmatprep.subr.bf16.mxu1 %v9824_v36  ;;  %v9867_v33 = vld [vmem:[%s10387_s25 + $0x80] sm:$0xff]  }
  0x87   : > { %8517 = vmatmul.mubr.bf16.gmra.mrb[16].mxu1 %v9799_v34  ;;  %8964 = vmatprep.subr.bf16.mxu0 %v9826_v37  ;;  %v9869_v34 = vld [vmem:[%s10441_s16] sm:$0xff]  }
  0x88   : > { %8901 = vmatmul.mubr.bf16.gmra.mrb[16].mxu0 %v9801_v35  ;;  %8520 = vmatprep.mubr.bf16.mxu1 %v9803_v38  ;;  %v9870_v35 = vld [vmem:[%s10441_s16 + $0x8] sm:$0xff]   ;;  %v9875_v38 = vld [vmem:[%s10441_s16 + $0x10] sm:$0xff]  }
  0x89   : > { %8904 = vmatprep.mubr.bf16.mxu0 %v9804_v39  ;;  %v9876_v39 = vld [vmem:[%s10441_s16 + $0x18] sm:$0xff]  }
  0x8f   : > { %8521 = vmatmul.mubr.bf16.gmra.mrb[20].mxu1 %v9805_v40  ;;  %v9878_v40 = vld [vmem:[%s10968_s8 + $0x108] sm:$0xff]  }
  0x90   : > { %8905 = vmatmul.mubr.bf16.gmra.mrb[20].mxu0 %v9807_v41  ;;  %8524 = vmatprep.mubr.bf16.mxu1 %v9809_v42  ;;  %v9880_v41 = vld [vmem:[%s10968_s8 + $0x308] sm:$0xff]   ;;  %v9877_v42 = vld [vmem:[%s10441_s16 + $0x18] sm:$0xff]  }
  0x91   : > { %8908 = vmatprep.mubr.bf16.mxu0 %v9810_v43  ;;  %v9884_v43 = vld [vmem:[%s10968_s8 + $0x110] sm:$0xff]  }
  0x97   : > { %8525 = vmatmul.mubr.bf16.gmra.mrb[24].mxu1 %v9811_v44  ;;  %v9886_v44 = vld [vmem:[%s10968_s8 + $0x310] sm:$0xff]  }
  0x98   : > { %8909 = vmatmul.mubr.bf16.gmra.mrb[24].mxu0 %v9813_v45  ;;  %8528 = vmatprep.mubr.bf16.mxu1 %v9815_v46  ;;  %v9879_v45 = vld [vmem:[%s10441_s16 + $0x20] sm:$0xff]  }
  0x99   : > { %8912 = vmatprep.mubr.bf16.mxu0 %v9816_v47  ;;  %v9881_v46 = vld [vmem:[%s10441_s16 + $0x20] sm:$0xff]   ;;  %v9882_v47 = vld [vmem:[%s10441_s16 + $0x28] sm:$0xff]  }
  0x9f   : > { %8529 = vmatmul.mubr.bf16.gmra.mrb[28].mxu1 %v9817_v48  ;;  %v9890_v48 = vld [vmem:[%s10968_s8 + $0x118] sm:$0xff]  }
  0xa0   : > { %8913 = vmatmul.mubr.bf16.gmra.mrb[28].mxu0 %v9819_v49  ;;  %8548 = vmatprep.mubr.bf16.mxu1 %v9821_v50  ;;  %v9892_v49 = vld [vmem:[%s10968_s8 + $0x318] sm:$0xff]   ;;  %v9883_v50 = vld [vmem:[%s10441_s16 + $0x28] sm:$0xff]  }
  0xa1   : > { %8932 = vmatprep.mubr.bf16.mxu0 %v9822_v51  ;;  %v9885_v51 = vld [vmem:[%s10441_s16 + $0x30] sm:$0xff]  }
  0xa7   : > { %8549 = vmatmul.mubr.bf16.vlgmr.msra.gmra.mrb[0].mxu1 %v9823_v52  ;;  %v9896_v52 = vld [vmem:[%s10968_s8 + $0x120] sm:$0xff]  }
  0xa8   : > { %8933 = vmatmul.mubr.bf16.vlgmr.msra.gmra.mrb[0].mxu0 %v9825_v53  ;;  %8581 = vmatpush3.bf16.msra.mxu1 %v9824_v36  ;;  %v9871_v36 = vld [vmem:[%s10441_s16 + $0x8] sm:$0xff]   ;;  %v9898_v53 = vld [vmem:[%s10968_s8 + $0x320] sm:$0xff]  }
  0xa9   : > { %8965 = vmatpush3.bf16.msra.mxu0 %v9826_v37  ;;  %8552 = vmatprep.mubr.bf16.mxu1 %v9827_v54  ;;  %v9873_v37 = vld [vmem:[%s10441_s16 + $0x10] sm:$0xff]  }
  0xaa   : > { %8936 = vmatprep.mubr.bf16.mxu0 %v9828_v55  ;;  %8582 = vmatprep.subr.bf16.mxu1 %v9830_v56  ;;  %v9887_v54 = vld [vmem:[%s10441_s16 + $0x30] sm:$0xff]   ;;  %v9888_v55 = vld [vmem:[%s10441_s16 + $0x38] sm:$0xff]  }
  0xab   : > { %8966 = vmatprep.subr.bf16.mxu0 %v9832_v57 }
  0xac   : > { %8583 = vmatpush3.bf16.msra.mxu1 %v9830_v56  ;;  %v9902_v56 = vld [vmem:[%s10968_s8 + $0x128] sm:$0xff]  }
  0xad   : > { %8967 = vmatpush3.bf16.msra.mxu0 %v9832_v57  ;;  %8584 = vmatprep.subr.bf16.mxu1 %v9836_v59  ;;  %v9904_v57 = vld [vmem:[%s10968_s8 + $0x328] sm:$0xff]  }
  0xae   : > { %8968 = vmatprep.subr.bf16.mxu0 %v9838_v60 }
  0xaf   : > { %8553 = vmatmul.mubr.bf16.gmra.mrb[4].mxu1 %v9829_v58  ;;  %v9889_v58 = vld [vmem:[%s10441_s16 + $0x38] sm:$0xff]  }
  0xb0   : > { %8937 = vmatmul.mubr.bf16.gmra.mrb[4].mxu0 %v9831_v61  ;;  %8556 = vmatprep.mubr.bf16.mxu1 %v9833_v62  ;;  %v9910_v61 = vld [vmem:[%s10968_s8 + $0x330] sm:$0xff]   ;;  %v9893_v62 = vld [vmem:[%s10441_s16 + $0x40] sm:$0xff]  }
  0xb1   : > { %8940 = vmatprep.mubr.bf16.mxu0 %v9834_v63  ;;  %8585 = vmatpush3.bf16.msra.mxu1 %v9836_v59  ;;  %v9891_v59 = vld [vmem:[%s10441_s16 + $0x40] sm:$0xff]   ;;  %v9894_v63 = vld [vmem:[%s10441_s16 + $0x48] sm:$0xff]  }
  0xb2   : > { %8969 = vmatpush3.bf16.msra.mxu0 %v9838_v60  ;;  %8586 = vmatprep.subr.bf16.mxu1 %v9842_v0  ;;  %v9908_v60 = vld [vmem:[%s10968_s8 + $0x130] sm:$0xff]  }
  0xb3   : > { %8970 = vmatprep.subr.bf16.mxu0 %v9844_v1 }
  0xb5   : > { %8587 = vmatpush3.bf16.msra.mxu1 %v9842_v0  ;;  %v9914_v0 = vld [vmem:[%s10968_s8 + $0x138] sm:$0xff]  }
  0xb6   : > { %8971 = vmatpush3.bf16.msra.mxu0 %v9844_v1  ;;  %8588 = vmatprep.subr.bf16.mxu1 %v9848_v4  ;;  %v9916_v1 = vld [vmem:[%s10968_s8 + $0x338] sm:$0xff]  }
  0xb7   : > { %8557 = vmatmul.mubr.bf16.gmra.mrb[8].mxu1 %v9835_v2  ;;  %8972 = vmatprep.subr.bf16.mxu0 %v9850_v5  ;;  %v9895_v2 = vld [vmem:[%s10441_s16 + $0x48] sm:$0xff]  }
  0xb8   : > { %8941 = vmatmul.mubr.bf16.gmra.mrb[8].mxu0 %v9837_v3  ;;  %8560 = vmatprep.mubr.bf16.mxu1 %v9839_v6  ;;  %v9897_v3 = vld [vmem:[%s10441_s16 + $0x50] sm:$0xff]  }
  0xb9   : > { %8944 = vmatprep.mubr.bf16.mxu0 %v9840_v7  ;;  %8589 = vmatpush3.bf16.msra.mxu1 %v9848_v4  ;;  %v9920_v4 = vld [vmem:[%s10968_s8 + $0x140] sm:$0xff]   ;;  %v9899_v6 = vld [vmem:[%s10441_s16 + $0x50] sm:$0xff]   ;;  %v9900_v7 = vld [vmem:[%s10441_s16 + $0x58] sm:$0xff]  }
  0xba   : > { %8973 = vmatpush3.bf16.msra.mxu0 %v9850_v5  ;;  %8590 = vmatprep.subr.bf16.mxu1 %v9854_v8  ;;  %v9922_v5 = vld [vmem:[%s10968_s8 + $0x340] sm:$0xff]  }
  0xbb   : > { %8974 = vmatprep.subr.bf16.mxu0 %v9856_v9 }
  0xbd   : > { %8591 = vmatpush3.bf16.msra.mxu1 %v9854_v8  ;;  %v9901_v8 = vld [vmem:[%s10441_s16 + $0x58] sm:$0xff]  }
  0xbe   : > { %8975 = vmatpush3.bf16.msra.mxu0 %v9856_v9  ;;  %8592 = vmatprep.subr.bf16.mxu1 %v9860_v12  ;;  %v9903_v9 = vld [vmem:[%s10441_s16 + $0x60] sm:$0xff]  }
  0xbf   : > { %8561 = vmatmul.mubr.bf16.gmra.mrb[12].mxu1 %v9841_v10  ;;  %8976 = vmatprep.subr.bf16.mxu0 %v9862_v13  ;;  %v9905_v10 = vld [vmem:[%s10441_s16 + $0x60] sm:$0xff]  }
  0xc0   : > { %8945 = vmatmul.mubr.bf16.gmra.mrb[12].mxu0 %v9843_v11  ;;  %8564 = vmatprep.mubr.bf16.mxu1 %v9845_v14  ;;  %v9906_v11 = vld [vmem:[%s10441_s16 + $0x68] sm:$0xff]   ;;  %v9911_v14 = vld [vmem:[%s10441_s16 + $0x70] sm:$0xff]  }
  0xc1   : > { %8948 = vmatprep.mubr.bf16.mxu0 %v9846_v15  ;;  %8593 = vmatpush3.bf16.msra.mxu1 %v9860_v12  ;;  %v9907_v12 = vld [vmem:[%s10441_s16 + $0x68] sm:$0xff]   ;;  %v9912_v15 = vld [vmem:[%s10441_s16 + $0x78] sm:$0xff]  }
  0xc2   : > { %8977 = vmatpush3.bf16.msra.mxu0 %v9862_v13  ;;  %8594 = vmatprep.subr.bf16.mxu1 %v9866_v16  ;;  %v9909_v13 = vld [vmem:[%s10441_s16 + $0x70] sm:$0xff]  }
  0xc3   : > { %8978 = vmatprep.subr.bf16.mxu0 %v9868_v17 }
  0xc5   : > { %8595 = vmatpush3.bf16.msra.mxu1 %v9866_v16  ;;  %v9913_v16 = vld [vmem:[%s10441_s16 + $0x78] sm:$0xff]  }
  0xc6   : > { %8979 = vmatpush3.bf16.msra.mxu0 %v9868_v17  ;;  %8628 = vmatprep.subr.bf16.mxu1 %v9872_v20  ;;  %v9915_v17 = vld [vmem:[%s10441_s16 + $0x80] sm:$0xff]  }
  0xc7   : > { %8565 = vmatmul.mubr.bf16.gmra.mrb[16].mxu1 %v9847_v18  ;;  %9012 = vmatprep.subr.bf16.mxu0 %v9874_v21  ;;  %v9917_v18 = vld [vmem:[%s10519_s13] sm:$0xff]  }
  0xc8   : > { %8949 = vmatmul.mubr.bf16.gmra.mrb[16].mxu0 %v9849_v19  ;;  %8568 = vmatprep.mubr.bf16.mxu1 %v9851_v22  ;;  %v9918_v19 = vld [vmem:[%s10519_s13 + $0x8] sm:$0xff]   ;;  %v9923_v22 = vld [vmem:[%s10519_s13 + $0x10] sm:$0xff]  }
  0xc9   : > { %8952 = vmatprep.mubr.bf16.mxu0 %v9852_v23  ;;  %v9924_v23 = vld [vmem:[%s10519_s13 + $0x18] sm:$0xff]  }
  0xcf   : > { %8569 = vmatmul.mubr.bf16.gmra.mrb[20].mxu1 %v9853_v24  ;;  %v9926_v24 = vld [vmem:[%s10968_s8 + $0x148] sm:$0xff]  }
  0xd0   : > { %8953 = vmatmul.mubr.bf16.gmra.mrb[20].mxu0 %v9855_v25  ;;  %8572 = vmatprep.mubr.bf16.mxu1 %v9857_v26  ;;  %v9928_v25 = vld [vmem:[%s10968_s8 + $0x348] sm:$0xff]   ;;  %v9925_v26 = vld [vmem:[%s10519_s13 + $0x18] sm:$0xff]  }
  0xd1   : > { %8956 = vmatprep.mubr.bf16.mxu0 %v9858_v27  ;;  %v9932_v27 = vld [vmem:[%s10968_s8 + $0x150] sm:$0xff]  }
  0xd7   : > { %8573 = vmatmul.mubr.bf16.gmra.mrb[24].mxu1 %v9859_v28  ;;  %v9934_v28 = vld [vmem:[%s10968_s8 + $0x350] sm:$0xff]  }
  0xd8   : > { %8957 = vmatmul.mubr.bf16.gmra.mrb[24].mxu0 %v9861_v29  ;;  %8576 = vmatprep.mubr.bf16.mxu1 %v9863_v30  ;;  %v9927_v29 = vld [vmem:[%s10519_s13 + $0x20] sm:$0xff]  }
  0xd9   : > { %8960 = vmatprep.mubr.bf16.mxu0 %v9864_v31  ;;  %v9929_v30 = vld [vmem:[%s10519_s13 + $0x20] sm:$0xff]   ;;  %v9930_v31 = vld [vmem:[%s10519_s13 + $0x28] sm:$0xff]  }
  0xdf   : > { %8577 = vmatmul.mubr.bf16.gmra.mrb[28].mxu1 %v9865_v32  ;;  %v9938_v32 = vld [vmem:[%s10968_s8 + $0x158] sm:$0xff]  }
  0xe0   : > { %8961 = vmatmul.mubr.bf16.gmra.mrb[28].mxu0 %v9867_v33  ;;  %8596 = vmatprep.mubr.bf16.mxu1 %v9869_v34  ;;  %v9940_v33 = vld [vmem:[%s10968_s8 + $0x358] sm:$0xff]   ;;  %v9931_v34 = vld [vmem:[%s10519_s13 + $0x28] sm:$0xff]  }
  0xe1   : > { %8980 = vmatprep.mubr.bf16.mxu0 %v9870_v35  ;;  %v9933_v35 = vld [vmem:[%s10519_s13 + $0x30] sm:$0xff]  }
  0xe7   : > { %8597 = vmatmul.mubr.bf16.vlgmr.msra.gmra.mrb[0].mxu1 %v9871_v36  ;;  %v9944_v36 = vld [vmem:[%s10968_s8 + $0x160] sm:$0xff]  }
  0xe8   : > { %8981 = vmatmul.mubr.bf16.vlgmr.msra.gmra.mrb[0].mxu0 %v9873_v37  ;;  %8629 = vmatpush3.bf16.msra.mxu1 %v9872_v20  ;;  %v9919_v20 = vld [vmem:[%s10519_s13 + $0x8] sm:$0xff]   ;;  %v9946_v37 = vld [vmem:[%s10968_s8 + $0x360] sm:$0xff]  }
  0xe9   : > { %9013 = vmatpush3.bf16.msra.mxu0 %v9874_v21  ;;  %8600 = vmatprep.mubr.bf16.mxu1 %v9875_v38  ;;  %v9921_v21 = vld [vmem:[%s10519_s13 + $0x10] sm:$0xff]  }
  0xea   : > { %8984 = vmatprep.mubr.bf16.mxu0 %v9876_v39  ;;  %8630 = vmatprep.subr.bf16.mxu1 %v9878_v40  ;;  %v9935_v38 = vld [vmem:[%s10519_s13 + $0x30] sm:$0xff]   ;;  %v9936_v39 = vld [vmem:[%s10519_s13 + $0x38] sm:$0xff]  }
  0xeb   : > { %9014 = vmatprep.subr.bf16.mxu0 %v9880_v41 }
  0xec   : > { %8631 = vmatpush3.bf16.msra.mxu1 %v9878_v40  ;;  %v9950_v40 = vld [vmem:[%s10968_s8 + $0x168] sm:$0xff]  }
  0xed   : > { %9015 = vmatpush3.bf16.msra.mxu0 %v9880_v41  ;;  %8632 = vmatprep.subr.bf16.mxu1 %v9884_v43  ;;  %v9952_v41 = vld [vmem:[%s10968_s8 + $0x368] sm:$0xff]  }
  0xee   : > { %9016 = vmatprep.subr.bf16.mxu0 %v9886_v44 }
  0xef   : > { %8601 = vmatmul.mubr.bf16.gmra.mrb[4].mxu1 %v9877_v42  ;;  %v9937_v42 = vld [vmem:[%s10519_s13 + $0x38] sm:$0xff]  }
  0xf0   : > { %8985 = vmatmul.mubr.bf16.gmra.mrb[4].mxu0 %v9879_v45  ;;  %8604 = vmatprep.mubr.bf16.mxu1 %v9881_v46  ;;  %v9958_v45 = vld [vmem:[%s10968_s8 + $0x370] sm:$0xff]   ;;  %v9941_v46 = vld [vmem:[%s10519_s13 + $0x40] sm:$0xff]  }
  0xf1   : > { %8988 = vmatprep.mubr.bf16.mxu0 %v9882_v47  ;;  %8633 = vmatpush3.bf16.msra.mxu1 %v9884_v43  ;;  %v9939_v43 = vld [vmem:[%s10519_s13 + $0x40] sm:$0xff]   ;;  %v9942_v47 = vld [vmem:[%s10519_s13 + $0x48] sm:$0xff]  }
  0xf2   : > { %9017 = vmatpush3.bf16.msra.mxu0 %v9886_v44  ;;  %8634 = vmatprep.subr.bf16.mxu1 %v9890_v48  ;;  %v9956_v44 = vld [vmem:[%s10968_s8 + $0x170] sm:$0xff]  }
  0xf3   : > { %9018 = vmatprep.subr.bf16.mxu0 %v9892_v49 }
  0xf5   : > { %8635 = vmatpush3.bf16.msra.mxu1 %v9890_v48  ;;  %v9962_v48 = vld [vmem:[%s10968_s8 + $0x178] sm:$0xff]  }
  0xf6   : > { %9019 = vmatpush3.bf16.msra.mxu0 %v9892_v49  ;;  %8636 = vmatprep.subr.bf16.mxu1 %v9896_v52  ;;  %v9964_v49 = vld [vmem:[%s10968_s8 + $0x378] sm:$0xff]  }
  0xf7   : > { %8605 = vmatmul.mubr.bf16.gmra.mrb[8].mxu1 %v9883_v50  ;;  %9020 = vmatprep.subr.bf16.mxu0 %v9898_v53  ;;  %v9943_v50 = vld [vmem:[%s10519_s13 + $0x48] sm:$0xff]  }
  0xf8   : > { %8989 = vmatmul.mubr.bf16.gmra.mrb[8].mxu0 %v9885_v51  ;;  %8608 = vmatprep.mubr.bf16.mxu1 %v9887_v54  ;;  %v9945_v51 = vld [vmem:[%s10519_s13 + $0x50] sm:$0xff]  }
  0xf9   : > { %8992 = vmatprep.mubr.bf16.mxu0 %v9888_v55  ;;  %8637 = vmatpush3.bf16.msra.mxu1 %v9896_v52  ;;  %v9968_v52 = vld [vmem:[%s10968_s8 + $0x180] sm:$0xff]   ;;  %v9947_v54 = vld [vmem:[%s10519_s13 + $0x50] sm:$0xff]   ;;  %v9948_v55 = vld [vmem:[%s10519_s13 + $0x58] sm:$0xff]  }
  0xfa   : > { %9021 = vmatpush3.bf16.msra.mxu0 %v9898_v53  ;;  %8638 = vmatprep.subr.bf16.mxu1 %v9902_v56  ;;  %v9970_v53 = vld [vmem:[%s10968_s8 + $0x380] sm:$0xff]  }
  0xfb   : > { %9022 = vmatprep.subr.bf16.mxu0 %v9904_v57 }
  0xfd   : > { %8639 = vmatpush3.bf16.msra.mxu1 %v9902_v56  ;;  %v9949_v56 = vld [vmem:[%s10519_s13 + $0x58] sm:$0xff]  }
  0xfe   : > { %9023 = vmatpush3.bf16.msra.mxu0 %v9904_v57  ;;  %8640 = vmatprep.subr.bf16.mxu1 %v9908_v60  ;;  %v9951_v57 = vld [vmem:[%s10519_s13 + $0x60] sm:$0xff]  }
  0xff   : > { %8609 = vmatmul.mubr.bf16.gmra.mrb[12].mxu1 %v9889_v58  ;;  %9024 = vmatprep.subr.bf16.mxu0 %v9910_v61  ;;  %v9953_v58 = vld [vmem:[%s10519_s13 + $0x60] sm:$0xff]  }
 0x100   : > { %8993 = vmatmul.mubr.bf16.gmra.mrb[12].mxu0 %v9891_v59  ;;  %8612 = vmatprep.mubr.bf16.mxu1 %v9893_v62  ;;  %v9954_v59 = vld [vmem:[%s10519_s13 + $0x68] sm:$0xff]   ;;  %v9959_v62 = vld [vmem:[%s10519_s13 + $0x70] sm:$0xff]  }
 0x101   : > { %8996 = vmatprep.mubr.bf16.mxu0 %v9894_v63  ;;  %8641 = vmatpush3.bf16.msra.mxu1 %v9908_v60  ;;  %v9955_v60 = vld [vmem:[%s10519_s13 + $0x68] sm:$0xff]   ;;  %v9960_v63 = vld [vmem:[%s10519_s13 + $0x78] sm:$0xff]  }
 0x102   : > { %9025 = vmatpush3.bf16.msra.mxu0 %v9910_v61  ;;  %8642 = vmatprep.subr.bf16.mxu1 %v9914_v0  ;;  %v9957_v61 = vld [vmem:[%s10519_s13 + $0x70] sm:$0xff]  }
 0x103   : > { %9026 = vmatprep.subr.bf16.mxu0 %v9916_v1 }
 0x105   : > { %8643 = vmatpush3.bf16.msra.mxu1 %v9914_v0  ;;  %v9961_v0 = vld [vmem:[%s10519_s13 + $0x78] sm:$0xff]  }
 0x106   : > { %9027 = vmatpush3.bf16.msra.mxu0 %v9916_v1  ;;  %8676 = vmatprep.subr.bf16.mxu1 %v9920_v4  ;;  %v9963_v1 = vld [vmem:[%s10519_s13 + $0x80] sm:$0xff]   ;;  %s7264_s13 = sshll.u32 %s10977_s17, 1 }
 0x107   : > { %8613 = vmatmul.mubr.bf16.gmra.mrb[16].mxu1 %v9895_v2  ;;  %9060 = vmatprep.subr.bf16.mxu0 %v9922_v5  ;;  %v9965_v2 = vld [vmem:[%s10597_s30] sm:$0xff]   ;;  %s596_s23 = scalar_lea.vmem %s10971_s11, %s7264_s13 }
 0x108   : > { %8997 = vmatmul.mubr.bf16.gmra.mrb[16].mxu0 %v9897_v3  ;;  %8616 = vmatprep.mubr.bf16.mxu1 %v9899_v6  ;;  %v9966_v3 = vld [vmem:[%s10597_s30 + $0x8] sm:$0xff]   ;;  %v9971_v6 = vld [vmem:[%s10597_s30 + $0x10] sm:$0xff]  }
 0x109   : > { %9000 = vmatprep.mubr.bf16.mxu0 %v9900_v7  ;;  %v9972_v7 = vld [vmem:[%s10597_s30 + $0x18] sm:$0xff]  }
 0x10f   : > { %8617 = vmatmul.mubr.bf16.gmra.mrb[20].mxu1 %v9901_v8  ;;  %v9974_v8 = vld [vmem:[%s10968_s8 + $0x188] sm:$0xff]  }
 0x110   : > { %9001 = vmatmul.mubr.bf16.gmra.mrb[20].mxu0 %v9903_v9  ;;  %8620 = vmatprep.mubr.bf16.mxu1 %v9905_v10  ;;  %v9976_v9 = vld [vmem:[%s10968_s8 + $0x388] sm:$0xff]   ;;  %v9973_v10 = vld [vmem:[%s10597_s30 + $0x18] sm:$0xff]  }
 0x111   : > { %9004 = vmatprep.mubr.bf16.mxu0 %v9906_v11  ;;  %v9980_v11 = vld [vmem:[%s10968_s8 + $0x190] sm:$0xff]  }
 0x117   : > { %8621 = vmatmul.mubr.bf16.gmra.mrb[24].mxu1 %v9907_v12  ;;  %v9975_v12 = vld [vmem:[%s10597_s30 + $0x20] sm:$0xff]  }
 0x118   : > { %9005 = vmatmul.mubr.bf16.gmra.mrb[24].mxu0 %v9909_v13  ;;  %8624 = vmatprep.mubr.bf16.mxu1 %v9911_v14  ;;  %v9977_v13 = vld [vmem:[%s10597_s30 + $0x20] sm:$0xff]   ;;  %v9982_v14 = vld [vmem:[%s10968_s8 + $0x390] sm:$0xff]  }
 0x119   : > { %9008 = vmatprep.mubr.bf16.mxu0 %v9912_v15  ;;  %v9978_v15 = vld [vmem:[%s10597_s30 + $0x28] sm:$0xff]  }
 0x11f   : > { %8625 = vmatmul.mubr.bf16.gmra.mrb[28].mxu1 %v9913_v16  ;;  %v9986_v16 = vld [vmem:[%s10968_s8 + $0x198] sm:$0xff]  }
 0x120   : > { %9009 = vmatmul.mubr.bf16.gmra.mrb[28].mxu0 %v9915_v17  ;;  %8644 = vmatprep.mubr.bf16.mxu1 %v9917_v18  ;;  %v9988_v17 = vld [vmem:[%s10968_s8 + $0x398] sm:$0xff]   ;;  %v9992_v18 = vld [vmem:[%s10968_s8 + $0x1a0] sm:$0xff]  }
 0x121   : > { %9028 = vmatprep.mubr.bf16.mxu0 %v9918_v19  ;;  %v9979_v19 = vld [vmem:[%s10597_s30 + $0x28] sm:$0xff]  }
 0x127   : > { %8645 = vmatmul.mubr.bf16.vlgmr.msra.gmra.mrb[0].mxu1 %v9919_v20  ;;  %v9994_v20 = vld [vmem:[%s10968_s8 + $0x3a0] sm:$0xff]  }
 0x128   : > { %9029 = vmatmul.mubr.bf16.vlgmr.msra.gmra.mrb[0].mxu0 %v9921_v21  ;;  %8677 = vmatpush3.bf16.msra.mxu1 %v9920_v4  ;;  %v9967_v4 = vld [vmem:[%s10597_s30 + $0x8] sm:$0xff]   ;;  %v9981_v21 = vld [vmem:[%s10597_s30 + $0x30] sm:$0xff]  }
 0x129   : > { %9061 = vmatpush3.bf16.msra.mxu0 %v9922_v5  ;;  %8648 = vmatprep.mubr.bf16.mxu1 %v9923_v22  ;;  %v9969_v5 = vld [vmem:[%s10597_s30 + $0x10] sm:$0xff]  }
 0x12a   : > { %9032 = vmatprep.mubr.bf16.mxu0 %v9924_v23  ;;  %8678 = vmatprep.subr.bf16.mxu1 %v9926_v24  ;;  %v9983_v22 = vld [vmem:[%s10597_s30 + $0x30] sm:$0xff]   ;;  %v9984_v23 = vld [vmem:[%s10597_s30 + $0x38] sm:$0xff]  }
 0x12b   : > { %9062 = vmatprep.subr.bf16.mxu0 %v9928_v25 }
 0x12c   : > { %8679 = vmatpush3.bf16.msra.mxu1 %v9926_v24  ;;  %v9998_v24 = vld [vmem:[%s10968_s8 + $0x1a8] sm:$0xff]  }
 0x12d   : > { %9063 = vmatpush3.bf16.msra.mxu0 %v9928_v25  ;;  %8680 = vmatprep.subr.bf16.mxu1 %v9932_v27  ;;  %v10000_v25 = vld [vmem:[%s10968_s8 + $0x3a8] sm:$0xff]  }
 0x12e   : > { %9064 = vmatprep.subr.bf16.mxu0 %v9934_v28 }
 0x12f   : > { %8649 = vmatmul.mubr.bf16.gmra.mrb[4].mxu1 %v9925_v26  ;;  %v10004_v26 = vld [vmem:[%s10968_s8 + $0x1b0] sm:$0xff]  }
 0x130   : > { %9033 = vmatmul.mubr.bf16.gmra.mrb[4].mxu0 %v9927_v29  ;;  %8652 = vmatprep.mubr.bf16.mxu1 %v9929_v30  ;;  %v9987_v29 = vld [vmem:[%s10597_s30 + $0x40] sm:$0xff]  }
 0x131   : > { %9036 = vmatprep.mubr.bf16.mxu0 %v9930_v31  ;;  %8681 = vmatpush3.bf16.msra.mxu1 %v9932_v27  ;;  %v9985_v27 = vld [vmem:[%s10597_s30 + $0x38] sm:$0xff]   ;;  %v9989_v30 = vld [vmem:[%s10597_s30 + $0x40] sm:$0xff]   ;;  %v9990_v31 = vld [vmem:[%s10597_s30 + $0x48] sm:$0xff]  }
 0x132   : > { %9065 = vmatpush3.bf16.msra.mxu0 %v9934_v28  ;;  %8682 = vmatprep.subr.bf16.mxu1 %v9938_v32  ;;  %v10006_v28 = vld [vmem:[%s10968_s8 + $0x3b0] sm:$0xff]  }
 0x133   : > { %9066 = vmatprep.subr.bf16.mxu0 %v9940_v33 }
 0x135   : > { %8683 = vmatpush3.bf16.msra.mxu1 %v9938_v32  ;;  %v10010_v32 = vld [vmem:[%s10968_s8 + $0x1b8] sm:$0xff]  }
 0x136   : > { %9067 = vmatpush3.bf16.msra.mxu0 %v9940_v33  ;;  %8684 = vmatprep.subr.bf16.mxu1 %v9944_v36  ;;  %v10012_v33 = vld [vmem:[%s10968_s8 + $0x3b8] sm:$0xff]  }
 0x137   : > { %8653 = vmatmul.mubr.bf16.gmra.mrb[8].mxu1 %v9931_v34  ;;  %9068 = vmatprep.subr.bf16.mxu0 %v9946_v37  ;;  %v10016_v34 = vld [vmem:[%s10968_s8 + $0x1c0] sm:$0xff]  }
 0x138   : > { %9037 = vmatmul.mubr.bf16.gmra.mrb[8].mxu0 %v9933_v35  ;;  %8656 = vmatprep.mubr.bf16.mxu1 %v9935_v38  ;;  %v9991_v35 = vld [vmem:[%s10597_s30 + $0x48] sm:$0xff]   ;;  %v9995_v38 = vld [vmem:[%s10597_s30 + $0x50] sm:$0xff]  }
 0x139   : > { %9040 = vmatprep.mubr.bf16.mxu0 %v9936_v39  ;;  %8685 = vmatpush3.bf16.msra.mxu1 %v9944_v36  ;;  %v10018_v36 = vld [vmem:[%s10968_s8 + $0x3c0] sm:$0xff]   ;;  %v9996_v39 = vld [vmem:[%s10597_s30 + $0x58] sm:$0xff]  }
 0x13a   : > { %9069 = vmatpush3.bf16.msra.mxu0 %v9946_v37  ;;  %8686 = vmatprep.subr.bf16.mxu1 %v9950_v40  ;;  %v9993_v37 = vld [vmem:[%s10597_s30 + $0x50] sm:$0xff]  }
 0x13b   : > { %9070 = vmatprep.subr.bf16.mxu0 %v9952_v41 }
 0x13d   : > { %8687 = vmatpush3.bf16.msra.mxu1 %v9950_v40  ;;  %v9997_v40 = vld [vmem:[%s10597_s30 + $0x58] sm:$0xff]  }
 0x13e   : > { %9071 = vmatpush3.bf16.msra.mxu0 %v9952_v41  ;;  %8688 = vmatprep.subr.bf16.mxu1 %v9956_v44  ;;  %v9999_v41 = vld [vmem:[%s10597_s30 + $0x60] sm:$0xff]  }
 0x13f   : > { %8657 = vmatmul.mubr.bf16.gmra.mrb[12].mxu1 %v9937_v42  ;;  %9072 = vmatprep.subr.bf16.mxu0 %v9958_v45  ;;  %v10001_v42 = vld [vmem:[%s10597_s30 + $0x60] sm:$0xff]  }
 0x140   : > { %9041 = vmatmul.mubr.bf16.gmra.mrb[12].mxu0 %v9939_v43  ;;  %8660 = vmatprep.mubr.bf16.mxu1 %v9941_v46  ;;  %v10002_v43 = vld [vmem:[%s10597_s30 + $0x68] sm:$0xff]   ;;  %v10007_v46 = vld [vmem:[%s10597_s30 + $0x70] sm:$0xff]  }
 0x141   : > { %9044 = vmatprep.mubr.bf16.mxu0 %v9942_v47  ;;  %8689 = vmatpush3.bf16.msra.mxu1 %v9956_v44  ;;  %v10003_v44 = vld [vmem:[%s10597_s30 + $0x68] sm:$0xff]   ;;  %v10008_v47 = vld [vmem:[%s10597_s30 + $0x78] sm:$0xff]  }
 0x142   : > { %9073 = vmatpush3.bf16.msra.mxu0 %v9958_v45  ;;  %8690 = vmatprep.subr.bf16.mxu1 %v9962_v48  ;;  %v10005_v45 = vld [vmem:[%s10597_s30 + $0x70] sm:$0xff]  }
 0x143   : > { %9074 = vmatprep.subr.bf16.mxu0 %v9964_v49 }
 0x145   : > { %8691 = vmatpush3.bf16.msra.mxu1 %v9962_v48  ;;  %v10009_v48 = vld [vmem:[%s10597_s30 + $0x78] sm:$0xff]  }
 0x146   : > { %9075 = vmatpush3.bf16.msra.mxu0 %v9964_v49  ;;  %8724 = vmatprep.subr.bf16.mxu1 %v9968_v52  ;;  %v10011_v49 = vld [vmem:[%s10597_s30 + $0x80] sm:$0xff]   ;;  %s7924_s30 = sshll.u32 %s10977_s17, 7 }
 0x147   : > { %8661 = vmatmul.mubr.bf16.gmra.mrb[16].mxu1 %v9943_v50  ;;  %9108 = vmatprep.subr.bf16.mxu0 %v9970_v53  ;;  %v10013_v50 = vld [vmem:[%s10651_s29] sm:$0xff]   ;;  %s10900_s16 = scalar_lea.vmem %s10970_s10, %s7924_s30 }
 0x148   : > { %9045 = vmatmul.mubr.bf16.gmra.mrb[16].mxu0 %v9945_v51  ;;  %8664 = vmatprep.mubr.bf16.mxu1 %v9947_v54  ;;  %v10014_v51 = vld [vmem:[%s10651_s29 + $0x8] sm:$0xff]   ;;  %v10019_v54 = vld [vmem:[%s10651_s29 + $0x10] sm:$0xff]  }
 0x149   : > { %9048 = vmatprep.mubr.bf16.mxu0 %v9948_v55  ;;  %v10020_v55 = vld [vmem:[%s10651_s29 + $0x18] sm:$0xff]  }
 0x14f   : > { %8665 = vmatmul.mubr.bf16.gmra.mrb[20].mxu1 %v9949_v56  ;;  %v10022_v56 = vld [vmem:[%s10968_s8 + $0x1c8] sm:$0xff]  }
 0x150   : > { %9049 = vmatmul.mubr.bf16.gmra.mrb[20].mxu0 %v9951_v57  ;;  %8668 = vmatprep.mubr.bf16.mxu1 %v9953_v58  ;;  %v10024_v57 = vld [vmem:[%s10968_s8 + $0x3c8] sm:$0xff]   ;;  %v10028_v58 = vld [vmem:[%s10968_s8 + $0x1d0] sm:$0xff]  }
 0x151   : > { %9052 = vmatprep.mubr.bf16.mxu0 %v9954_v59  ;;  %v10030_v59 = vld [vmem:[%s10968_s8 + $0x3d0] sm:$0xff]  }
 0x157   : > { %8669 = vmatmul.mubr.bf16.gmra.mrb[24].mxu1 %v9955_v60  ;;  %v10021_v60 = vld [vmem:[%s10651_s29 + $0x18] sm:$0xff]  }
 0x158   : > { %9053 = vmatmul.mubr.bf16.gmra.mrb[24].mxu0 %v9957_v61  ;;  %8672 = vmatprep.mubr.bf16.mxu1 %v9959_v62  ;;  %v10023_v61 = vld [vmem:[%s10651_s29 + $0x20] sm:$0xff]  }
 0x159   : > { %9056 = vmatprep.mubr.bf16.mxu0 %v9960_v63  ;;  %v10025_v62 = vld [vmem:[%s10651_s29 + $0x20] sm:$0xff]   ;;  %v10026_v63 = vld [vmem:[%s10651_s29 + $0x28] sm:$0xff]  }
 0x15f   : > { %8673 = vmatmul.mubr.bf16.gmra.mrb[28].mxu1 %v9961_v0  ;;  %v10034_v0 = vld [vmem:[%s10968_s8 + $0x1d8] sm:$0xff]  }
 0x160   : > { %9057 = vmatmul.mubr.bf16.gmra.mrb[28].mxu0 %v9963_v1  ;;  %8692 = vmatprep.mubr.bf16.mxu1 %v9965_v2  ;;  %v10036_v1 = vld [vmem:[%s10968_s8 + $0x3d8] sm:$0xff]   ;;  %v10040_v2 = vld [vmem:[%s10968_s8 + $0x1e0] sm:$0xff]  }
 0x161   : > { %9076 = vmatprep.mubr.bf16.mxu0 %v9966_v3  ;;  %v10027_v3 = vld [vmem:[%s10651_s29 + $0x28] sm:$0xff]  }
 0x167   : > { %8693 = vmatmul.mubr.bf16.vlgmr.msra.gmra.mrb[0].mxu1 %v9967_v4  ;;  %v10042_v4 = vld [vmem:[%s10968_s8 + $0x3e0] sm:$0xff]  }
 0x168   : > { %9077 = vmatmul.mubr.bf16.vlgmr.msra.gmra.mrb[0].mxu0 %v9969_v5  ;;  %8725 = vmatpush3.bf16.msra.mxu1 %v9968_v52  ;;  %v10015_v52 = vld [vmem:[%s10651_s29 + $0x8] sm:$0xff]   ;;  %v10029_v5 = vld [vmem:[%s10651_s29 + $0x30] sm:$0xff]  }
 0x169   : > { %9109 = vmatpush3.bf16.msra.mxu0 %v9970_v53  ;;  %8696 = vmatprep.mubr.bf16.mxu1 %v9971_v6  ;;  %v10017_v53 = vld [vmem:[%s10651_s29 + $0x10] sm:$0xff]  }
 0x16a   : > { %9080 = vmatprep.mubr.bf16.mxu0 %v9972_v7  ;;  %8726 = vmatprep.subr.bf16.mxu1 %v9974_v8  ;;  %v10031_v6 = vld [vmem:[%s10651_s29 + $0x30] sm:$0xff]   ;;  %v10032_v7 = vld [vmem:[%s10651_s29 + $0x38] sm:$0xff]  }
 0x16b   : > { %9110 = vmatprep.subr.bf16.mxu0 %v9976_v9 }
 0x16c   : > { %8727 = vmatpush3.bf16.msra.mxu1 %v9974_v8  ;;  %v10046_v8 = vld [vmem:[%s10968_s8 + $0x1e8] sm:$0xff]  }
 0x16d   : > { %9111 = vmatpush3.bf16.msra.mxu0 %v9976_v9  ;;  %8728 = vmatprep.subr.bf16.mxu1 %v9980_v11  ;;  %v10048_v9 = vld [vmem:[%s10968_s8 + $0x3e8] sm:$0xff]  }
 0x16e   : > { %9112 = vmatprep.subr.bf16.mxu0 %v9982_v14 }
 0x16f   : > { %8697 = vmatmul.mubr.bf16.gmra.mrb[4].mxu1 %v9973_v10  ;;  %v10052_v10 = vld [vmem:[%s10968_s8 + $0x1f0] sm:$0xff]  }
 0x170   : > { %9081 = vmatmul.mubr.bf16.gmra.mrb[4].mxu0 %v9975_v12  ;;  %8700 = vmatprep.mubr.bf16.mxu1 %v9977_v13  ;;  %v10054_v12 = vld [vmem:[%s10968_s8 + $0x3f0] sm:$0xff]   ;;  %v10035_v13 = vld [vmem:[%s10651_s29 + $0x40] sm:$0xff]  }
 0x171   : > { %9084 = vmatprep.mubr.bf16.mxu0 %v9978_v15  ;;  %8729 = vmatpush3.bf16.msra.mxu1 %v9980_v11  ;;  %v10033_v11 = vld [vmem:[%s10651_s29 + $0x38] sm:$0xff]   ;;  %v10038_v15 = vld [vmem:[%s10651_s29 + $0x48] sm:$0xff]  }
 0x172   : > { %9113 = vmatpush3.bf16.msra.mxu0 %v9982_v14  ;;  %8730 = vmatprep.subr.bf16.mxu1 %v9986_v16  ;;  %v10037_v14 = vld [vmem:[%s10651_s29 + $0x40] sm:$0xff]  }
 0x173   : > { %9114 = vmatprep.subr.bf16.mxu0 %v9988_v17 }
 0x175   : > { %8731 = vmatpush3.bf16.msra.mxu1 %v9986_v16  ;;  %v10058_v16 = vld [vmem:[%s10968_s8 + $0x1f8] sm:$0xff]  }
 0x176   : > { %9115 = vmatpush3.bf16.msra.mxu0 %v9988_v17  ;;  %8732 = vmatprep.subr.bf16.mxu1 %v9992_v18  ;;  %v10060_v17 = vld [vmem:[%s10968_s8 + $0x3f8] sm:$0xff]  }
 0x177   : > { %8701 = vmatmul.mubr.bf16.gmra.mrb[8].mxu1 %v9979_v19  ;;  %9116 = vmatprep.subr.bf16.mxu0 %v9994_v20  ;;  %v10041_v19 = vld [vmem:[%s10651_s29 + $0x50] sm:$0xff]  }
 0x178   : > { %9085 = vmatmul.mubr.bf16.gmra.mrb[8].mxu0 %v9981_v21  ;;  %8704 = vmatprep.mubr.bf16.mxu1 %v9983_v22  ;;  %v10044_v21 = vld [vmem:[%s10651_s29 + $0x58] sm:$0xff]  }
 0x179   : > { %9088 = vmatprep.mubr.bf16.mxu0 %v9984_v23  ;;  %8733 = vmatpush3.bf16.msra.mxu1 %v9992_v18  ;;  %v10039_v18 = vld [vmem:[%s10651_s29 + $0x48] sm:$0xff]   ;;  %v10045_v22 = vld [vmem:[%s10651_s29 + $0x58] sm:$0xff]   ;;  %v10047_v23 = vld [vmem:[%s10651_s29 + $0x60] sm:$0xff]  }
 0x17a   : > { %9117 = vmatpush3.bf16.msra.mxu0 %v9994_v20  ;;  %8734 = vmatprep.subr.bf16.mxu1 %v9998_v24  ;;  %v10043_v20 = vld [vmem:[%s10651_s29 + $0x50] sm:$0xff]  }
 0x17b   : > { %9118 = vmatprep.subr.bf16.mxu0 %v10000_v25 }
 0x17d   : > { %8735 = vmatpush3.bf16.msra.mxu1 %v9998_v24  ;;  %v10049_v24 = vld [vmem:[%s10651_s29 + $0x60] sm:$0xff]  }
 0x17e   : > { %9119 = vmatpush3.bf16.msra.mxu0 %v10000_v25  ;;  %8736 = vmatprep.subr.bf16.mxu1 %v10004_v26  ;;  %v10050_v25 = vld [vmem:[%s10651_s29 + $0x68] sm:$0xff]  }
 0x17f   : > { %8705 = vmatmul.mubr.bf16.gmra.mrb[12].mxu1 %v9985_v27  ;;  %9120 = vmatprep.subr.bf16.mxu0 %v10006_v28  ;;  %v10053_v27 = vld [vmem:[%s10651_s29 + $0x70] sm:$0xff]  }
 0x180   : > { %9089 = vmatmul.mubr.bf16.gmra.mrb[12].mxu0 %v9987_v29  ;;  %8708 = vmatprep.mubr.bf16.mxu1 %v9989_v30  ;;  %v10056_v29 = vld [vmem:[%s10651_s29 + $0x78] sm:$0xff]  }
 0x181   : > { %9092 = vmatprep.mubr.bf16.mxu0 %v9990_v31  ;;  %8737 = vmatpush3.bf16.msra.mxu1 %v10004_v26  ;;  %v10051_v26 = vld [vmem:[%s10651_s29 + $0x68] sm:$0xff]   ;;  %v10057_v30 = vld [vmem:[%s10651_s29 + $0x78] sm:$0xff]   ;;  %v10059_v31 = vld [vmem:[%s10651_s29 + $0x80] sm:$0xff]  }
 0x182   : > { %9121 = vmatpush3.bf16.msra.mxu0 %v10006_v28  ;;  %8738 = vmatprep.subr.bf16.mxu1 %v10010_v32  ;;  %v10055_v28 = vld [vmem:[%s10651_s29 + $0x70] sm:$0xff]  }
 0x183   : > { %9122 = vmatprep.subr.bf16.mxu0 %v10012_v33 }
 0x185   : > { %8739 = vmatpush3.bf16.msra.mxu1 %v10010_v32  ;;  %v10061_v32 = vld [vmem:[%s10705_s21] sm:$0xff]  }
 0x186   : > { %9123 = vmatpush3.bf16.msra.mxu0 %v10012_v33  ;;  %8772 = vmatprep.subr.bf16.mxu1 %v10016_v34  ;;  %v10062_v33 = vld [vmem:[%s10705_s21 + $0x8] sm:$0xff]  }
 0x187   : > { %8709 = vmatmul.mubr.bf16.gmra.mrb[16].mxu1 %v9991_v35  ;;  %9156 = vmatprep.subr.bf16.mxu0 %v10018_v36  ;;  %v10064_v35 = vld [vmem:[%s10705_s21 + $0x10] sm:$0xff]  }
 0x188   : > { %9093 = vmatmul.mubr.bf16.gmra.mrb[16].mxu0 %v9993_v37  ;;  %8712 = vmatprep.mubr.bf16.mxu1 %v9995_v38  ;;  %v10066_v37 = vld [vmem:[%s10705_s21 + $0x18] sm:$0xff]  }
 0x189   : > { %9096 = vmatprep.mubr.bf16.mxu0 %v9996_v39  ;;  %v10067_v38 = vld [vmem:[%s10705_s21 + $0x18] sm:$0xff]   ;;  %v10068_v39 = vld [vmem:[%s10705_s21 + $0x20] sm:$0xff]  }
 0x18f   : > { %8713 = vmatmul.mubr.bf16.gmra.mrb[20].mxu1 %v9997_v40  ;;  %v10069_v40 = vld [vmem:[%s10705_s21 + $0x20] sm:$0xff]  }
 0x190   : > { %9097 = vmatmul.mubr.bf16.gmra.mrb[20].mxu0 %v9999_v41  ;;  %8716 = vmatprep.mubr.bf16.mxu1 %v10001_v42  ;;  %v10070_v41 = vld [vmem:[%s10705_s21 + $0x28] sm:$0xff]  }
 0x191   : > { %9100 = vmatprep.mubr.bf16.mxu0 %v10002_v43  ;;  %v10071_v42 = vld [vmem:[%s10705_s21 + $0x28] sm:$0xff]   ;;  %v10072_v43 = vld [vmem:[%s10705_s21 + $0x30] sm:$0xff]  }
 0x197   : > { %8717 = vmatmul.mubr.bf16.gmra.mrb[24].mxu1 %v10003_v44  ;;  %v10073_v44 = vld [vmem:[%s10705_s21 + $0x30] sm:$0xff]  }
 0x198   : > { %9101 = vmatmul.mubr.bf16.gmra.mrb[24].mxu0 %v10005_v45  ;;  %8720 = vmatprep.mubr.bf16.mxu1 %v10007_v46  ;;  %v10074_v45 = vld [vmem:[%s10705_s21 + $0x38] sm:$0xff]  }
 0x199   : > { %9104 = vmatprep.mubr.bf16.mxu0 %v10008_v47  ;;  %v10075_v46 = vld [vmem:[%s10705_s21 + $0x38] sm:$0xff]   ;;  %v10076_v47 = vld [vmem:[%s10705_s21 + $0x40] sm:$0xff]  }
 0x19f   : > { %8721 = vmatmul.mubr.bf16.gmra.mrb[28].mxu1 %v10009_v48  ;;  %v10077_v48 = vld [vmem:[%s10705_s21 + $0x40] sm:$0xff]  }
 0x1a0   : > { %9105 = vmatmul.mubr.bf16.gmra.mrb[28].mxu0 %v10011_v49  ;;  %8740 = vmatprep.mubr.bf16.mxu1 %v10013_v50  ;;  %v10078_v49 = vld [vmem:[%s10705_s21 + $0x48] sm:$0xff]  }
 0x1a1   : > { %9124 = vmatprep.mubr.bf16.mxu0 %v10014_v51  ;;  %v10079_v50 = vld [vmem:[%s10705_s21 + $0x48] sm:$0xff]   ;;  %v10080_v51 = vld [vmem:[%s10705_s21 + $0x50] sm:$0xff]  }
 0x1a7   : > { %8741 = vmatmul.mubr.bf16.vlgmr.msra.gmra.mrb[0].mxu1 %v10015_v52  ;;  %v10081_v52 = vld [vmem:[%s10705_s21 + $0x50] sm:$0xff]  }
 0x1a8   : > { %9125 = vmatmul.mubr.bf16.vlgmr.msra.gmra.mrb[0].mxu0 %v10017_v53  ;;  %8773 = vmatpush3.bf16.msra.mxu1 %v10016_v34  ;;  %v10063_v34 = vld [vmem:[%s10705_s21 + $0x8] sm:$0xff]   ;;  %v10082_v53 = vld [vmem:[%s10705_s21 + $0x58] sm:$0xff]  }
 0x1a9   : > { %9157 = vmatpush3.bf16.msra.mxu0 %v10018_v36  ;;  %8744 = vmatprep.mubr.bf16.mxu1 %v10019_v54  ;;  %v10065_v36 = vld [vmem:[%s10705_s21 + $0x10] sm:$0xff]   ;;  %v10083_v54 = vld [vmem:[%s10705_s21 + $0x58] sm:$0xff]  }
 0x1aa   : > { %9128 = vmatprep.mubr.bf16.mxu0 %v10020_v55  ;;  %8774 = vmatprep.subr.bf16.mxu1 %v10022_v56  ;;  %v10084_v55 = vld [vmem:[%s10705_s21 + $0x60] sm:$0xff]  }
 0x1ab   : > { %9158 = vmatprep.subr.bf16.mxu0 %v10024_v57 }
 0x1ac   : > { %8775 = vmatpush3.bf16.msra.mxu1 %v10022_v56  ;;  %v10085_v56 = vld [vmem:[%s10705_s21 + $0x60] sm:$0xff]  }
 0x1ad   : > { %9159 = vmatpush3.bf16.msra.mxu0 %v10024_v57  ;;  %8776 = vmatprep.subr.bf16.mxu1 %v10028_v58  ;;  %v10086_v57 = vld [vmem:[%s10705_s21 + $0x68] sm:$0xff]  }
 0x1ae   : > { %9160 = vmatprep.subr.bf16.mxu0 %v10030_v59 }
 0x1af   : > { %8745 = vmatmul.mubr.bf16.gmra.mrb[4].mxu1 %v10021_v60  ;;  %v10089_v60 = vld [vmem:[%s10705_s21 + $0x70] sm:$0xff]  }
 0x1b0   : > { %9129 = vmatmul.mubr.bf16.gmra.mrb[4].mxu0 %v10023_v61  ;;  %8748 = vmatprep.mubr.bf16.mxu1 %v10025_v62  ;;  %v10090_v61 = vld [vmem:[%s10705_s21 + $0x78] sm:$0xff]  }
 0x1b1   : > { %9132 = vmatprep.mubr.bf16.mxu0 %v10026_v63  ;;  %8777 = vmatpush3.bf16.msra.mxu1 %v10028_v58  ;;  %v10087_v58 = vld [vmem:[%s10705_s21 + $0x68] sm:$0xff]   ;;  %v10091_v62 = vld [vmem:[%s10705_s21 + $0x78] sm:$0xff]   ;;  %v10092_v63 = vld [vmem:[%s10705_s21 + $0x80] sm:$0xff]  }
 0x1b2   : > { %9161 = vmatpush3.bf16.msra.mxu0 %v10030_v59  ;;  %8778 = vmatprep.subr.bf16.mxu1 %v10034_v0  ;;  %v10088_v59 = vld [vmem:[%s10705_s21 + $0x70] sm:$0xff]  }
 0x1b3   : > { %9162 = vmatprep.subr.bf16.mxu0 %v10036_v1 }
 0x1b5   : > { %8779 = vmatpush3.bf16.msra.mxu1 %v10034_v0 }
 0x1b6   : > { %9163 = vmatpush3.bf16.msra.mxu0 %v10036_v1  ;;  %8780 = vmatprep.subr.bf16.mxu1 %v10040_v2 }
 0x1b7   : > { %8749 = vmatmul.mubr.bf16.gmra.mrb[8].mxu1 %v10027_v3  ;;  %9164 = vmatprep.subr.bf16.mxu0 %v10042_v4 }
 0x1b8   : > { %9133 = vmatmul.mubr.bf16.gmra.mrb[8].mxu0 %v10029_v5  ;;  %8752 = vmatprep.mubr.bf16.mxu1 %v10031_v6 }
 0x1b9   : > { %9136 = vmatprep.mubr.bf16.mxu0 %v10032_v7  ;;  %8781 = vmatpush3.bf16.msra.mxu1 %v10040_v2 }
 0x1ba   : > { %9165 = vmatpush3.bf16.msra.mxu0 %v10042_v4  ;;  %8782 = vmatprep.subr.bf16.mxu1 %v10046_v8  ;;  %v10891_v4 = vld [vmem:[%s10969_s9] ss:$0 sm:$0xff] }
 0x1bb   : > { %9166 = vmatprep.subr.bf16.mxu0 %v10048_v9 }
 0x1bd   : > { %8783 = vmatpush3.bf16.msra.mxu1 %v10046_v8 }
 0x1be   : > { %9167 = vmatpush3.bf16.msra.mxu0 %v10048_v9  ;;  %8784 = vmatprep.subr.bf16.mxu1 %v10052_v10 }
 0x1bf   : > { %8753 = vmatmul.mubr.bf16.gmra.mrb[12].mxu1 %v10033_v11  ;;  %9168 = vmatprep.subr.bf16.mxu0 %v10054_v12 }
 0x1c0   : > { %9137 = vmatmul.mubr.bf16.gmra.mrb[12].mxu0 %v10035_v13  ;;  %8756 = vmatprep.mubr.bf16.mxu1 %v10037_v14 }
 0x1c1   : > { %9140 = vmatprep.mubr.bf16.mxu0 %v10038_v15  ;;  %8785 = vmatpush3.bf16.msra.mxu1 %v10052_v10 }
 0x1c2   : > { %9169 = vmatpush3.bf16.msra.mxu0 %v10054_v12  ;;  %8786 = vmatprep.subr.bf16.mxu1 %v10058_v16 }
 0x1c3   : > { %9170 = vmatprep.subr.bf16.mxu0 %v10060_v17 }
 0x1c5   : > { %8787 = vmatpush3.bf16.msra.mxu1 %v10058_v16 }
 0x1c6   : > { %9171 = vmatpush3.bf16.msra.mxu0 %v10060_v17 }
 0x1c7   : > { %8757 = vmatmul.mubr.bf16.gmra.mrb[16].mxu1 %v10039_v18 }
 0x1c8   : > { %9141 = vmatmul.mubr.bf16.gmra.mrb[16].mxu0 %v10041_v19  ;;  %8760 = vmatprep.mubr.bf16.mxu1 %v10043_v20 }
 0x1c9   : > { %9144 = vmatprep.mubr.bf16.mxu0 %v10044_v21 }
 0x1cf   : > { %8761 = vmatmul.mubr.bf16.gmra.mrb[20].mxu1 %v10045_v22 }
 0x1d0   : > { %9145 = vmatmul.mubr.bf16.gmra.mrb[20].mxu0 %v10047_v23  ;;  %8764 = vmatprep.mubr.bf16.mxu1 %v10049_v24 }
 0x1d1   : > { %9148 = vmatprep.mubr.bf16.mxu0 %v10050_v25 }
 0x1d7   : > { %8765 = vmatmul.mubr.bf16.gmra.mrb[24].mxu1 %v10051_v26 }
 0x1d8   : > { %9149 = vmatmul.mubr.bf16.gmra.mrb[24].mxu0 %v10053_v27  ;;  %8768 = vmatprep.mubr.bf16.mxu1 %v10055_v28 }
 0x1d9   : > { %9152 = vmatprep.mubr.bf16.mxu0 %v10056_v29 }
 0x1df   : > { %8769 = vmatmul.mubr.bf16.gmra.mrb[28].mxu1 %v10057_v30 }
 0x1e0   : > { %9153 = vmatmul.mubr.bf16.gmra.mrb[28].mxu0 %v10059_v31  ;;  %8788 = vmatprep.mubr.bf16.mxu1 %v10061_v32 }
 0x1e1   : > { %9172 = vmatprep.mubr.bf16.mxu0 %v10062_v33 }
 0x1e7   : > { %8789 = vmatmul.mubr.bf16.vlgmr.msra.gmra.mrb[0].mxu1 %v10063_v34 }
 0x1e8   : > { %9173 = vmatmul.mubr.bf16.vlgmr.msra.gmra.mrb[0].mxu0 %v10064_v35  ;;  %8792 = vmatprep.mubr.bf16.mxu1 %v10065_v36 }
 0x1e9   : > { %9176 = vmatprep.mubr.bf16.mxu0 %v10066_v37 }
 0x1ef   : > { %8793 = vmatmul.mubr.bf16.gmra.mrb[4].mxu1 %v10067_v38 }
 0x1f0   : > { %9177 = vmatmul.mubr.bf16.gmra.mrb[4].mxu0 %v10068_v39  ;;  %8796 = vmatprep.mubr.bf16.mxu1 %v10069_v40 }
 0x1f1   : > { %9180 = vmatprep.mubr.bf16.mxu0 %v10070_v41 }
 0x1f7   : > { %8797 = vmatmul.mubr.bf16.gmra.mrb[8].mxu1 %v10071_v42 }
 0x1f8   : > { %9181 = vmatmul.mubr.bf16.gmra.mrb[8].mxu0 %v10072_v43  ;;  %8800 = vmatprep.mubr.bf16.mxu1 %v10073_v44 }
 0x1f9   : > { %9184 = vmatprep.mubr.bf16.mxu0 %v10074_v45 }
 0x1ff   : > { %8801 = vmatmul.mubr.bf16.gmra.mrb[12].mxu1 %v10075_v46 }
 0x200   : > { %9185 = vmatmul.mubr.bf16.gmra.mrb[12].mxu0 %v10076_v47  ;;  %8804 = vmatprep.mubr.bf16.mxu1 %v10077_v48 }
 0x201   : > { %9188 = vmatprep.mubr.bf16.mxu0 %v10078_v49 }
 0x207   : > { %8805 = vmatmul.mubr.bf16.gmra.mrb[16].mxu1 %v10079_v50 }
 0x208   : > { %9189 = vmatmul.mubr.bf16.gmra.mrb[16].mxu0 %v10080_v51  ;;  %8808 = vmatprep.mubr.bf16.mxu1 %v10081_v52 }
 0x209   : > { %9192 = vmatprep.mubr.bf16.mxu0 %v10082_v53 }
 0x20f   : > { %8809 = vmatmul.mubr.bf16.gmra.mrb[20].mxu1 %v10083_v54 }
 0x210   : > { %9193 = vmatmul.mubr.bf16.gmra.mrb[20].mxu0 %v10084_v55  ;;  %8812 = vmatprep.mubr.bf16.mxu1 %v10085_v56 }
 0x211   : > { %9196 = vmatprep.mubr.bf16.mxu0 %v10086_v57 }
 0x217   : > { %8813 = vmatmul.mubr.bf16.gmra.mrb[24].mxu1 %v10087_v58 }
 0x218   : > { %9197 = vmatmul.mubr.bf16.gmra.mrb[24].mxu0 %v10088_v59  ;;  %8816 = vmatprep.mubr.bf16.mxu1 %v10089_v60 }
 0x219   : > { %9200 = vmatprep.mubr.bf16.mxu0 %v10090_v61 }
 0x21f   : > { %8817 = vmatmul.mubr.bf16.gmra.mrb[28].mxu1 %v10091_v62 }
 0x220   : > { %9201 = vmatmul.mubr.bf16.gmra.mrb[28].mxu0 %v10092_v63 }
 0x2ba   : > { %v8790_v0 = vpop.f32.mrb[0].mxu1 }
 0x2bb   : > { %v9174_v1 = vpop.f32.mrb[0].mxu0  ;;  %v3462_v2 = vpop.f32.mrb[1].mxu1 }
 0x2bc   : > { %v9204_v3 = vadd.f32 %v9174_v1, %v8790_v0  ;;  %v6550_v5 = vpop.f32.mrb[1].mxu0  ;;  %v8791_v6 = vpop.f32.mrb[2].mxu1 }
 0x2bd   : > { %v9205_v7 = vadd.f32 %v6550_v5, %v3462_v2  ;;  %v9175_v8 = vpop.f32.mrb[2].mxu0  ;;  %v3465_v9 = vpop.f32.mrb[3].mxu1 }
 0x2be   : > { %v9206_v10 = vadd.f32 %v9175_v8, %v8791_v6  ;;  %v6553_v11 = vpop.f32.mrb[3].mxu0  ;;  %v6718_v14 = vadd.f32 %v9204_v3, %v10891_v4 }
 0x2bf   : > { %v6716_v12 = vadd.f32 %v9205_v7, %v10891_v4  ;;  %v9207_v13 = vadd.f32 %v6553_v11, %v3465_v9 }
 0x2c0   : > { %v6719_v15 = vadd.f32 %v9206_v10, %v10891_v4  ;;  %v6947_v28 = vmul.f32 %v6718_v14, %v6718_v14 }
 0x2c1   : > { %v6717_v16 = vadd.f32 %v9207_v13, %v10891_v4  ;;  %v6945_v19 = vmul.f32 %v6716_v12, %v6716_v12 }
 0x2c2   : > { %v7965_v17 = vpack.c.bf16 %v6719_v15, %v6718_v14  ;;  %v8794_v18 = vpop.f32.mrb[4].mxu1  ;;  %v6948_v34 = vmul.f32 %v6719_v15, %v6719_v15 }
 0x2c3   : > { %v7960_v20 = vpack.c.bf16 %v6717_v16, %v6716_v12  ;;  %v6908_v21 = vadd.f32 %v6717_v16, %v6716_v12  ;;  %v6946_v22 = vmul.f32 %v6717_v16, %v6717_v16  ;;  %v9178_v23 = vpop.f32.mrb[4].mxu0  ;;  %v3478_v24 = vpop.f32.mrb[5].mxu1 }
 0x2c4   : > { %8037 = vst [vmem:[%s10900_s16 + $0x8] sm:$0xff] %v7965_v17   ;;  %v9208_v25 = vadd.f32 %v9178_v23, %v8794_v18  ;;  %v6566_v26 = vpop.f32.mrb[5].mxu0  ;;  %v8795_v27 = vpop.f32.mrb[6].mxu1 }
 0x2c5   : > { %7961 = vst [vmem:[%s10900_s16] sm:$0xff] %v7960_v20   ;;  %v6909_v29 = vadd.f32 %v6908_v21, %v6718_v14  ;;  %v6977_v30 = vadd.f32 %v6946_v22, %v6945_v19  ;;  %v9209_v31 = vadd.f32 %v6566_v26, %v3478_v24  ;;  %v9179_v32 = vpop.f32.mrb[6].mxu0  ;;  %v3481_v33 = vpop.f32.mrb[7].mxu1 }
 0x2c6   : > { %v9210_v35 = vadd.f32 %v9179_v32, %v8795_v27  ;;  %v6569_v36 = vpop.f32.mrb[7].mxu0  ;;  %v6722_v41 = vadd.f32 %v9208_v25, %v10891_v4 }
 0x2c7   : > { %v6978_v37 = vadd.f32 %v6977_v30, %v6947_v28  ;;  %v6720_v38 = vadd.f32 %v9209_v31, %v10891_v4  ;;  %v6910_v39 = vadd.f32 %v6909_v29, %v6719_v15  ;;  %v9211_v40 = vadd.f32 %v6569_v36, %v3481_v33 }
 0x2c8   : > { %v6723_v42 = vadd.f32 %v9210_v35, %v10891_v4  ;;  %v6951_v58 = vmul.f32 %v6722_v41, %v6722_v41 }
 0x2c9   : > { %v6911_v43 = vadd.f32 %v6910_v39, %v6720_v38  ;;  %v6949_v44 = vmul.f32 %v6720_v38, %v6720_v38  ;;  %v6979_v45 = vadd.f32 %v6978_v37, %v6948_v34  ;;  %v6721_v46 = vadd.f32 %v9211_v40, %v10891_v4 }
 0x2ca   : > { %v7975_v47 = vpack.c.bf16 %v6723_v42, %v6722_v41  ;;  %v8798_v48 = vpop.f32.mrb[8].mxu1  ;;  %v6952_v0 = vmul.f32 %v6723_v42, %v6723_v42 }
 0x2cb   : > { %v6980_v49 = vadd.f32 %v6979_v45, %v6949_v44  ;;  %v7970_v50 = vpack.c.bf16 %v6721_v46, %v6720_v38  ;;  %v6912_v51 = vadd.f32 %v6911_v43, %v6721_v46  ;;  %v6950_v52 = vmul.f32 %v6721_v46, %v6721_v46  ;;  %v9182_v53 = vpop.f32.mrb[8].mxu0  ;;  %v3494_v54 = vpop.f32.mrb[9].mxu1 }
 0x2cc   : > { %8039 = vst [vmem:[%s10900_s16 + $0x18] sm:$0xff] %v7975_v47   ;;  %v9212_v55 = vadd.f32 %v9182_v53, %v8798_v48  ;;  %v6582_v56 = vpop.f32.mrb[9].mxu0  ;;  %v8799_v57 = vpop.f32.mrb[10].mxu1 }
 0x2cd   : > { %8038 = vst [vmem:[%s10900_s16 + $0x10] sm:$0xff] %v7970_v50   ;;  %v6913_v59 = vadd.f32 %v6912_v51, %v6722_v41  ;;  %v6981_v60 = vadd.f32 %v6980_v49, %v6950_v52  ;;  %v9213_v61 = vadd.f32 %v6582_v56, %v3494_v54  ;;  %v9183_v62 = vpop.f32.mrb[10].mxu0  ;;  %v3497_v63 = vpop.f32.mrb[11].mxu1 }
 0x2ce   : > { %v9214_v1 = vadd.f32 %v9183_v62, %v8799_v57  ;;  %v6585_v2 = vpop.f32.mrb[11].mxu0  ;;  %v6726_v8 = vadd.f32 %v9212_v55, %v10891_v4 }
 0x2cf   : > { %v6982_v3 = vadd.f32 %v6981_v60, %v6951_v58  ;;  %v6724_v5 = vadd.f32 %v9213_v61, %v10891_v4  ;;  %v6914_v6 = vadd.f32 %v6913_v59, %v6723_v42  ;;  %v9215_v7 = vadd.f32 %v6585_v2, %v3497_v63 }
 0x2d0   : > { %v6727_v9 = vadd.f32 %v9214_v1, %v10891_v4  ;;  %v6955_v25 = vmul.f32 %v6726_v8, %v6726_v8 }
 0x2d1   : > { %v6915_v10 = vadd.f32 %v6914_v6, %v6724_v5  ;;  %v6953_v11 = vmul.f32 %v6724_v5, %v6724_v5  ;;  %v6983_v12 = vadd.f32 %v6982_v3, %v6952_v0  ;;  %v6725_v13 = vadd.f32 %v9215_v7, %v10891_v4 }
 0x2d2   : > { %v7985_v14 = vpack.c.bf16 %v6727_v9, %v6726_v8  ;;  %v8802_v15 = vpop.f32.mrb[12].mxu1  ;;  %v6956_v31 = vmul.f32 %v6727_v9, %v6727_v9 }
 0x2d3   : > { %v6984_v16 = vadd.f32 %v6983_v12, %v6953_v11  ;;  %v7980_v17 = vpack.c.bf16 %v6725_v13, %v6724_v5  ;;  %v6916_v18 = vadd.f32 %v6915_v10, %v6725_v13  ;;  %v6954_v19 = vmul.f32 %v6725_v13, %v6725_v13  ;;  %v9186_v20 = vpop.f32.mrb[12].mxu0  ;;  %v3510_v21 = vpop.f32.mrb[13].mxu1 }
 0x2d4   : > { %8041 = vst [vmem:[%s10900_s16 + $0x28] sm:$0xff] %v7985_v14   ;;  %v9216_v22 = vadd.f32 %v9186_v20, %v8802_v15  ;;  %v6598_v23 = vpop.f32.mrb[13].mxu0  ;;  %v8803_v24 = vpop.f32.mrb[14].mxu1 }
 0x2d5   : > { %8040 = vst [vmem:[%s10900_s16 + $0x20] sm:$0xff] %v7980_v17   ;;  %v6917_v26 = vadd.f32 %v6916_v18, %v6726_v8  ;;  %v6985_v27 = vadd.f32 %v6984_v16, %v6954_v19  ;;  %v9217_v28 = vadd.f32 %v6598_v23, %v3510_v21  ;;  %v9187_v29 = vpop.f32.mrb[14].mxu0  ;;  %v3513_v30 = vpop.f32.mrb[15].mxu1 }
 0x2d6   : > { %v9218_v32 = vadd.f32 %v9187_v29, %v8803_v24  ;;  %v6601_v33 = vpop.f32.mrb[15].mxu0  ;;  %v6730_v38 = vadd.f32 %v9216_v22, %v10891_v4 }
 0x2d7   : > { %v6986_v34 = vadd.f32 %v6985_v27, %v6955_v25  ;;  %v6728_v35 = vadd.f32 %v9217_v28, %v10891_v4  ;;  %v6918_v36 = vadd.f32 %v6917_v26, %v6727_v9  ;;  %v9219_v37 = vadd.f32 %v6601_v33, %v3513_v30 }
 0x2d8   : > { %v6731_v39 = vadd.f32 %v9218_v32, %v10891_v4  ;;  %v6959_v55 = vmul.f32 %v6730_v38, %v6730_v38 }
 0x2d9   : > { %v6919_v40 = vadd.f32 %v6918_v36, %v6728_v35  ;;  %v6957_v41 = vmul.f32 %v6728_v35, %v6728_v35  ;;  %v6987_v42 = vadd.f32 %v6986_v34, %v6956_v31  ;;  %v6729_v43 = vadd.f32 %v9219_v37, %v10891_v4 }
 0x2da   : > { %v7995_v44 = vpack.c.bf16 %v6731_v39, %v6730_v38  ;;  %v8806_v45 = vpop.f32.mrb[16].mxu1  ;;  %v6960_v61 = vmul.f32 %v6731_v39, %v6731_v39 }
 0x2db   : > { %v6988_v46 = vadd.f32 %v6987_v42, %v6957_v41  ;;  %v7990_v47 = vpack.c.bf16 %v6729_v43, %v6728_v35  ;;  %v6920_v48 = vadd.f32 %v6919_v40, %v6729_v43  ;;  %v6958_v49 = vmul.f32 %v6729_v43, %v6729_v43  ;;  %v9190_v50 = vpop.f32.mrb[16].mxu0  ;;  %v3526_v51 = vpop.f32.mrb[17].mxu1 }
 0x2dc   : > { %8043 = vst [vmem:[%s10900_s16 + $0x38] sm:$0xff] %v7995_v44   ;;  %v9220_v52 = vadd.f32 %v9190_v50, %v8806_v45  ;;  %v6614_v53 = vpop.f32.mrb[17].mxu0  ;;  %v8807_v54 = vpop.f32.mrb[18].mxu1 }
 0x2dd   : > { %8042 = vst [vmem:[%s10900_s16 + $0x30] sm:$0xff] %v7990_v47   ;;  %v6921_v56 = vadd.f32 %v6920_v48, %v6730_v38  ;;  %v6989_v57 = vadd.f32 %v6988_v46, %v6958_v49  ;;  %v9221_v58 = vadd.f32 %v6614_v53, %v3526_v51  ;;  %v9191_v59 = vpop.f32.mrb[18].mxu0  ;;  %v3529_v60 = vpop.f32.mrb[19].mxu1 }
 0x2de   : > { %v9222_v62 = vadd.f32 %v9191_v59, %v8807_v54  ;;  %v6617_v63 = vpop.f32.mrb[19].mxu0  ;;  %v6734_v5 = vadd.f32 %v9220_v52, %v10891_v4 }
 0x2df   : > { %v6990_v0 = vadd.f32 %v6989_v57, %v6959_v55  ;;  %v6732_v1 = vadd.f32 %v9221_v58, %v10891_v4  ;;  %v6922_v2 = vadd.f32 %v6921_v56, %v6731_v39  ;;  %v9223_v3 = vadd.f32 %v6617_v63, %v3529_v60 }
 0x2e0   : > { %v6735_v6 = vadd.f32 %v9222_v62, %v10891_v4  ;;  %v6963_v22 = vmul.f32 %v6734_v5, %v6734_v5 }
 0x2e1   : > { %v6923_v7 = vadd.f32 %v6922_v2, %v6732_v1  ;;  %v6961_v8 = vmul.f32 %v6732_v1, %v6732_v1  ;;  %v6991_v9 = vadd.f32 %v6990_v0, %v6960_v61  ;;  %v6733_v10 = vadd.f32 %v9223_v3, %v10891_v4 }
 0x2e2   : > { %v8005_v11 = vpack.c.bf16 %v6735_v6, %v6734_v5  ;;  %v8810_v12 = vpop.f32.mrb[20].mxu1  ;;  %v6964_v28 = vmul.f32 %v6735_v6, %v6735_v6 }
 0x2e3   : > { %v6992_v13 = vadd.f32 %v6991_v9, %v6961_v8  ;;  %v8000_v14 = vpack.c.bf16 %v6733_v10, %v6732_v1  ;;  %v6924_v15 = vadd.f32 %v6923_v7, %v6733_v10  ;;  %v6962_v16 = vmul.f32 %v6733_v10, %v6733_v10  ;;  %v9194_v17 = vpop.f32.mrb[20].mxu0  ;;  %v3542_v18 = vpop.f32.mrb[21].mxu1 }
 0x2e4   : > { %8045 = vst [vmem:[%s10900_s16 + $0x48] sm:$0xff] %v8005_v11   ;;  %v9224_v19 = vadd.f32 %v9194_v17, %v8810_v12  ;;  %v6630_v20 = vpop.f32.mrb[21].mxu0  ;;  %v8811_v21 = vpop.f32.mrb[22].mxu1 }
 0x2e5   : > { %8044 = vst [vmem:[%s10900_s16 + $0x40] sm:$0xff] %v8000_v14   ;;  %v6925_v23 = vadd.f32 %v6924_v15, %v6734_v5  ;;  %v6993_v24 = vadd.f32 %v6992_v13, %v6962_v16  ;;  %v9225_v25 = vadd.f32 %v6630_v20, %v3542_v18  ;;  %v9195_v26 = vpop.f32.mrb[22].mxu0  ;;  %v3545_v27 = vpop.f32.mrb[23].mxu1 }
 0x2e6   : > { %v9226_v29 = vadd.f32 %v9195_v26, %v8811_v21  ;;  %v6633_v30 = vpop.f32.mrb[23].mxu0  ;;  %v6738_v35 = vadd.f32 %v9224_v19, %v10891_v4 }
 0x2e7   : > { %v6994_v31 = vadd.f32 %v6993_v24, %v6963_v22  ;;  %v6736_v32 = vadd.f32 %v9225_v25, %v10891_v4  ;;  %v6926_v33 = vadd.f32 %v6925_v23, %v6735_v6  ;;  %v9227_v34 = vadd.f32 %v6633_v30, %v3545_v27 }
 0x2e8   : > { %v6739_v36 = vadd.f32 %v9226_v29, %v10891_v4  ;;  %v6967_v52 = vmul.f32 %v6738_v35, %v6738_v35 }
 0x2e9   : > { %v6927_v37 = vadd.f32 %v6926_v33, %v6736_v32  ;;  %v6965_v38 = vmul.f32 %v6736_v32, %v6736_v32  ;;  %v6995_v39 = vadd.f32 %v6994_v31, %v6964_v28  ;;  %v6737_v40 = vadd.f32 %v9227_v34, %v10891_v4 }
 0x2ea   : > { %v8015_v41 = vpack.c.bf16 %v6739_v36, %v6738_v35  ;;  %v8814_v42 = vpop.f32.mrb[24].mxu1  ;;  %v6968_v58 = vmul.f32 %v6739_v36, %v6739_v36 }
 0x2eb   : > { %v6996_v43 = vadd.f32 %v6995_v39, %v6965_v38  ;;  %v8010_v44 = vpack.c.bf16 %v6737_v40, %v6736_v32  ;;  %v6928_v45 = vadd.f32 %v6927_v37, %v6737_v40  ;;  %v6966_v46 = vmul.f32 %v6737_v40, %v6737_v40  ;;  %v9198_v47 = vpop.f32.mrb[24].mxu0  ;;  %v3558_v48 = vpop.f32.mrb[25].mxu1 }
 0x2ec   : > { %8047 = vst [vmem:[%s10900_s16 + $0x58] sm:$0xff] %v8015_v41   ;;  %v9228_v49 = vadd.f32 %v9198_v47, %v8814_v42  ;;  %v6646_v50 = vpop.f32.mrb[25].mxu0  ;;  %v8815_v51 = vpop.f32.mrb[26].mxu1 }
 0x2ed   : > { %8046 = vst [vmem:[%s10900_s16 + $0x50] sm:$0xff] %v8010_v44   ;;  %v6929_v53 = vadd.f32 %v6928_v45, %v6738_v35  ;;  %v6997_v54 = vadd.f32 %v6996_v43, %v6966_v46  ;;  %v9229_v55 = vadd.f32 %v6646_v50, %v3558_v48  ;;  %v9199_v56 = vpop.f32.mrb[26].mxu0  ;;  %v3561_v57 = vpop.f32.mrb[27].mxu1 }
 0x2ee   : > { %v9230_v59 = vadd.f32 %v9199_v56, %v8815_v51  ;;  %v6649_v60 = vpop.f32.mrb[27].mxu0  ;;  %v6742_v1 = vadd.f32 %v9228_v49, %v10891_v4 }
 0x2ef   : > { %v6998_v61 = vadd.f32 %v6997_v54, %v6967_v52  ;;  %v6740_v62 = vadd.f32 %v9229_v55, %v10891_v4  ;;  %v6930_v63 = vadd.f32 %v6929_v53, %v6739_v36  ;;  %v9231_v0 = vadd.f32 %v6649_v60, %v3561_v57 }
 0x2f0   : > { %v6743_v2 = vadd.f32 %v9230_v59, %v10891_v4  ;;  %v6971_v19 = vmul.f32 %v6742_v1, %v6742_v1 }
 0x2f1   : > { %v6931_v3 = vadd.f32 %v6930_v63, %v6740_v62  ;;  %v6969_v5 = vmul.f32 %v6740_v62, %v6740_v62  ;;  %v6999_v6 = vadd.f32 %v6998_v61, %v6968_v58  ;;  %v6741_v7 = vadd.f32 %v9231_v0, %v10891_v4 }
 0x2f2   : > { %v8025_v8 = vpack.c.bf16 %v6743_v2, %v6742_v1  ;;  %v8818_v9 = vpop.f32.mrb[28].mxu1  ;;  %v6972_v25 = vmul.f32 %v6743_v2, %v6743_v2 }
 0x2f3   : > { %v7000_v10 = vadd.f32 %v6999_v6, %v6969_v5  ;;  %v8020_v11 = vpack.c.bf16 %v6741_v7, %v6740_v62  ;;  %v6932_v12 = vadd.f32 %v6931_v3, %v6741_v7  ;;  %v6970_v13 = vmul.f32 %v6741_v7, %v6741_v7  ;;  %v9202_v14 = vpop.f32.mrb[28].mxu0  ;;  %v3574_v15 = vpop.f32.mrb[29].mxu1 }
 0x2f4   : > { %8049 = vst [vmem:[%s10900_s16 + $0x68] sm:$0xff] %v8025_v8   ;;  %v9232_v16 = vadd.f32 %v9202_v14, %v8818_v9  ;;  %v6662_v17 = vpop.f32.mrb[29].mxu0  ;;  %v8819_v18 = vpop.f32.mrb[30].mxu1 }
 0x2f5   : > { %8048 = vst [vmem:[%s10900_s16 + $0x60] sm:$0xff] %v8020_v11   ;;  %v6933_v20 = vadd.f32 %v6932_v12, %v6742_v1  ;;  %v7001_v21 = vadd.f32 %v7000_v10, %v6970_v13  ;;  %v9233_v22 = vadd.f32 %v6662_v17, %v3574_v15  ;;  %v9203_v23 = vpop.f32.mrb[30].mxu0  ;;  %v3577_v24 = vpop.f32.mrb[31].mxu1 }
 0x2f6   : > { %v9234_v26 = vadd.f32 %v9203_v23, %v8819_v18  ;;  %v6665_v27 = vpop.f32.mrb[31].mxu0  ;;  %v6746_v32 = vadd.f32 %v9232_v16, %v10891_v4 }
 0x2f7   : > { %v7002_v28 = vadd.f32 %v7001_v21, %v6971_v19  ;;  %v6744_v29 = vadd.f32 %v9233_v22, %v10891_v4  ;;  %v6934_v30 = vadd.f32 %v6933_v20, %v6743_v2  ;;  %v9235_v31 = vadd.f32 %v6665_v27, %v3577_v24 }
 0x2f8   : > { %v6747_v33 = vadd.f32 %v9234_v26, %v10891_v4  ;;  %v6975_v43 = vmul.f32 %v6746_v32, %v6746_v32 }
 0x2f9   : > { %v6935_v34 = vadd.f32 %v6934_v30, %v6744_v29  ;;  %v6973_v35 = vmul.f32 %v6744_v29, %v6744_v29  ;;  %v7003_v36 = vadd.f32 %v7002_v28, %v6972_v25  ;;  %v6745_v37 = vadd.f32 %v9235_v31, %v10891_v4 }
 0x2fa   : > { %v8035_v38 = vpack.c.bf16 %v6747_v33, %v6746_v32  ;;  %v6976_v46 = vmul.f32 %v6747_v33, %v6747_v33 }
 0x2fb   : > { %v7004_v39 = vadd.f32 %v7003_v36, %v6973_v35  ;;  %v8030_v40 = vpack.c.bf16 %v6745_v37, %v6744_v29  ;;  %v6936_v41 = vadd.f32 %v6935_v34, %v6745_v37  ;;  %v6974_v42 = vmul.f32 %v6745_v37, %v6745_v37 }
 0x2fc   : > { %8051 = vst [vmem:[%s10900_s16 + $0x78] sm:$0xff] %v8035_v38  }
 0x2fd   : > { %8050 = vst [vmem:[%s10900_s16 + $0x70] sm:$0xff] %v8030_v40   ;;  %v6937_v44 = vadd.f32 %v6936_v41, %v6746_v32  ;;  %v7005_v45 = vadd.f32 %v7004_v39, %v6974_v42 }
 0x2ff   : > { %v6938_v47 = vadd.f32 %v6937_v44, %v6747_v33  ;;  %v7006_v48 = vadd.f32 %v7005_v45, %v6975_v43 }
 0x301   : > { %v6939_v49 = vrot.slane %v6938_v47, 4  ;;  %v7007_v50 = vadd.f32 %v7006_v48, %v6976_v46 }
 0x303   : > { %v6940_v51 = vadd.f32 %v6939_v49, %v6938_v47  ;;  %v7008_v52 = vrot.slane %v7007_v50, 4 }
 0x305   : > { %v6941_v53 = vrot.slane %v6940_v51, 2  ;;  %v7009_v4 = vadd.f32 %v7008_v52, %v7007_v50 }
 0x307   : > { %v6942_v54 = vadd.f32 %v6941_v53, %v6940_v51  ;;  %v7010_v55 = vrot.slane %v7009_v4, 2 }
 0x309   : > { %v6943_v56 = vrot.slane %v6942_v54, 1  ;;  %v7011_v57 = vadd.f32 %v7010_v55, %v7009_v4 }
 0x30b   : > { %v7012_v58 = vrot.slane %v7011_v57, 1  ;;  %v6944_v59 = vadd.f32 %v6943_v56, %v6942_v54 }
 0x30d   : > { %v7013_v60 = vadd.f32 %v7012_v58, %v7011_v57 }
 0x30f   : > { %v7015_v61 = vsel %vm7014_vm0, %v6944_v59, %v7013_v60 }
 0x310   : > { %7016 = vst [vmem:[%s596_s23] sm:$0x3] %v7015_v61 }
 0x311 PF: > { %s22_s19 = sadd.s32 1, %s10115_s19   ;;  %s10972_s17 = smov %s10111_s18 }
 0x312   : > { %p19_p5 = scmp.ge.s32.totalorder %s22_s19, 4   ;;  %s10973_s18 = smov %s10975_s20 }
 0x314   :  { %21 = sbr.rel (!%p19_p5) target bundleno = 2 (0x2), region = 144 }

// kernel: _forward.6
= control target key start
LH: loop header
LB: loop body
LE: loop exit
PB: predicated region body
PF: predicated region fallthrough
CT: control target
= control target key end

     0   :  { %vm2730_vm0 = vcmask 1040384   ;;  %s4702_s1 = inlined_call_operand.vmem [shape: bf16[2048,128], index: 1, kind: input, shape index: {}]   ;;  %s4703_s0 = inlined_call_operand.vmem [shape: bf16[128,2048], index: 0, kind: input, shape index: {}]   ;;  %s4704_s2 = inlined_call_operand.vmem [shape: f32[1,128], index: 2, kind: input, shape index: {}]   ;;  %s4705_s3 = inlined_call_operand.vmem [shape: bf16[128,128], index: 3, kind: output, shape index: {0}]   ;;  %s4706_s4 = inlined_call_operand.vmem [shape: f32[1,2,128], index: 4, kind: output, shape index: {1}]  }
   0x1   :  { %v3589_v0 = vld [vmem:[%s4702_s1 + $0x40] sm:$0xff]   ;;  %v3593_v4 = vld [vmem:[%s4702_s1 + $0x48] sm:$0xff]   ;;  %v3597_v8 = vld [vmem:[%s4702_s1 + $0x50] sm:$0xff]  }
   0x2   :  { %v3590_v1 = vld [vmem:[%s4702_s1 + $0xc0] sm:$0xff]   ;;  %3077 = vmatprep.subr.bf16.mxu0 %v3589_v0  ;;  %v3594_v5 = vld [vmem:[%s4702_s1 + $0xc8] sm:$0xff]   ;;  %v3598_v9 = vld [vmem:[%s4702_s1 + $0xd0] sm:$0xff]  }
   0x3   :  { %v3591_v2 = vld [vmem:[%s4702_s1] sm:$0xff]   ;;  %3141 = vmatprep.subr.bf16.mxu1 %v3590_v1  ;;  %v3595_v6 = vld [vmem:[%s4702_s1 + $0x8] sm:$0xff]   ;;  %v3599_v10 = vld [vmem:[%s4702_s1 + $0x10] sm:$0xff]  }
   0x4   :  { %v3592_v3 = vld [vmem:[%s4702_s1 + $0x80] sm:$0xff]   ;;  %3078 = vmatpush3.bf16.msra.mxu0 %v3591_v2  ;;  %v3596_v7 = vld [vmem:[%s4702_s1 + $0x88] sm:$0xff]   ;;  %v3600_v11 = vld [vmem:[%s4702_s1 + $0x90] sm:$0xff]  }
   0x5   :  { %3142 = vmatpush3.bf16.msra.mxu1 %v3592_v3  ;;  %3079 = vmatprep.subr.bf16.mxu0 %v3593_v4  ;;  %v3601_v12 = vld [vmem:[%s4702_s1 + $0x58] sm:$0xff]   ;;  %v3605_v16 = vld [vmem:[%s4702_s1 + $0x60] sm:$0xff]   ;;  %v3609_v20 = vld [vmem:[%s4702_s1 + $0x68] sm:$0xff]  }
   0x6   :  { %3143 = vmatprep.subr.bf16.mxu1 %v3594_v5  ;;  %v3602_v13 = vld [vmem:[%s4702_s1 + $0xd8] sm:$0xff]   ;;  %v3606_v17 = vld [vmem:[%s4702_s1 + $0xe0] sm:$0xff]   ;;  %v3610_v21 = vld [vmem:[%s4702_s1 + $0xe8] sm:$0xff]  }
   0x7   :  { %v3603_v14 = vld [vmem:[%s4702_s1 + $0x18] sm:$0xff]   ;;  %v3607_v18 = vld [vmem:[%s4702_s1 + $0x20] sm:$0xff]   ;;  %v3611_v22 = vld [vmem:[%s4702_s1 + $0x28] sm:$0xff]  }
   0x8   :  { %3080 = vmatpush3.bf16.msra.mxu0 %v3595_v6  ;;  %v3604_v15 = vld [vmem:[%s4702_s1 + $0x98] sm:$0xff]   ;;  %v3608_v19 = vld [vmem:[%s4702_s1 + $0xa0] sm:$0xff]   ;;  %v3612_v23 = vld [vmem:[%s4702_s1 + $0xa8] sm:$0xff]  }
   0x9   :  { %3144 = vmatpush3.bf16.msra.mxu1 %v3596_v7  ;;  %3081 = vmatprep.subr.bf16.mxu0 %v3597_v8  ;;  %v3613_v24 = vld [vmem:[%s4702_s1 + $0x70] sm:$0xff]   ;;  %v3617_v28 = vld [vmem:[%s4702_s1 + $0x78] sm:$0xff]   ;;  %v17_v32 = vld [vmem:[%s4703_s0] sm:$0xff] }
   0xa   :  { %3145 = vmatprep.subr.bf16.mxu1 %v3598_v9  ;;  %v3614_v25 = vld [vmem:[%s4702_s1 + $0xf0] sm:$0xff]   ;;  %v3618_v29 = vld [vmem:[%s4702_s1 + $0xf8] sm:$0xff]   ;;  %v25_v33 = vld [vmem:[%s4703_s0 + $0x40] sm:$0xff] }
   0xb   :  { %v3615_v26 = vld [vmem:[%s4702_s1 + $0x30] sm:$0xff]   ;;  %v3619_v30 = vld [vmem:[%s4702_s1 + $0x38] sm:$0xff]   ;;  %v18_v34 = vld [vmem:[%s4703_s0 + $0x8] sm:$0xff]  ;;  %v2742_v35 = vcombine.low %v17_v32, %v25_v33  ;;  %v2743_v36 = vcombine.high %v17_v32, %v25_v33 }
   0xc   :  { %3082 = vmatpush3.bf16.msra.mxu0 %v3599_v10  ;;  %v3616_v27 = vld [vmem:[%s4702_s1 + $0xb0] sm:$0xff]   ;;  %v3620_v31 = vld [vmem:[%s4702_s1 + $0xb8] sm:$0xff]   ;;  %v26_v37 = vld [vmem:[%s4703_s0 + $0x48] sm:$0xff] }
   0xd   :  { %3146 = vmatpush3.bf16.msra.mxu1 %v3600_v11  ;;  %3083 = vmatprep.subr.bf16.mxu0 %v3601_v12  ;;  %v2744_v38 = vcombine.low %v18_v34, %v26_v37  ;;  %v2745_v39 = vcombine.high %v18_v34, %v26_v37  ;;  %v3621_v40 = vld [vmem:[%s4702_s1 + $0x140] sm:$0xff]   ;;  %v34_v47 = vld [vmem:[%s4703_s0 + $0x88] sm:$0xff]  ;;  %v3629_v62 = vld [vmem:[%s4702_s1 + $0x150] sm:$0xff]  }
   0xe   :  { %3147 = vmatprep.subr.bf16.mxu1 %v3602_v13  ;;  %1848 = vmatprep.mubr.bf16.mxu0 %v2743_v36  ;;  %v3622_v41 = vld [vmem:[%s4702_s1 + $0x100] sm:$0xff]   ;;  %v42_v48 = vld [vmem:[%s4703_s0 + $0xc8] sm:$0xff]  ;;  %v3630_v63 = vld [vmem:[%s4702_s1 + $0x110] sm:$0xff]  }
   0xf   :  { %1945 = vmatprep.mubr.bf16.mxu1 %v2745_v39  ;;  %v3623_v42 = vld [vmem:[%s4702_s1 + $0x1c0] sm:$0xff]   ;;  %v2761_v49 = vcombine.high %v34_v47, %v42_v48  ;;  %v3625_v50 = vld [vmem:[%s4702_s1 + $0x148] sm:$0xff]   ;;  %v2760_v53 = vcombine.low %v34_v47, %v42_v48  ;;  %v3631_v0 = vld [vmem:[%s4702_s1 + $0x1d0] sm:$0xff]  }
  0x10   :  { %3084 = vmatpush3.bf16.msra.mxu0 %v3603_v14  ;;  %v3624_v43 = vld [vmem:[%s4702_s1 + $0x180] sm:$0xff]   ;;  %v3626_v52 = vld [vmem:[%s4702_s1 + $0x108] sm:$0xff]   ;;  %v3632_v1 = vld [vmem:[%s4702_s1 + $0x190] sm:$0xff]  }
  0x11   :  { %3148 = vmatpush3.bf16.msra.mxu1 %v3604_v15  ;;  %3085 = vmatprep.subr.bf16.mxu0 %v3605_v16  ;;  %v33_v44 = vld [vmem:[%s4703_s0 + $0x80] sm:$0xff]  ;;  %v3627_v54 = vld [vmem:[%s4702_s1 + $0x1c8] sm:$0xff]   ;;  %v3633_v10 = vld [vmem:[%s4702_s1 + $0x158] sm:$0xff]  }
  0x12   :  { %3149 = vmatprep.subr.bf16.mxu1 %v3606_v17  ;;  %v41_v45 = vld [vmem:[%s4703_s0 + $0xc0] sm:$0xff]  ;;  %v3628_v55 = vld [vmem:[%s4702_s1 + $0x188] sm:$0xff]   ;;  %v3634_v11 = vld [vmem:[%s4702_s1 + $0x118] sm:$0xff]  }
  0x13   :  { %v2759_v46 = vcombine.high %v33_v44, %v41_v45  ;;  %v2758_v51 = vcombine.low %v33_v44, %v41_v45  ;;  %v49_v56 = vld [vmem:[%s4703_s0 + $0x100] sm:$0xff]  ;;  %v50_v58 = vld [vmem:[%s4703_s0 + $0x108] sm:$0xff]  ;;  %v3635_v12 = vld [vmem:[%s4702_s1 + $0x1d8] sm:$0xff]  }
  0x14   :  { %3086 = vmatpush3.bf16.msra.mxu0 %v3607_v18  ;;  %v57_v57 = vld [vmem:[%s4703_s0 + $0x140] sm:$0xff]  ;;  %v58_v59 = vld [vmem:[%s4703_s0 + $0x148] sm:$0xff]  ;;  %v3636_v13 = vld [vmem:[%s4702_s1 + $0x198] sm:$0xff]  }
  0x15   :  { %3150 = vmatpush3.bf16.msra.mxu1 %v3608_v19  ;;  %3087 = vmatprep.subr.bf16.mxu0 %v3609_v20  ;;  %v2775_v60 = vcombine.high %v49_v56, %v57_v57  ;;  %v2777_v61 = vcombine.high %v50_v58, %v58_v59  ;;  %v2774_v2 = vcombine.low %v49_v56, %v57_v57  ;;  %v65_v3 = vld [vmem:[%s4703_s0 + $0x180] sm:$0xff]  ;;  %v66_v5 = vld [vmem:[%s4703_s0 + $0x188] sm:$0xff]  ;;  %v3646_v39 = vld [vmem:[%s4702_s1 + $0x130] sm:$0xff]  }
  0x16   :  { %3151 = vmatprep.subr.bf16.mxu1 %v3610_v21  ;;  %v73_v4 = vld [vmem:[%s4703_s0 + $0x1c0] sm:$0xff]  ;;  %v2776_v6 = vcombine.low %v50_v58, %v58_v59  ;;  %v74_v8 = vld [vmem:[%s4703_s0 + $0x1c8] sm:$0xff]  ;;  %v3650_v48 = vld [vmem:[%s4702_s1 + $0x138] sm:$0xff]  }
  0x17   :  { %v2791_v7 = vcombine.high %v65_v3, %v73_v4  ;;  %v2793_v9 = vcombine.high %v66_v5, %v74_v8  ;;  %v81_v14 = vld [vmem:[%s4703_s0 + $0x200] sm:$0xff]  ;;  %v82_v16 = vld [vmem:[%s4703_s0 + $0x208] sm:$0xff]  ;;  %v2790_v19 = vcombine.low %v65_v3, %v73_v4  ;;  %v2792_v21 = vcombine.low %v66_v5, %v74_v8  ;;  %v28_v3 = vld [vmem:[%s4703_s0 + $0x58] sm:$0xff] }
  0x18   :  { %3088 = vmatpush3.bf16.msra.mxu0 %v3611_v22  ;;  %v89_v15 = vld [vmem:[%s4703_s0 + $0x240] sm:$0xff]  ;;  %v90_v17 = vld [vmem:[%s4703_s0 + $0x248] sm:$0xff]  ;;  %v35_v8 = vld [vmem:[%s4703_s0 + $0x90] sm:$0xff] }
  0x19   :  { %3152 = vmatpush3.bf16.msra.mxu1 %v3612_v23  ;;  %3089 = vmatprep.subr.bf16.mxu0 %v3613_v24  ;;  %v3637_v18 = vld [vmem:[%s4702_s1 + $0x160] sm:$0xff]   ;;  %v2807_v22 = vcombine.high %v81_v14, %v89_v15  ;;  %v2809_v24 = vcombine.high %v82_v16, %v90_v17  ;;  %v3643_v32 = vld [vmem:[%s4702_s1 + $0x1e8] sm:$0xff]   ;;  %v2806_v34 = vcombine.low %v81_v14, %v89_v15 }
  0x1a   :  { %3153 = vmatprep.subr.bf16.mxu1 %v3614_v25  ;;  %v3638_v20 = vld [vmem:[%s4702_s1 + $0x120] sm:$0xff]   ;;  %v3644_v33 = vld [vmem:[%s4702_s1 + $0x1a8] sm:$0xff]  }
  0x1b   :  { %v3639_v23 = vld [vmem:[%s4702_s1 + $0x1e0] sm:$0xff]   ;;  %v114_v44 = vld [vmem:[%s4703_s0 + $0x308] sm:$0xff] }
  0x1c   :  { %3090 = vmatpush3.bf16.msra.mxu0 %v3615_v26  ;;  %v3640_v25 = vld [vmem:[%s4702_s1 + $0x1a0] sm:$0xff]   ;;  %v122_v45 = vld [vmem:[%s4703_s0 + $0x348] sm:$0xff] }
  0x1d   :  { %3154 = vmatpush3.bf16.msra.mxu1 %v3616_v27  ;;  %3091 = vmatprep.subr.bf16.mxu0 %v3617_v28  ;;  %v97_v26 = vld [vmem:[%s4703_s0 + $0x280] sm:$0xff]  ;;  %v3641_v28 = vld [vmem:[%s4702_s1 + $0x168] sm:$0xff]  }
  0x1e   :  { %3155 = vmatprep.subr.bf16.mxu1 %v3618_v29  ;;  %v105_v27 = vld [vmem:[%s4703_s0 + $0x2c0] sm:$0xff]  ;;  %v98_v29 = vld [vmem:[%s4703_s0 + $0x288] sm:$0xff] }
  0x1f   :  { %v2823_v36 = vcombine.high %v97_v26, %v105_v27  ;;  %v2822_v47 = vcombine.low %v97_v26, %v105_v27  ;;  %v3653_v56 = vld [vmem:[%s4702_s1 + $0x240] sm:$0xff]   ;;  %v130_v57 = vld [vmem:[%s4703_s0 + $0x388] sm:$0xff]  ;;  %v3661_v26 = vld [vmem:[%s4702_s1 + $0x250] sm:$0xff]  }
  0x20   :  { %3092 = vmatpush3.bf16.msra.mxu0 %v3619_v30  ;;  %v106_v30 = vld [vmem:[%s4703_s0 + $0x2c8] sm:$0xff]  ;;  %v3655_v58 = vld [vmem:[%s4702_s1 + $0x2c0] sm:$0xff]   ;;  %v3663_v27 = vld [vmem:[%s4702_s1 + $0x2d0] sm:$0xff]  }
  0x21   :  { %3156 = vmatpush3.bf16.msra.mxu1 %v3620_v31  ;;  %3205 = vmatprep.subr.bf16.mxu0 %v3621_v40  ;;  %v3642_v31 = vld [vmem:[%s4702_s1 + $0x128] sm:$0xff]   ;;  %v2825_v37 = vcombine.high %v98_v29, %v106_v30  ;;  %v3647_v40 = vld [vmem:[%s4702_s1 + $0x1f0] sm:$0xff]   ;;  %v3656_v15 = vld [vmem:[%s4702_s1 + $0x280] sm:$0xff]  }
  0x22   :  { %3269 = vmatprep.subr.bf16.mxu1 %v3623_v42  ;;  %v121_v42 = vld [vmem:[%s4703_s0 + $0x340] sm:$0xff]  ;;  %v138_v59 = vld [vmem:[%s4703_s0 + $0x3c8] sm:$0xff] }
  0x23   :  { %1849 = vmatmul.mubr.bf16.vlgmr.msra.gmra.mrb[0].mxu0 %v2742_v35  ;;  %v2808_v35 = vcombine.low %v82_v16, %v90_v17  ;;  %v2856_v5 = vcombine.low %v130_v57, %v138_v59  ;;  %v3657_v17 = vld [vmem:[%s4702_s1 + $0x248] sm:$0xff]  }
  0x24   :  { %1946 = vmatmul.mubr.bf16.vlgmr.msra.gmra.mrb[0].mxu1 %v2744_v38  ;;  %3206 = vmatpush3.bf16.msra.mxu0 %v3622_v41  ;;  %v3645_v38 = vld [vmem:[%s4702_s1 + $0x170] sm:$0xff]   ;;  %v113_v41 = vld [vmem:[%s4703_s0 + $0x300] sm:$0xff] }
  0x25   :  { %3270 = vmatpush3.bf16.msra.mxu1 %v3624_v43  ;;  %1856 = vmatprep.mubr.bf16.mxu0 %v2759_v46  ;;  %v3648_v43 = vld [vmem:[%s4702_s1 + $0x1b0] sm:$0xff]   ;;  %v3649_v46 = vld [vmem:[%s4702_s1 + $0x178] sm:$0xff]  }
  0x26   :  { %1953 = vmatprep.mubr.bf16.mxu1 %v2761_v49  ;;  %3207 = vmatprep.subr.bf16.mxu0 %v3625_v50  ;;  %v2824_v49 = vcombine.low %v98_v29, %v106_v30  ;;  %v2839_v50 = vcombine.high %v113_v41, %v121_v42 }
  0x27   :  { %3271 = vmatprep.subr.bf16.mxu1 %v3627_v54  ;;  %v129_v54 = vld [vmem:[%s4703_s0 + $0x380] sm:$0xff] }
  0x28   :  { %3208 = vmatpush3.bf16.msra.mxu0 %v3626_v52  ;;  %v2841_v52 = vcombine.high %v114_v44, %v122_v45 }
  0x29   :  { %3272 = vmatpush3.bf16.msra.mxu1 %v3628_v55  ;;  %3209 = vmatprep.subr.bf16.mxu0 %v3629_v62  ;;  %v137_v55 = vld [vmem:[%s4703_s0 + $0x3c0] sm:$0xff] }
  0x2a   :  { %3273 = vmatprep.subr.bf16.mxu1 %v3631_v0  ;;  %v2855_v62 = vcombine.high %v129_v54, %v137_v55  ;;  %v19_v0 = vld [vmem:[%s4703_s0 + $0x10] sm:$0xff]  ;;  %v2854_v4 = vcombine.low %v129_v54, %v137_v55  ;;  %v84_v54 = vld [vmem:[%s4703_s0 + $0x218] sm:$0xff] }
  0x2b   :  { %1857 = vmatmul.mubr.bf16.gmra.mrb[4].mxu0 %v2758_v51  ;;  %v3651_v51 = vld [vmem:[%s4702_s1 + $0x1f8] sm:$0xff]  }
  0x2c   :  { %1954 = vmatmul.mubr.bf16.gmra.mrb[4].mxu1 %v2760_v53  ;;  %1864 = vmatprep.mubr.bf16.mxu0 %v2775_v60  ;;  %v3652_v53 = vld [vmem:[%s4702_s1 + $0x1b8] sm:$0xff]   ;;  %v2838_v60 = vcombine.low %v113_v41, %v121_v42  ;;  %v3669_v42 = vld [vmem:[%s4702_s1 + $0x260] sm:$0xff]  }
  0x2d   :  { %1961 = vmatprep.mubr.bf16.mxu1 %v2777_v61  ;;  %3210 = vmatpush3.bf16.msra.mxu0 %v3630_v63  ;;  %v2840_v61 = vcombine.low %v114_v44, %v122_v45  ;;  %v2857_v63 = vcombine.high %v130_v57, %v138_v59  ;;  %v3668_v41 = vld [vmem:[%s4702_s1 + $0x298] sm:$0xff]   ;;  %v3671_v44 = vld [vmem:[%s4702_s1 + $0x2e0] sm:$0xff]   ;;  %v3676_v57 = vld [vmem:[%s4702_s1 + $0x2a8] sm:$0xff]  }
  0x2e   :  { %3274 = vmatpush3.bf16.msra.mxu1 %v3632_v1  ;;  %3211 = vmatprep.subr.bf16.mxu0 %v3633_v10  ;;  %v27_v1 = vld [vmem:[%s4703_s0 + $0x50] sm:$0xff]  ;;  %v92_v55 = vld [vmem:[%s4703_s0 + $0x258] sm:$0xff] }
  0x2f   :  { %3275 = vmatprep.subr.bf16.mxu1 %v3635_v12  ;;  %v2746_v10 = vcombine.low %v19_v0, %v27_v1  ;;  %v36_v12 = vld [vmem:[%s4703_s0 + $0x98] sm:$0xff] }
  0x31   :  { %3212 = vmatpush3.bf16.msra.mxu0 %v3634_v11  ;;  %v3654_v11 = vld [vmem:[%s4702_s1 + $0x200] sm:$0xff]  }
  0x32   :  { %3276 = vmatpush3.bf16.msra.mxu1 %v3636_v13  ;;  %3213 = vmatprep.subr.bf16.mxu0 %v3637_v18  ;;  %v44_v13 = vld [vmem:[%s4703_s0 + $0xd8] sm:$0xff] }
  0x33   :  { %1865 = vmatmul.mubr.bf16.gmra.mrb[8].mxu0 %v2774_v2  ;;  %3277 = vmatprep.subr.bf16.mxu1 %v3639_v23  ;;  %v20_v2 = vld [vmem:[%s4703_s0 + $0x18] sm:$0xff]  ;;  %v2765_v18 = vcombine.high %v36_v12, %v44_v13  ;;  %v59_v23 = vld [vmem:[%s4703_s0 + $0x150] sm:$0xff]  ;;  %v2764_v29 = vcombine.low %v36_v12, %v44_v13  ;;  %v3687_v12 = vld [vmem:[%s4702_s1 + $0x3c0] sm:$0xff]   ;;  %v2812_v13 = vcombine.low %v84_v54, %v92_v55 }
  0x34   :  { %1962 = vmatmul.mubr.bf16.gmra.mrb[8].mxu1 %v2776_v6  ;;  %1872 = vmatprep.mubr.bf16.mxu0 %v2791_v7  ;;  %v2747_v6 = vcombine.high %v19_v0, %v27_v1  ;;  %v2749_v7 = vcombine.high %v20_v2, %v28_v3  ;;  %v2748_v14 = vcombine.low %v20_v2, %v28_v3  ;;  %v3678_v0 = vld [vmem:[%s4702_s1 + $0x230] sm:$0xff]   ;;  %v3681_v2 = vld [vmem:[%s4702_s1 + $0x278] sm:$0xff]  }
  0x35   :  { %1969 = vmatprep.mubr.bf16.mxu1 %v2793_v9  ;;  %3214 = vmatpush3.bf16.msra.mxu0 %v3638_v20  ;;  %v43_v9 = vld [vmem:[%s4703_s0 + $0xd0] sm:$0xff]  ;;  %v3659_v20 = vld [vmem:[%s4702_s1 + $0x2c8] sm:$0xff]  }
  0x36   :  { %3278 = vmatpush3.bf16.msra.mxu1 %v3640_v25  ;;  %3215 = vmatprep.subr.bf16.mxu0 %v3641_v28  ;;  %v2763_v16 = vcombine.high %v35_v8, %v43_v9  ;;  %v60_v25 = vld [vmem:[%s4703_s0 + $0x158] sm:$0xff]  ;;  %v2762_v28 = vcombine.low %v35_v8, %v43_v9  ;;  %v3680_v1 = vld [vmem:[%s4702_s1 + $0x2b0] sm:$0xff]  }
  0x37   :  { %3279 = vmatprep.subr.bf16.mxu1 %v3643_v32  ;;  %v3662_v32 = vld [vmem:[%s4702_s1 + $0x210] sm:$0xff]   ;;  %v3682_v8 = vld [vmem:[%s4702_s1 + $0x238] sm:$0xff]  }
  0x38   :  { %v99_v3 = vld [vmem:[%s4703_s0 + $0x290] sm:$0xff]  ;;  %v3684_v9 = vld [vmem:[%s4702_s1 + $0x2b8] sm:$0xff]  }
  0x39   :  { %3216 = vmatpush3.bf16.msra.mxu0 %v3642_v31 }
  0x3a   :  { %3280 = vmatpush3.bf16.msra.mxu1 %v3644_v33  ;;  %3217 = vmatprep.subr.bf16.mxu0 %v3645_v38  ;;  %v3664_v33 = vld [vmem:[%s4702_s1 + $0x290] sm:$0xff]   ;;  %v68_v38 = vld [vmem:[%s4703_s0 + $0x198] sm:$0xff] }
  0x3b   :  { %1873 = vmatmul.mubr.bf16.gmra.mrb[12].mxu0 %v2790_v19  ;;  %3281 = vmatprep.subr.bf16.mxu1 %v3647_v40  ;;  %v3658_v19 = vld [vmem:[%s4702_s1 + $0x208] sm:$0xff]   ;;  %v3666_v40 = vld [vmem:[%s4702_s1 + $0x218] sm:$0xff]  }
  0x3c   :  { %1970 = vmatmul.mubr.bf16.gmra.mrb[12].mxu1 %v2792_v21  ;;  %1880 = vmatprep.mubr.bf16.mxu0 %v2807_v22  ;;  %v3660_v21 = vld [vmem:[%s4702_s1 + $0x288] sm:$0xff]   ;;  %v51_v22 = vld [vmem:[%s4703_s0 + $0x110] sm:$0xff] }
  0x3d   :  { %1977 = vmatprep.mubr.bf16.mxu1 %v2809_v24  ;;  %3218 = vmatpush3.bf16.msra.mxu0 %v3646_v39  ;;  %v52_v24 = vld [vmem:[%s4703_s0 + $0x118] sm:$0xff]  ;;  %v2779_v30 = vcombine.high %v51_v22, %v59_v23 }
  0x3e   :  { %3282 = vmatpush3.bf16.msra.mxu1 %v3648_v43  ;;  %3219 = vmatprep.subr.bf16.mxu0 %v3649_v46  ;;  %v2781_v31 = vcombine.high %v52_v24, %v60_v25  ;;  %v76_v39 = vld [vmem:[%s4703_s0 + $0x1d8] sm:$0xff]  ;;  %v2778_v43 = vcombine.low %v51_v22, %v59_v23  ;;  %v2780_v45 = vcombine.low %v52_v24, %v60_v25  ;;  %v131_v24 = vld [vmem:[%s4703_s0 + $0x390] sm:$0xff] }
  0x3f   :  { %3283 = vmatprep.subr.bf16.mxu1 %v3651_v51  ;;  %v83_v51 = vld [vmem:[%s4703_s0 + $0x210] sm:$0xff] }
  0x40   :  { %v139_v25 = vld [vmem:[%s4703_s0 + $0x3d0] sm:$0xff] }
  0x41   :  { %3220 = vmatpush3.bf16.msra.mxu0 %v3650_v48  ;;  %v2797_v48 = vcombine.high %v68_v38, %v76_v39 }
  0x42   :  { %3284 = vmatpush3.bf16.msra.mxu1 %v3652_v53  ;;  %3333 = vmatprep.subr.bf16.mxu0 %v3653_v56  ;;  %v91_v53 = vld [vmem:[%s4703_s0 + $0x250] sm:$0xff]  ;;  %v3674_v56 = vld [vmem:[%s4702_s1 + $0x228] sm:$0xff]  }
  0x43   :  { %1881 = vmatmul.mubr.bf16.gmra.mrb[16].mxu0 %v2806_v34  ;;  %3397 = vmatprep.subr.bf16.mxu1 %v3655_v58  ;;  %v3665_v34 = vld [vmem:[%s4702_s1 + $0x258] sm:$0xff]   ;;  %v3677_v58 = vld [vmem:[%s4702_s1 + $0x270] sm:$0xff]  }
  0x44   :  { %1978 = vmatmul.mubr.bf16.gmra.mrb[16].mxu1 %v2808_v35  ;;  %1888 = vmatprep.mubr.bf16.mxu0 %v2823_v36  ;;  %v67_v35 = vld [vmem:[%s4703_s0 + $0x190] sm:$0xff] }
  0x45   :  { %1985 = vmatprep.mubr.bf16.mxu1 %v2825_v37  ;;  %v75_v36 = vld [vmem:[%s4703_s0 + $0x1d0] sm:$0xff]  ;;  %v3667_v37 = vld [vmem:[%s4702_s1 + $0x2d8] sm:$0xff]  }
  0x46   :  { %v2795_v46 = vcombine.high %v67_v35, %v75_v36  ;;  %v2794_v59 = vcombine.low %v67_v35, %v75_v36  ;;  %v30_v35 = vld [vmem:[%s4703_s0 + $0x68] sm:$0xff]  ;;  %v2858_v36 = vcombine.low %v131_v24, %v139_v25 }
  0x4b   :  { %1889 = vmatmul.mubr.bf16.gmra.mrb[20].mxu0 %v2822_v47  ;;  %v3670_v47 = vld [vmem:[%s4702_s1 + $0x220] sm:$0xff]  }
  0x4c   :  { %1986 = vmatmul.mubr.bf16.gmra.mrb[20].mxu1 %v2824_v49  ;;  %1896 = vmatprep.mubr.bf16.mxu0 %v2839_v50  ;;  %v3672_v49 = vld [vmem:[%s4702_s1 + $0x2a0] sm:$0xff]   ;;  %v3673_v50 = vld [vmem:[%s4702_s1 + $0x268] sm:$0xff]  }
  0x4d   :  { %1993 = vmatprep.mubr.bf16.mxu1 %v2841_v52  ;;  %v3675_v52 = vld [vmem:[%s4702_s1 + $0x2e8] sm:$0xff]  }
  0x53   :  { %1897 = vmatmul.mubr.bf16.gmra.mrb[24].mxu0 %v2838_v60  ;;  %v3679_v60 = vld [vmem:[%s4702_s1 + $0x2f0] sm:$0xff]  }
  0x54   :  { %1994 = vmatmul.mubr.bf16.gmra.mrb[24].mxu1 %v2840_v61  ;;  %1904 = vmatprep.mubr.bf16.mxu0 %v2855_v62  ;;  %v2796_v61 = vcombine.low %v68_v38, %v76_v39  ;;  %v2811_v62 = vcombine.high %v83_v51, %v91_v53 }
  0x55   :  { %2001 = vmatprep.mubr.bf16.mxu1 %v2857_v63  ;;  %v2813_v63 = vcombine.high %v84_v54, %v92_v55  ;;  %v53_v54 = vld [vmem:[%s4703_s0 + $0x120] sm:$0xff] }
  0x56   :  { %v61_v55 = vld [vmem:[%s4703_s0 + $0x160] sm:$0xff] }
  0x5b   :  { %1905 = vmatmul.mubr.bf16.gmra.mrb[28].mxu0 %v2854_v4  ;;  %v107_v4 = vld [vmem:[%s4703_s0 + $0x2d0] sm:$0xff] }
  0x5c   :  { %2002 = vmatmul.mubr.bf16.gmra.mrb[28].mxu1 %v2856_v5  ;;  %2042 = vmatprep.mubr.bf16.mxu0 %v2747_v6  ;;  %v3683_v5 = vld [vmem:[%s4702_s1 + $0x2f8] sm:$0xff]  }
  0x5d   :  { %2139 = vmatprep.mubr.bf16.mxu1 %v2749_v7  ;;  %v100_v6 = vld [vmem:[%s4703_s0 + $0x298] sm:$0xff] }
  0x5e   :  { %v108_v7 = vld [vmem:[%s4703_s0 + $0x2d8] sm:$0xff] }
  0x63   :  { %2043 = vmatmul.mubr.bf16.vlgmr.msra.gmra.mrb[32].mxu0 %v2746_v10  ;;  %v3685_v10 = vld [vmem:[%s4702_s1 + $0x340] sm:$0xff]  }
  0x64   :  { %2140 = vmatmul.mubr.bf16.vlgmr.msra.gmra.mrb[32].mxu1 %v2748_v14  ;;  %3334 = vmatpush3.bf16.msra.mxu0 %v3654_v11  ;;  %v2810_v11 = vcombine.low %v83_v51, %v91_v53  ;;  %v2827_v14 = vcombine.high %v99_v3, %v107_v4  ;;  %v3691_v51 = vld [vmem:[%s4702_s1 + $0x3c8] sm:$0xff]  }
  0x65   :  { %3398 = vmatpush3.bf16.msra.mxu1 %v3656_v15  ;;  %2050 = vmatprep.mubr.bf16.mxu0 %v2763_v16  ;;  %v2829_v15 = vcombine.high %v100_v6, %v108_v7  ;;  %v115_v16 = vld [vmem:[%s4703_s0 + $0x310] sm:$0xff]  ;;  %v3692_v53 = vld [vmem:[%s4702_s1 + $0x388] sm:$0xff]  }
  0x66   :  { %2147 = vmatprep.mubr.bf16.mxu1 %v2765_v18  ;;  %3335 = vmatprep.subr.bf16.mxu0 %v3657_v17  ;;  %v123_v17 = vld [vmem:[%s4703_s0 + $0x350] sm:$0xff]  ;;  %v116_v18 = vld [vmem:[%s4703_s0 + $0x318] sm:$0xff] }
  0x67   :  { %3399 = vmatprep.subr.bf16.mxu1 %v3659_v20  ;;  %v2826_v20 = vcombine.low %v99_v3, %v107_v4  ;;  %v2843_v22 = vcombine.high %v115_v16, %v123_v17  ;;  %v3699_v3 = vld [vmem:[%s4702_s1 + $0x3d8] sm:$0xff]   ;;  %v69_v4 = vld [vmem:[%s4703_s0 + $0x1a0] sm:$0xff] }
  0x68   :  { %3336 = vmatpush3.bf16.msra.mxu0 %v3658_v19  ;;  %v124_v19 = vld [vmem:[%s4703_s0 + $0x358] sm:$0xff] }
  0x69   :  { %3400 = vmatpush3.bf16.msra.mxu1 %v3660_v21  ;;  %3337 = vmatprep.subr.bf16.mxu0 %v3661_v26  ;;  %v2828_v21 = vcombine.low %v100_v6, %v108_v7  ;;  %v2845_v23 = vcombine.high %v116_v18, %v124_v19  ;;  %v132_v26 = vld [vmem:[%s4703_s0 + $0x398] sm:$0xff]  ;;  %v70_v6 = vld [vmem:[%s4703_s0 + $0x1a8] sm:$0xff] }
  0x6a   :  { %3401 = vmatprep.subr.bf16.mxu1 %v3663_v27  ;;  %v140_v27 = vld [vmem:[%s4703_s0 + $0x3d8] sm:$0xff] }
  0x6b   :  { %2051 = vmatmul.mubr.bf16.gmra.mrb[36].mxu0 %v2762_v28  ;;  %v2842_v28 = vcombine.low %v115_v16, %v123_v17  ;;  %v3698_v7 = vld [vmem:[%s4702_s1 + $0x318] sm:$0xff]   ;;  %v3702_v16 = vld [vmem:[%s4702_s1 + $0x320] sm:$0xff]  }
  0x6c   :  { %2148 = vmatmul.mubr.bf16.gmra.mrb[36].mxu1 %v2764_v29  ;;  %2058 = vmatprep.mubr.bf16.mxu0 %v2779_v30  ;;  %v2844_v29 = vcombine.low %v116_v18, %v124_v19  ;;  %v2859_v30 = vcombine.high %v131_v24, %v139_v25  ;;  %v3704_v17 = vld [vmem:[%s4702_s1 + $0x3a0] sm:$0xff]   ;;  %v3705_v18 = vld [vmem:[%s4702_s1 + $0x368] sm:$0xff]  }
  0x6d   :  { %2155 = vmatprep.mubr.bf16.mxu1 %v2781_v31  ;;  %3338 = vmatpush3.bf16.msra.mxu0 %v3662_v32  ;;  %v2861_v31 = vcombine.high %v132_v26, %v140_v27  ;;  %v21_v32 = vld [vmem:[%s4703_s0 + $0x20] sm:$0xff]  ;;  %v3707_v19 = vld [vmem:[%s4702_s1 + $0x3e8] sm:$0xff]  }
  0x6e   :  { %3402 = vmatpush3.bf16.msra.mxu1 %v3664_v33  ;;  %3339 = vmatprep.subr.bf16.mxu0 %v3665_v34  ;;  %v29_v33 = vld [vmem:[%s4703_s0 + $0x60] sm:$0xff]  ;;  %v22_v34 = vld [vmem:[%s4703_s0 + $0x28] sm:$0xff] }
  0x6f   :  { %3403 = vmatprep.subr.bf16.mxu1 %v3667_v37  ;;  %v2860_v37 = vcombine.low %v132_v26, %v140_v27  ;;  %v2751_v38 = vcombine.high %v21_v32, %v29_v33  ;;  %v2753_v39 = vcombine.high %v22_v34, %v30_v35  ;;  %v94_v24 = vld [vmem:[%s4703_s0 + $0x268] sm:$0xff]  ;;  %v3709_v26 = vld [vmem:[%s4702_s1 + $0x370] sm:$0xff]  }
  0x70   :  { %v3708_v25 = vld [vmem:[%s4702_s1 + $0x3a8] sm:$0xff]  }
  0x71   :  { %3340 = vmatpush3.bf16.msra.mxu0 %v3666_v40  ;;  %v37_v40 = vld [vmem:[%s4703_s0 + $0xa0] sm:$0xff] }
  0x72   :  { %3404 = vmatpush3.bf16.msra.mxu1 %v3668_v41  ;;  %3341 = vmatprep.subr.bf16.mxu0 %v3669_v42  ;;  %v45_v41 = vld [vmem:[%s4703_s0 + $0xe0] sm:$0xff]  ;;  %v2750_v42 = vcombine.low %v21_v32, %v29_v33  ;;  %v3710_v32 = vld [vmem:[%s4702_s1 + $0x330] sm:$0xff]  }
  0x73   :  { %2059 = vmatmul.mubr.bf16.gmra.mrb[40].mxu0 %v2778_v43  ;;  %3405 = vmatprep.subr.bf16.mxu1 %v3671_v44  ;;  %v38_v43 = vld [vmem:[%s4703_s0 + $0xa8] sm:$0xff]  ;;  %v3712_v33 = vld [vmem:[%s4702_s1 + $0x3b0] sm:$0xff]  }
  0x74   :  { %2156 = vmatmul.mubr.bf16.gmra.mrb[40].mxu1 %v2780_v45  ;;  %2066 = vmatprep.mubr.bf16.mxu0 %v2795_v46  ;;  %v46_v44 = vld [vmem:[%s4703_s0 + $0xe8] sm:$0xff]  ;;  %v2752_v45 = vcombine.low %v22_v34, %v30_v35  ;;  %v3686_v46 = vld [vmem:[%s4702_s1 + $0x300] sm:$0xff]   ;;  %v3713_v34 = vld [vmem:[%s4702_s1 + $0x378] sm:$0xff]  }
  0x75   :  { %2163 = vmatprep.mubr.bf16.mxu1 %v2797_v48  ;;  %3342 = vmatpush3.bf16.msra.mxu0 %v3670_v47  ;;  %v3688_v47 = vld [vmem:[%s4702_s1 + $0x380] sm:$0xff]   ;;  %v2767_v48 = vcombine.high %v37_v40, %v45_v41  ;;  %v3715_v35 = vld [vmem:[%s4702_s1 + $0x3f8] sm:$0xff]  }
  0x76   :  { %3406 = vmatpush3.bf16.msra.mxu1 %v3672_v49  ;;  %3343 = vmatprep.subr.bf16.mxu0 %v3673_v50  ;;  %v2769_v49 = vcombine.high %v38_v43, %v46_v44  ;;  %v3689_v50 = vld [vmem:[%s4702_s1 + $0x348] sm:$0xff]  }
  0x77   :  { %3407 = vmatprep.subr.bf16.mxu1 %v3675_v52  ;;  %v3690_v52 = vld [vmem:[%s4702_s1 + $0x308] sm:$0xff]  }
  0x79   :  { %3344 = vmatpush3.bf16.msra.mxu0 %v3674_v56  ;;  %v3693_v56 = vld [vmem:[%s4702_s1 + $0x350] sm:$0xff]  }
  0x7a   :  { %3408 = vmatpush3.bf16.msra.mxu1 %v3676_v57  ;;  %3345 = vmatprep.subr.bf16.mxu0 %v3677_v58  ;;  %v54_v57 = vld [vmem:[%s4703_s0 + $0x128] sm:$0xff] }
  0x7b   :  { %2067 = vmatmul.mubr.bf16.gmra.mrb[44].mxu0 %v2794_v59  ;;  %3409 = vmatprep.subr.bf16.mxu1 %v3679_v60  ;;  %v62_v58 = vld [vmem:[%s4703_s0 + $0x168] sm:$0xff]  ;;  %v3695_v59 = vld [vmem:[%s4702_s1 + $0x3d0] sm:$0xff]   ;;  %v2766_v60 = vcombine.low %v37_v40, %v45_v41  ;;  %v3716_v41 = vld [vmem:[%s4702_s1 + $0x3b8] sm:$0xff]  }
  0x7c   :  { %2164 = vmatmul.mubr.bf16.gmra.mrb[44].mxu1 %v2796_v61  ;;  %2074 = vmatprep.mubr.bf16.mxu0 %v2811_v62  ;;  %v2768_v61 = vcombine.low %v38_v43, %v46_v44  ;;  %v2783_v62 = vcombine.high %v53_v54, %v61_v55  ;;  %v110_v40 = vld [vmem:[%s4703_s0 + $0x2e8] sm:$0xff] }
  0x7d   :  { %2171 = vmatprep.mubr.bf16.mxu1 %v2813_v63  ;;  %3346 = vmatpush3.bf16.msra.mxu0 %v3678_v0  ;;  %v2785_v63 = vcombine.high %v54_v57, %v62_v58  ;;  %v3694_v0 = vld [vmem:[%s4702_s1 + $0x310] sm:$0xff]  }
  0x7e   :  { %3410 = vmatpush3.bf16.msra.mxu1 %v3680_v1  ;;  %3347 = vmatprep.subr.bf16.mxu0 %v3681_v2  ;;  %v3696_v1 = vld [vmem:[%s4702_s1 + $0x390] sm:$0xff]   ;;  %v3697_v2 = vld [vmem:[%s4702_s1 + $0x358] sm:$0xff]  }
  0x7f   :  { %3411 = vmatprep.subr.bf16.mxu1 %v3683_v5  ;;  %v77_v5 = vld [vmem:[%s4703_s0 + $0x1e0] sm:$0xff] }
  0x80   :  { %v2798_v27 = vcombine.low %v69_v4, %v77_v5 }
  0x81   :  { %3348 = vmatpush3.bf16.msra.mxu0 %v3682_v8  ;;  %v78_v8 = vld [vmem:[%s4703_s0 + $0x1e8] sm:$0xff] }
  0x82   :  { %3412 = vmatpush3.bf16.msra.mxu1 %v3684_v9  ;;  %3461 = vmatprep.subr.bf16.mxu0 %v3685_v10  ;;  %v3700_v9 = vld [vmem:[%s4702_s1 + $0x398] sm:$0xff]   ;;  %v3701_v10 = vld [vmem:[%s4702_s1 + $0x360] sm:$0xff]  }
  0x83   :  { %2075 = vmatmul.mubr.bf16.gmra.mrb[48].mxu0 %v2810_v11  ;;  %3525 = vmatprep.subr.bf16.mxu1 %v3687_v12  ;;  %v2782_v11 = vcombine.low %v53_v54, %v61_v55  ;;  %v3703_v12 = vld [vmem:[%s4702_s1 + $0x3e0] sm:$0xff]  }
  0x84   :  { %2172 = vmatmul.mubr.bf16.gmra.mrb[48].mxu1 %v2812_v13  ;;  %2082 = vmatprep.mubr.bf16.mxu0 %v2827_v14  ;;  %v2784_v13 = vcombine.low %v54_v57, %v62_v58  ;;  %v2799_v14 = vcombine.high %v69_v4, %v77_v5  ;;  %v133_v54 = vld [vmem:[%s4703_s0 + $0x3a0] sm:$0xff]  ;;  %v142_v57 = vld [vmem:[%s4703_s0 + $0x3e8] sm:$0xff] }
  0x85   :  { %2179 = vmatprep.mubr.bf16.mxu1 %v2829_v15  ;;  %v2801_v15 = vcombine.high %v70_v6, %v78_v8  ;;  %v141_v55 = vld [vmem:[%s4703_s0 + $0x3e0] sm:$0xff] }
  0x8b   :  { %2083 = vmatmul.mubr.bf16.gmra.mrb[52].mxu0 %v2826_v20  ;;  %v85_v20 = vld [vmem:[%s4703_s0 + $0x220] sm:$0xff] }
  0x8c   :  { %2180 = vmatmul.mubr.bf16.gmra.mrb[52].mxu1 %v2828_v21  ;;  %2090 = vmatprep.mubr.bf16.mxu0 %v2843_v22  ;;  %v93_v21 = vld [vmem:[%s4703_s0 + $0x260] sm:$0xff]  ;;  %v86_v22 = vld [vmem:[%s4703_s0 + $0x228] sm:$0xff] }
  0x8d   :  { %2187 = vmatprep.mubr.bf16.mxu1 %v2845_v23  ;;  %v3706_v23 = vld [vmem:[%s4702_s1 + $0x328] sm:$0xff]   ;;  %v2816_v43 = vcombine.low %v86_v22, %v94_v24 }
  0x93   :  { %2091 = vmatmul.mubr.bf16.gmra.mrb[56].mxu0 %v2842_v28  ;;  %v3711_v28 = vld [vmem:[%s4702_s1 + $0x3f0] sm:$0xff]  }
  0x94   :  { %2188 = vmatmul.mubr.bf16.gmra.mrb[56].mxu1 %v2844_v29  ;;  %2098 = vmatprep.mubr.bf16.mxu0 %v2859_v30  ;;  %v2800_v29 = vcombine.low %v70_v6, %v78_v8  ;;  %v2815_v30 = vcombine.high %v85_v20, %v93_v21  ;;  %v39_v6 = vld [vmem:[%s4703_s0 + $0xb0] sm:$0xff]  ;;  %v40_v8 = vld [vmem:[%s4703_s0 + $0xb8] sm:$0xff] }
  0x95   :  { %2195 = vmatprep.mubr.bf16.mxu1 %v2861_v31  ;;  %v2817_v31 = vcombine.high %v86_v22, %v94_v24  ;;  %v71_v22 = vld [vmem:[%s4703_s0 + $0x1b0] sm:$0xff]  ;;  %v72_v24 = vld [vmem:[%s4703_s0 + $0x1b8] sm:$0xff] }
  0x9b   :  { %2099 = vmatmul.mubr.bf16.gmra.mrb[60].mxu0 %v2858_v36  ;;  %v101_v36 = vld [vmem:[%s4703_s0 + $0x2a0] sm:$0xff] }
  0x9c   :  { %2196 = vmatmul.mubr.bf16.gmra.mrb[60].mxu1 %v2860_v37  ;;  %2236 = vmatprep.mubr.bf16.mxu0 %v2751_v38  ;;  %v109_v37 = vld [vmem:[%s4703_s0 + $0x2e0] sm:$0xff]  ;;  %v3714_v38 = vld [vmem:[%s4702_s1 + $0x338] sm:$0xff]  }
  0x9d   :  { %2333 = vmatprep.mubr.bf16.mxu1 %v2753_v39  ;;  %v102_v39 = vld [vmem:[%s4703_s0 + $0x2a8] sm:$0xff]  ;;  %v2831_v44 = vcombine.high %v101_v36, %v109_v37 }
  0xa3   :  { %2237 = vmatmul.mubr.bf16.vlgmr.msra.gmra.mrb[64].mxu0 %v2750_v42  ;;  %v2814_v42 = vcombine.low %v85_v20, %v93_v21 }
  0xa4   :  { %2334 = vmatmul.mubr.bf16.vlgmr.msra.gmra.mrb[64].mxu1 %v2752_v45  ;;  %3462 = vmatpush3.bf16.msra.mxu0 %v3686_v46  ;;  %v2833_v45 = vcombine.high %v102_v39, %v110_v40  ;;  %v117_v46 = vld [vmem:[%s4703_s0 + $0x320] sm:$0xff] }
  0xa5   :  { %3526 = vmatpush3.bf16.msra.mxu1 %v3688_v47  ;;  %2244 = vmatprep.mubr.bf16.mxu0 %v2767_v48  ;;  %v125_v47 = vld [vmem:[%s4703_s0 + $0x360] sm:$0xff]  ;;  %v118_v48 = vld [vmem:[%s4703_s0 + $0x328] sm:$0xff] }
  0xa6   :  { %2341 = vmatprep.mubr.bf16.mxu1 %v2769_v49  ;;  %3463 = vmatprep.subr.bf16.mxu0 %v3689_v50  ;;  %v126_v49 = vld [vmem:[%s4703_s0 + $0x368] sm:$0xff]  ;;  %v2830_v50 = vcombine.low %v101_v36, %v109_v37  ;;  %v2846_v58 = vcombine.low %v117_v46, %v125_v47  ;;  %v4477_v36 = vld [vmem:[%s4704_s2] ss:$0 sm:$0xff] }
  0xa7   :  { %3527 = vmatprep.subr.bf16.mxu1 %v3691_v51  ;;  %v2832_v51 = vcombine.low %v102_v39, %v110_v40 }
  0xa8   :  { %3464 = vmatpush3.bf16.msra.mxu0 %v3690_v52  ;;  %v2847_v52 = vcombine.high %v117_v46, %v125_v47 }
  0xa9   :  { %3528 = vmatpush3.bf16.msra.mxu1 %v3692_v53  ;;  %3465 = vmatprep.subr.bf16.mxu0 %v3693_v56  ;;  %v2849_v53 = vcombine.high %v118_v48, %v126_v49  ;;  %v134_v56 = vld [vmem:[%s4703_s0 + $0x3a8] sm:$0xff] }
  0xaa   :  { %3529 = vmatprep.subr.bf16.mxu1 %v3695_v59  ;;  %v2848_v59 = vcombine.low %v118_v48, %v126_v49 }
  0xab   :  { %2245 = vmatmul.mubr.bf16.gmra.mrb[68].mxu0 %v2766_v60  ;;  %v2863_v60 = vcombine.high %v133_v54, %v141_v55 }
  0xac   :  { %2342 = vmatmul.mubr.bf16.gmra.mrb[68].mxu1 %v2768_v61  ;;  %2252 = vmatprep.mubr.bf16.mxu0 %v2783_v62  ;;  %v2865_v61 = vcombine.high %v134_v56, %v142_v57  ;;  %v23_v62 = vld [vmem:[%s4703_s0 + $0x30] sm:$0xff] }
  0xad   :  { %2349 = vmatprep.mubr.bf16.mxu1 %v2785_v63  ;;  %3466 = vmatpush3.bf16.msra.mxu0 %v3694_v0  ;;  %v31_v63 = vld [vmem:[%s4703_s0 + $0x70] sm:$0xff]  ;;  %v24_v0 = vld [vmem:[%s4703_s0 + $0x38] sm:$0xff] }
  0xae   :  { %3530 = vmatpush3.bf16.msra.mxu1 %v3696_v1  ;;  %3467 = vmatprep.subr.bf16.mxu0 %v3697_v2  ;;  %v32_v1 = vld [vmem:[%s4703_s0 + $0x78] sm:$0xff]  ;;  %v2862_v2 = vcombine.low %v133_v54, %v141_v55  ;;  %v2755_v4 = vcombine.high %v23_v62, %v31_v63  ;;  %v103_v54 = vld [vmem:[%s4703_s0 + $0x2b0] sm:$0xff] }
  0xaf   :  { %3531 = vmatprep.subr.bf16.mxu1 %v3699_v3  ;;  %v2864_v3 = vcombine.low %v134_v56, %v142_v57  ;;  %v2757_v5 = vcombine.high %v24_v0, %v32_v1  ;;  %v111_v55 = vld [vmem:[%s4703_s0 + $0x2f0] sm:$0xff] }
  0xb1   :  { %3468 = vmatpush3.bf16.msra.mxu0 %v3698_v7  ;;  %v47_v7 = vld [vmem:[%s4703_s0 + $0xf0] sm:$0xff] }
  0xb2   :  { %3532 = vmatpush3.bf16.msra.mxu1 %v3700_v9  ;;  %3469 = vmatprep.subr.bf16.mxu0 %v3701_v10  ;;  %v48_v9 = vld [vmem:[%s4703_s0 + $0xf8] sm:$0xff]  ;;  %v2754_v10 = vcombine.low %v23_v62, %v31_v63 }
  0xb3   :  { %2253 = vmatmul.mubr.bf16.gmra.mrb[72].mxu0 %v2782_v11  ;;  %3533 = vmatprep.subr.bf16.mxu1 %v3703_v12  ;;  %v2756_v11 = vcombine.low %v24_v0, %v32_v1  ;;  %v2771_v12 = vcombine.high %v39_v6, %v47_v7 }
  0xb4   :  { %2350 = vmatmul.mubr.bf16.gmra.mrb[72].mxu1 %v2784_v13  ;;  %2260 = vmatprep.mubr.bf16.mxu0 %v2799_v14  ;;  %v2773_v13 = vcombine.high %v40_v8, %v48_v9  ;;  %v55_v14 = vld [vmem:[%s4703_s0 + $0x130] sm:$0xff] }
  0xb5   :  { %2357 = vmatprep.mubr.bf16.mxu1 %v2801_v15  ;;  %3470 = vmatpush3.bf16.msra.mxu0 %v3702_v16  ;;  %v63_v15 = vld [vmem:[%s4703_s0 + $0x170] sm:$0xff]  ;;  %v56_v16 = vld [vmem:[%s4703_s0 + $0x138] sm:$0xff] }
  0xb6   :  { %3534 = vmatpush3.bf16.msra.mxu1 %v3704_v17  ;;  %3471 = vmatprep.subr.bf16.mxu0 %v3705_v18  ;;  %v64_v17 = vld [vmem:[%s4703_s0 + $0x178] sm:$0xff]  ;;  %v2770_v18 = vcombine.low %v39_v6, %v47_v7  ;;  %v2787_v20 = vcombine.high %v55_v14, %v63_v15 }
  0xb7   :  { %3535 = vmatprep.subr.bf16.mxu1 %v3707_v19  ;;  %v2772_v19 = vcombine.low %v40_v8, %v48_v9  ;;  %v2789_v21 = vcombine.high %v56_v16, %v64_v17 }
  0xb9   :  { %3472 = vmatpush3.bf16.msra.mxu0 %v3706_v23  ;;  %v79_v23 = vld [vmem:[%s4703_s0 + $0x1f0] sm:$0xff] }
  0xba   :  { %3536 = vmatpush3.bf16.msra.mxu1 %v3708_v25  ;;  %3473 = vmatprep.subr.bf16.mxu0 %v3709_v26  ;;  %v80_v25 = vld [vmem:[%s4703_s0 + $0x1f8] sm:$0xff]  ;;  %v2786_v26 = vcombine.low %v55_v14, %v63_v15  ;;  %v119_v14 = vld [vmem:[%s4703_s0 + $0x330] sm:$0xff] }
  0xbb   :  { %2261 = vmatmul.mubr.bf16.gmra.mrb[76].mxu0 %v2798_v27  ;;  %3537 = vmatprep.subr.bf16.mxu1 %v3711_v28  ;;  %v2788_v27 = vcombine.low %v56_v16, %v64_v17  ;;  %v2803_v28 = vcombine.high %v71_v22, %v79_v23  ;;  %v127_v15 = vld [vmem:[%s4703_s0 + $0x370] sm:$0xff] }
  0xbc   :  { %2358 = vmatmul.mubr.bf16.gmra.mrb[76].mxu1 %v2800_v29  ;;  %2268 = vmatprep.mubr.bf16.mxu0 %v2815_v30  ;;  %v2805_v29 = vcombine.high %v72_v24, %v80_v25  ;;  %v87_v30 = vld [vmem:[%s4703_s0 + $0x230] sm:$0xff] }
  0xbd   :  { %2365 = vmatprep.mubr.bf16.mxu1 %v2817_v31  ;;  %3474 = vmatpush3.bf16.msra.mxu0 %v3710_v32  ;;  %v95_v31 = vld [vmem:[%s4703_s0 + $0x270] sm:$0xff] }
  0xbe   :  { %3538 = vmatpush3.bf16.msra.mxu1 %v3712_v33  ;;  %3475 = vmatprep.subr.bf16.mxu0 %v3713_v34  ;;  %v88_v33 = vld [vmem:[%s4703_s0 + $0x238] sm:$0xff]  ;;  %v2818_v62 = vcombine.low %v87_v30, %v95_v31 }
  0xbf   :  { %3539 = vmatprep.subr.bf16.mxu1 %v3715_v35  ;;  %v96_v34 = vld [vmem:[%s4703_s0 + $0x278] sm:$0xff] }
  0xc0   :  { %v2821_v47 = vcombine.high %v88_v33, %v96_v34 }
  0xc1   :  { %3476 = vmatpush3.bf16.msra.mxu0 %v3714_v38  ;;  %v2802_v38 = vcombine.low %v71_v22, %v79_v23  ;;  %v2834_v22 = vcombine.low %v103_v54, %v111_v55 }
  0xc2   :  { %3540 = vmatpush3.bf16.msra.mxu1 %v3716_v41 }
  0xc3   :  { %2269 = vmatmul.mubr.bf16.gmra.mrb[80].mxu0 %v2814_v42  ;;  %v2804_v42 = vcombine.low %v72_v24, %v80_v25 }
  0xc4   :  { %2366 = vmatmul.mubr.bf16.gmra.mrb[80].mxu1 %v2816_v43  ;;  %2276 = vmatprep.mubr.bf16.mxu0 %v2831_v44  ;;  %v2819_v43 = vcombine.high %v87_v30, %v95_v31 }
  0xc5   :  { %2373 = vmatprep.mubr.bf16.mxu1 %v2833_v45 }
  0xcb   :  { %2277 = vmatmul.mubr.bf16.gmra.mrb[84].mxu0 %v2830_v50 }
  0xcc   :  { %2374 = vmatmul.mubr.bf16.gmra.mrb[84].mxu1 %v2832_v51  ;;  %2284 = vmatprep.mubr.bf16.mxu0 %v2847_v52 }
  0xcd   :  { %2381 = vmatprep.mubr.bf16.mxu1 %v2849_v53 }
  0xd3   :  { %2285 = vmatmul.mubr.bf16.gmra.mrb[88].mxu0 %v2846_v58  ;;  %v104_v58 = vld [vmem:[%s4703_s0 + $0x2b8] sm:$0xff] }
  0xd4   :  { %2382 = vmatmul.mubr.bf16.gmra.mrb[88].mxu1 %v2848_v59  ;;  %2292 = vmatprep.mubr.bf16.mxu0 %v2863_v60  ;;  %v112_v59 = vld [vmem:[%s4703_s0 + $0x2f8] sm:$0xff] }
  0xd5   :  { %2389 = vmatprep.mubr.bf16.mxu1 %v2865_v61  ;;  %v2837_v7 = vcombine.high %v104_v58, %v112_v59 }
  0xdb   :  { %2293 = vmatmul.mubr.bf16.gmra.mrb[92].mxu0 %v2862_v2  ;;  %v2820_v2 = vcombine.low %v88_v33, %v96_v34 }
  0xdc   :  { %2390 = vmatmul.mubr.bf16.gmra.mrb[92].mxu1 %v2864_v3  ;;  %2430 = vmatprep.mubr.bf16.mxu0 %v2755_v4  ;;  %v2835_v3 = vcombine.high %v103_v54, %v111_v55 }
  0xdd   :  { %2527 = vmatprep.mubr.bf16.mxu1 %v2757_v5 }
  0xe3   :  { %2431 = vmatmul.mubr.bf16.vlgmr.msra.gmra.mrb[96].mxu0 %v2754_v10 }
  0xe4   :  { %2528 = vmatmul.mubr.bf16.vlgmr.msra.gmra.mrb[96].mxu1 %v2756_v11  ;;  %2438 = vmatprep.mubr.bf16.mxu0 %v2771_v12 }
  0xe5   :  { %2535 = vmatprep.mubr.bf16.mxu1 %v2773_v13 }
  0xeb   :  { %2439 = vmatmul.mubr.bf16.gmra.mrb[100].mxu0 %v2770_v18  ;;  %v120_v18 = vld [vmem:[%s4703_s0 + $0x338] sm:$0xff] }
  0xec   :  { %2536 = vmatmul.mubr.bf16.gmra.mrb[100].mxu1 %v2772_v19  ;;  %2446 = vmatprep.mubr.bf16.mxu0 %v2787_v20  ;;  %v128_v19 = vld [vmem:[%s4703_s0 + $0x378] sm:$0xff] }
  0xed   :  { %2543 = vmatprep.mubr.bf16.mxu1 %v2789_v21  ;;  %v2853_v31 = vcombine.high %v120_v18, %v128_v19 }
  0xf3   :  { %2447 = vmatmul.mubr.bf16.gmra.mrb[104].mxu0 %v2786_v26  ;;  %v2836_v26 = vcombine.low %v104_v58, %v112_v59 }
  0xf4   :  { %2544 = vmatmul.mubr.bf16.gmra.mrb[104].mxu1 %v2788_v27  ;;  %2454 = vmatprep.mubr.bf16.mxu0 %v2803_v28  ;;  %v2851_v27 = vcombine.high %v119_v14, %v127_v15 }
  0xf5   :  { %2551 = vmatprep.mubr.bf16.mxu1 %v2805_v29 }
  0xf6   :  { %v3093_v32 = vpop.f32.mrb[0].mxu0 }
  0xf7   :  { %v3157_v35 = vpop.f32.mrb[0].mxu1  ;;  %v3094_v37 = vpop.f32.mrb[1].mxu0 }
  0xf8   :  { %v3095_v39 = vadd.f32 %v3094_v37, %v3093_v32  ;;  %v3158_v40 = vpop.f32.mrb[1].mxu1  ;;  %v3096_v41 = vpop.f32.mrb[2].mxu0 }
  0xf9   :  { %v3159_v44 = vadd.f32 %v3158_v40, %v3157_v35  ;;  %v3160_v45 = vpop.f32.mrb[2].mxu1  ;;  %v3097_v46 = vpop.f32.mrb[3].mxu0  ;;  %v143_v40 = vld [vmem:[%s4703_s0 + $0x3f0] sm:$0xff] }
  0xfa   :  { %v1851_v48 = vadd.f32 %v3095_v39, %v4477_v36  ;;  %v3098_v49 = vadd.f32 %v3097_v46, %v3096_v41  ;;  %v3161_v50 = vpop.f32.mrb[3].mxu1  ;;  %v135_v39 = vld [vmem:[%s4703_s0 + $0x3b0] sm:$0xff] }
  0xfb   :  { %v3162_v51 = vadd.f32 %v3161_v50, %v3160_v45  ;;  %2455 = vmatmul.mubr.bf16.gmra.mrb[108].mxu0 %v2802_v38 }
  0xfc   :  { %v4480_v52 = vadd.f32 %v3159_v44, %v1851_v48  ;;  %v1854_v53 = vadd.f32 %v3098_v49, %v4477_v36  ;;  %2552 = vmatmul.mubr.bf16.gmra.mrb[108].mxu1 %v2804_v42  ;;  %2462 = vmatprep.mubr.bf16.mxu0 %v2819_v43  ;;  %v136_v43 = vld [vmem:[%s4703_s0 + $0x3b8] sm:$0xff] }
  0xfd   :  { %2559 = vmatprep.mubr.bf16.mxu1 %v2821_v47  ;;  %v144_v44 = vld [vmem:[%s4703_s0 + $0x3f8] sm:$0xff]  ;;  %v2850_v47 = vcombine.low %v119_v14, %v127_v15 }
  0xfe   :  { %v4489_v56 = vadd.f32 %v3162_v51, %v1854_v53  ;;  %v3099_v57 = vpop.f32.mrb[4].mxu0  ;;  %v2852_v51 = vcombine.low %v120_v18, %v128_v19  ;;  %v2867_v53 = vcombine.high %v135_v39, %v143_v40  ;;  %v2869_v58 = vcombine.high %v136_v43, %v144_v44 }
  0xff   :  { %v3163_v60 = vpop.f32.mrb[4].mxu1  ;;  %v3100_v61 = vpop.f32.mrb[5].mxu0 }
 0x100   :  { %v3101_v63 = vadd.f32 %v3100_v61, %v3099_v57  ;;  %v3164_v0 = vpop.f32.mrb[5].mxu1  ;;  %v3102_v1 = vpop.f32.mrb[6].mxu0 }
 0x101   :  { %v3165_v4 = vadd.f32 %v3164_v0, %v3163_v60  ;;  %v3166_v5 = vpop.f32.mrb[6].mxu1  ;;  %v3103_v6 = vpop.f32.mrb[7].mxu0 }
 0x102   :  { %v1859_v8 = vadd.f32 %v3101_v63, %v4477_v36  ;;  %v3104_v9 = vadd.f32 %v3103_v6, %v3102_v1  ;;  %v3167_v10 = vpop.f32.mrb[7].mxu1 }
 0x103   :  { %v3168_v11 = vadd.f32 %v3167_v10, %v3166_v5  ;;  %2463 = vmatmul.mubr.bf16.gmra.mrb[112].mxu0 %v2818_v62  ;;  %v2866_v5 = vcombine.low %v135_v39, %v143_v40 }
 0x104   :  { %v4498_v12 = vadd.f32 %v3165_v4, %v1859_v8  ;;  %v1862_v13 = vadd.f32 %v3104_v9, %v4477_v36  ;;  %2560 = vmatmul.mubr.bf16.gmra.mrb[112].mxu1 %v2820_v2  ;;  %2470 = vmatprep.mubr.bf16.mxu0 %v2835_v3  ;;  %v2868_v9 = vcombine.low %v136_v43, %v144_v44 }
 0x105   :  { %2567 = vmatprep.mubr.bf16.mxu1 %v2837_v7 }
 0x106   :  { %v4507_v16 = vadd.f32 %v3168_v11, %v1862_v13  ;;  %v3105_v17 = vpop.f32.mrb[8].mxu0 }
 0x107   :  { %v3169_v20 = vpop.f32.mrb[8].mxu1  ;;  %v3106_v21 = vpop.f32.mrb[9].mxu0 }
 0x108   :  { %v3107_v23 = vadd.f32 %v3106_v21, %v3105_v17  ;;  %v3170_v24 = vpop.f32.mrb[9].mxu1  ;;  %v3108_v25 = vpop.f32.mrb[10].mxu0 }
 0x109   :  { %v3171_v28 = vadd.f32 %v3170_v24, %v3169_v20  ;;  %v3172_v29 = vpop.f32.mrb[10].mxu1  ;;  %v3109_v30 = vpop.f32.mrb[11].mxu0 }
 0x10a   :  { %v1867_v32 = vadd.f32 %v3107_v23, %v4477_v36  ;;  %v3110_v33 = vadd.f32 %v3109_v30, %v3108_v25  ;;  %v3173_v34 = vpop.f32.mrb[11].mxu1 }
 0x10b   :  { %v3174_v35 = vadd.f32 %v3173_v34, %v3172_v29  ;;  %2471 = vmatmul.mubr.bf16.gmra.mrb[116].mxu0 %v2834_v22 }
 0x10c   :  { %v4516_v37 = vadd.f32 %v3171_v28, %v1867_v32  ;;  %v1870_v38 = vadd.f32 %v3110_v33, %v4477_v36  ;;  %2568 = vmatmul.mubr.bf16.gmra.mrb[116].mxu1 %v2836_v26  ;;  %2478 = vmatprep.mubr.bf16.mxu0 %v2851_v27 }
 0x10d   :  { %2575 = vmatprep.mubr.bf16.mxu1 %v2853_v31 }
 0x10e   :  { %v4525_v41 = vadd.f32 %v3174_v35, %v1870_v38  ;;  %v3111_v42 = vpop.f32.mrb[12].mxu0 }
 0x10f   :  { %v3175_v45 = vpop.f32.mrb[12].mxu1  ;;  %v3112_v46 = vpop.f32.mrb[13].mxu0 }
 0x110   :  { %v3113_v48 = vadd.f32 %v3112_v46, %v3111_v42  ;;  %v3176_v49 = vpop.f32.mrb[13].mxu1  ;;  %v3114_v50 = vpop.f32.mrb[14].mxu0 }
 0x111   :  { %v3177_v54 = vadd.f32 %v3176_v49, %v3175_v45  ;;  %v3178_v55 = vpop.f32.mrb[14].mxu1  ;;  %v3115_v57 = vpop.f32.mrb[15].mxu0 }
 0x112   :  { %v1875_v59 = vadd.f32 %v3113_v48, %v4477_v36  ;;  %v3116_v60 = vadd.f32 %v3115_v57, %v3114_v50  ;;  %v3179_v61 = vpop.f32.mrb[15].mxu1 }
 0x113   :  { %v3180_v62 = vadd.f32 %v3179_v61, %v3178_v55  ;;  %2479 = vmatmul.mubr.bf16.gmra.mrb[120].mxu0 %v2850_v47 }
 0x114   :  { %v4534_v63 = vadd.f32 %v3177_v54, %v1875_v59  ;;  %v1878_v0 = vadd.f32 %v3116_v60, %v4477_v36  ;;  %2576 = vmatmul.mubr.bf16.gmra.mrb[120].mxu1 %v2852_v51  ;;  %2486 = vmatprep.mubr.bf16.mxu0 %v2867_v53 }
 0x115   :  { %2583 = vmatprep.mubr.bf16.mxu1 %v2869_v58 }
 0x116   :  { %v4537_v1 = vadd.f32 %v3180_v62, %v1878_v0  ;;  %v3117_v2 = vpop.f32.mrb[16].mxu0 }
 0x117   :  { %v3181_v3 = vpop.f32.mrb[16].mxu1  ;;  %v3118_v4 = vpop.f32.mrb[17].mxu0 }
 0x118   :  { %v3119_v6 = vadd.f32 %v3118_v4, %v3117_v2  ;;  %v3182_v7 = vpop.f32.mrb[17].mxu1  ;;  %v3120_v8 = vpop.f32.mrb[18].mxu0 }
 0x119   :  { %v3183_v10 = vadd.f32 %v3182_v7, %v3181_v3  ;;  %v3184_v11 = vpop.f32.mrb[18].mxu1  ;;  %v3121_v13 = vpop.f32.mrb[19].mxu0 }
 0x11a   :  { %v1883_v14 = vadd.f32 %v3119_v6, %v4477_v36  ;;  %v3122_v15 = vadd.f32 %v3121_v13, %v3120_v8  ;;  %v3185_v17 = vpop.f32.mrb[19].mxu1 }
 0x11b   :  { %v3186_v18 = vadd.f32 %v3185_v17, %v3184_v11  ;;  %2487 = vmatmul.mubr.bf16.gmra.mrb[124].mxu0 %v2866_v5 }
 0x11c   :  { %v4540_v19 = vadd.f32 %v3183_v10, %v1883_v14  ;;  %v1886_v20 = vadd.f32 %v3122_v15, %v4477_v36  ;;  %2584 = vmatmul.mubr.bf16.gmra.mrb[124].mxu1 %v2868_v9 }
 0x11e   :  { %v4543_v21 = vadd.f32 %v3186_v18, %v1886_v20  ;;  %v3123_v22 = vpop.f32.mrb[20].mxu0 }
 0x11f   :  { %v3187_v23 = vpop.f32.mrb[20].mxu1  ;;  %v3124_v24 = vpop.f32.mrb[21].mxu0 }
 0x120   :  { %v3125_v25 = vadd.f32 %v3124_v24, %v3123_v22  ;;  %v3188_v26 = vpop.f32.mrb[21].mxu1  ;;  %v3126_v27 = vpop.f32.mrb[22].mxu0 }
 0x121   :  { %v3189_v28 = vadd.f32 %v3188_v26, %v3187_v23  ;;  %v3190_v29 = vpop.f32.mrb[22].mxu1  ;;  %v3127_v30 = vpop.f32.mrb[23].mxu0 }
 0x122   :  { %v1891_v31 = vadd.f32 %v3125_v25, %v4477_v36  ;;  %v3128_v32 = vadd.f32 %v3127_v30, %v3126_v27  ;;  %v3191_v33 = vpop.f32.mrb[23].mxu1 }
 0x123   :  { %v3192_v34 = vadd.f32 %v3191_v33, %v3190_v29 }
 0x124   :  { %v4546_v35 = vadd.f32 %v3189_v28, %v1891_v31  ;;  %v1894_v38 = vadd.f32 %v3128_v32, %v4477_v36 }
 0x126   :  { %v4549_v39 = vadd.f32 %v3192_v34, %v1894_v38  ;;  %v3129_v40 = vpop.f32.mrb[24].mxu0 }
 0x127   :  { %v3193_v42 = vpop.f32.mrb[24].mxu1  ;;  %v3130_v43 = vpop.f32.mrb[25].mxu0 }
 0x128   :  { %v3131_v44 = vadd.f32 %v3130_v43, %v3129_v40  ;;  %v3194_v45 = vpop.f32.mrb[25].mxu1  ;;  %v3132_v46 = vpop.f32.mrb[26].mxu0 }
 0x129   :  { %v3195_v47 = vadd.f32 %v3194_v45, %v3193_v42  ;;  %v3196_v48 = vpop.f32.mrb[26].mxu1  ;;  %v3133_v49 = vpop.f32.mrb[27].mxu0 }
 0x12a   :  { %v1899_v50 = vadd.f32 %v3131_v44, %v4477_v36  ;;  %v3134_v51 = vadd.f32 %v3133_v49, %v3132_v46  ;;  %v3197_v53 = vpop.f32.mrb[27].mxu1 }
 0x12b   :  { %v3198_v54 = vadd.f32 %v3197_v53, %v3196_v48 }
 0x12c   :  { %v4552_v55 = vadd.f32 %v3195_v47, %v1899_v50  ;;  %v1902_v57 = vadd.f32 %v3134_v51, %v4477_v36 }
 0x12e   :  { %v4555_v58 = vadd.f32 %v3198_v54, %v1902_v57  ;;  %v3135_v59 = vpop.f32.mrb[28].mxu0 }
 0x12f   :  { %v3199_v60 = vpop.f32.mrb[28].mxu1  ;;  %v3136_v61 = vpop.f32.mrb[29].mxu0 }
 0x130   :  { %v3137_v62 = vadd.f32 %v3136_v61, %v3135_v59  ;;  %v3200_v0 = vpop.f32.mrb[29].mxu1  ;;  %v3138_v2 = vpop.f32.mrb[30].mxu0 }
 0x131   :  { %v3201_v3 = vadd.f32 %v3200_v0, %v3199_v60  ;;  %v3202_v4 = vpop.f32.mrb[30].mxu1  ;;  %v3139_v5 = vpop.f32.mrb[31].mxu0 }
 0x132   :  { %v1907_v6 = vadd.f32 %v3137_v62, %v4477_v36  ;;  %v3140_v7 = vadd.f32 %v3139_v5, %v3138_v2  ;;  %v3203_v8 = vpop.f32.mrb[31].mxu1 }
 0x133   :  { %v3204_v9 = vadd.f32 %v3203_v8, %v3202_v4 }
 0x134   :  { %v4558_v10 = vadd.f32 %v3201_v3, %v1907_v6  ;;  %v1910_v11 = vadd.f32 %v3140_v7, %v4477_v36 }
 0x136   :  { %v4561_v13 = vadd.f32 %v3204_v9, %v1910_v11  ;;  %v3221_v14 = vpop.f32.mrb[32].mxu0 }
 0x137   :  { %v3285_v15 = vpop.f32.mrb[32].mxu1  ;;  %v3222_v17 = vpop.f32.mrb[33].mxu0 }
 0x138   :  { %v3223_v18 = vadd.f32 %v3222_v17, %v3221_v14  ;;  %v3286_v20 = vpop.f32.mrb[33].mxu1  ;;  %v3224_v22 = vpop.f32.mrb[34].mxu0 }
 0x139   :  { %v3287_v23 = vadd.f32 %v3286_v20, %v3285_v15  ;;  %v3288_v24 = vpop.f32.mrb[34].mxu1  ;;  %v3225_v25 = vpop.f32.mrb[35].mxu0 }
 0x13a   :  { %v2045_v26 = vadd.f32 %v3223_v18, %v4480_v52  ;;  %v3226_v27 = vadd.f32 %v3225_v25, %v3224_v22  ;;  %v3289_v28 = vpop.f32.mrb[35].mxu1 }
 0x13b   :  { %v3290_v29 = vadd.f32 %v3289_v28, %v3288_v24 }
 0x13c   :  { %v4564_v30 = vadd.f32 %v3287_v23, %v2045_v26  ;;  %v2048_v36 = vadd.f32 %v3226_v27, %v4489_v56 }
 0x13e   :  { %v4567_v31 = vadd.f32 %v3290_v29, %v2048_v36  ;;  %v3227_v32 = vpop.f32.mrb[36].mxu0 }
 0x13f   :  { %v3291_v33 = vpop.f32.mrb[36].mxu1  ;;  %v3228_v34 = vpop.f32.mrb[37].mxu0 }
 0x140   :  { %v3229_v38 = vadd.f32 %v3228_v34, %v3227_v32  ;;  %v3292_v40 = vpop.f32.mrb[37].mxu1  ;;  %v3230_v42 = vpop.f32.mrb[38].mxu0 }
 0x141   :  { %v3293_v43 = vadd.f32 %v3292_v40, %v3291_v33  ;;  %v3294_v44 = vpop.f32.mrb[38].mxu1  ;;  %v3231_v45 = vpop.f32.mrb[39].mxu0 }
 0x142   :  { %v2053_v52 = vadd.f32 %v3229_v38, %v4498_v12  ;;  %v3232_v46 = vadd.f32 %v3231_v45, %v3230_v42  ;;  %v3295_v47 = vpop.f32.mrb[39].mxu1 }
 0x143   :  { %v3296_v48 = vadd.f32 %v3295_v47, %v3294_v44 }
 0x144   :  { %v4570_v49 = vadd.f32 %v3293_v43, %v2053_v52  ;;  %v2056_v56 = vadd.f32 %v3232_v46, %v4507_v16 }
 0x146   :  { %v4573_v50 = vadd.f32 %v3296_v48, %v2056_v56  ;;  %v3233_v51 = vpop.f32.mrb[40].mxu0 }
 0x147   :  { %v3297_v53 = vpop.f32.mrb[40].mxu1  ;;  %v3234_v54 = vpop.f32.mrb[41].mxu0 }
 0x148   :  { %v3235_v57 = vadd.f32 %v3234_v54, %v3233_v51  ;;  %v3298_v59 = vpop.f32.mrb[41].mxu1  ;;  %v3236_v60 = vpop.f32.mrb[42].mxu0 }
 0x149   :  { %v3299_v61 = vadd.f32 %v3298_v59, %v3297_v53  ;;  %v3300_v62 = vpop.f32.mrb[42].mxu1  ;;  %v3237_v0 = vpop.f32.mrb[43].mxu0 }
 0x14a   :  { %v2061_v12 = vadd.f32 %v3235_v57, %v4516_v37  ;;  %v3238_v2 = vadd.f32 %v3237_v0, %v3236_v60  ;;  %v3301_v3 = vpop.f32.mrb[43].mxu1 }
 0x14b   :  { %v3302_v4 = vadd.f32 %v3301_v3, %v3300_v62 }
 0x14c   :  { %v4576_v5 = vadd.f32 %v3299_v61, %v2061_v12  ;;  %v2064_v16 = vadd.f32 %v3238_v2, %v4525_v41 }
 0x14e   :  { %v4579_v6 = vadd.f32 %v3302_v4, %v2064_v16  ;;  %v3239_v7 = vpop.f32.mrb[44].mxu0 }
 0x14f   :  { %v3303_v8 = vpop.f32.mrb[44].mxu1  ;;  %v3240_v9 = vpop.f32.mrb[45].mxu0 }
 0x150   :  { %v3241_v11 = vadd.f32 %v3240_v9, %v3239_v7  ;;  %v3304_v14 = vpop.f32.mrb[45].mxu1  ;;  %v3242_v15 = vpop.f32.mrb[46].mxu0 }
 0x151   :  { %v3305_v17 = vadd.f32 %v3304_v14, %v3303_v8  ;;  %v3306_v18 = vpop.f32.mrb[46].mxu1  ;;  %v3243_v20 = vpop.f32.mrb[47].mxu0 }
 0x152   :  { %v2069_v37 = vadd.f32 %v3241_v11, %v4534_v63  ;;  %v3244_v22 = vadd.f32 %v3243_v20, %v3242_v15  ;;  %v3307_v23 = vpop.f32.mrb[47].mxu1 }
 0x153   :  { %v3308_v24 = vadd.f32 %v3307_v23, %v3306_v18 }
 0x154   :  { %v4582_v25 = vadd.f32 %v3305_v17, %v2069_v37  ;;  %v2072_v41 = vadd.f32 %v3244_v22, %v4537_v1 }
 0x156   :  { %v4585_v26 = vadd.f32 %v3308_v24, %v2072_v41  ;;  %v3245_v27 = vpop.f32.mrb[48].mxu0 }
 0x157   :  { %v3309_v28 = vpop.f32.mrb[48].mxu1  ;;  %v3246_v29 = vpop.f32.mrb[49].mxu0 }
 0x158   :  { %v3247_v36 = vadd.f32 %v3246_v29, %v3245_v27  ;;  %v3310_v32 = vpop.f32.mrb[49].mxu1  ;;  %v3248_v33 = vpop.f32.mrb[50].mxu0 }
 0x159   :  { %v3311_v34 = vadd.f32 %v3310_v32, %v3309_v28  ;;  %v3312_v38 = vpop.f32.mrb[50].mxu1  ;;  %v3249_v40 = vpop.f32.mrb[51].mxu0 }
 0x15a   :  { %v2077_v63 = vadd.f32 %v3247_v36, %v4540_v19  ;;  %v3250_v42 = vadd.f32 %v3249_v40, %v3248_v33  ;;  %v3313_v43 = vpop.f32.mrb[51].mxu1 }
 0x15b   :  { %v3314_v44 = vadd.f32 %v3313_v43, %v3312_v38 }
 0x15c   :  { %v4588_v45 = vadd.f32 %v3311_v34, %v2077_v63  ;;  %v2080_v1 = vadd.f32 %v3250_v42, %v4543_v21 }
 0x15e   :  { %v4591_v52 = vadd.f32 %v3314_v44, %v2080_v1  ;;  %v3251_v46 = vpop.f32.mrb[52].mxu0 }
 0x15f   :  { %v3315_v47 = vpop.f32.mrb[52].mxu1  ;;  %v3252_v48 = vpop.f32.mrb[53].mxu0 }
 0x160   :  { %v3253_v56 = vadd.f32 %v3252_v48, %v3251_v46  ;;  %v3316_v51 = vpop.f32.mrb[53].mxu1  ;;  %v3254_v53 = vpop.f32.mrb[54].mxu0 }
 0x161   :  { %v3317_v54 = vadd.f32 %v3316_v51, %v3315_v47  ;;  %v3318_v57 = vpop.f32.mrb[54].mxu1  ;;  %v3255_v59 = vpop.f32.mrb[55].mxu0 }
 0x162   :  { %v2085_v19 = vadd.f32 %v3253_v56, %v4546_v35  ;;  %v3256_v60 = vadd.f32 %v3255_v59, %v3254_v53  ;;  %v3319_v61 = vpop.f32.mrb[55].mxu1 }
 0x163   :  { %v3320_v62 = vadd.f32 %v3319_v61, %v3318_v57 }
 0x164   :  { %v4594_v0 = vadd.f32 %v3317_v54, %v2085_v19  ;;  %v2088_v21 = vadd.f32 %v3256_v60, %v4549_v39 }
 0x166   :  { %v4597_v12 = vadd.f32 %v3320_v62, %v2088_v21  ;;  %v3257_v2 = vpop.f32.mrb[56].mxu0 }
 0x167   :  { %v3321_v3 = vpop.f32.mrb[56].mxu1  ;;  %v3258_v4 = vpop.f32.mrb[57].mxu0 }
 0x168   :  { %v3259_v16 = vadd.f32 %v3258_v4, %v3257_v2  ;;  %v3322_v7 = vpop.f32.mrb[57].mxu1  ;;  %v3260_v8 = vpop.f32.mrb[58].mxu0 }
 0x169   :  { %v3323_v9 = vadd.f32 %v3322_v7, %v3321_v3  ;;  %v3324_v11 = vpop.f32.mrb[58].mxu1  ;;  %v3261_v14 = vpop.f32.mrb[59].mxu0 }
 0x16a   :  { %v2093_v35 = vadd.f32 %v3259_v16, %v4552_v55  ;;  %v3262_v15 = vadd.f32 %v3261_v14, %v3260_v8  ;;  %v3325_v17 = vpop.f32.mrb[59].mxu1 }
 0x16b   :  { %v3326_v18 = vadd.f32 %v3325_v17, %v3324_v11 }
 0x16c   :  { %v4600_v20 = vadd.f32 %v3323_v9, %v2093_v35  ;;  %v2096_v39 = vadd.f32 %v3262_v15, %v4555_v58 }
 0x16e   :  { %v4603_v37 = vadd.f32 %v3326_v18, %v2096_v39  ;;  %v3263_v22 = vpop.f32.mrb[60].mxu0 }
 0x16f   :  { %v3327_v23 = vpop.f32.mrb[60].mxu1  ;;  %v3264_v24 = vpop.f32.mrb[61].mxu0 }
 0x170   :  { %v3265_v41 = vadd.f32 %v3264_v24, %v3263_v22  ;;  %v3328_v27 = vpop.f32.mrb[61].mxu1  ;;  %v3266_v28 = vpop.f32.mrb[62].mxu0 }
 0x171   :  { %v3329_v29 = vadd.f32 %v3328_v27, %v3327_v23  ;;  %v3330_v36 = vpop.f32.mrb[62].mxu1  ;;  %v3267_v32 = vpop.f32.mrb[63].mxu0 }
 0x172   :  { %v2101_v55 = vadd.f32 %v3265_v41, %v4558_v10  ;;  %v3268_v33 = vadd.f32 %v3267_v32, %v3266_v28  ;;  %v3331_v34 = vpop.f32.mrb[63].mxu1 }
 0x173   :  { %v3332_v38 = vadd.f32 %v3331_v34, %v3330_v36 }
 0x174   :  { %v4606_v40 = vadd.f32 %v3329_v29, %v2101_v55  ;;  %v2104_v58 = vadd.f32 %v3268_v33, %v4561_v13 }
 0x176   :  { %v4609_v63 = vadd.f32 %v3332_v38, %v2104_v58  ;;  %v3349_v42 = vpop.f32.mrb[64].mxu0 }
 0x177   :  { %v3413_v43 = vpop.f32.mrb[64].mxu1  ;;  %v3350_v44 = vpop.f32.mrb[65].mxu0 }
 0x178   :  { %v3351_v1 = vadd.f32 %v3350_v44, %v3349_v42  ;;  %v3414_v46 = vpop.f32.mrb[65].mxu1  ;;  %v3352_v47 = vpop.f32.mrb[66].mxu0 }
 0x179   :  { %v3415_v48 = vadd.f32 %v3414_v46, %v3413_v43  ;;  %v3416_v56 = vpop.f32.mrb[66].mxu1  ;;  %v3353_v51 = vpop.f32.mrb[67].mxu0 }
 0x17a   :  { %v2239_v10 = vadd.f32 %v3351_v1, %v4564_v30  ;;  %v3354_v53 = vadd.f32 %v3353_v51, %v3352_v47  ;;  %v3417_v54 = vpop.f32.mrb[67].mxu1 }
 0x17b   :  { %v3418_v57 = vadd.f32 %v3417_v54, %v3416_v56 }
 0x17c   :  { %v4612_v59 = vadd.f32 %v3415_v48, %v2239_v10  ;;  %v2242_v13 = vadd.f32 %v3354_v53, %v4567_v31 }
 0x17e   :  { %v4615_v19 = vadd.f32 %v3418_v57, %v2242_v13  ;;  %v3355_v60 = vpop.f32.mrb[68].mxu0 }
 0x17f   :  { %v3419_v61 = vpop.f32.mrb[68].mxu1  ;;  %v3356_v62 = vpop.f32.mrb[69].mxu0 }
 0x180   :  { %v3357_v21 = vadd.f32 %v3356_v62, %v3355_v60  ;;  %v3420_v2 = vpop.f32.mrb[69].mxu1  ;;  %v3358_v3 = vpop.f32.mrb[70].mxu0 }
 0x181   :  { %v3421_v4 = vadd.f32 %v3420_v2, %v3419_v61  ;;  %v3422_v16 = vpop.f32.mrb[70].mxu1  ;;  %v3359_v7 = vpop.f32.mrb[71].mxu0 }
 0x182   :  { %v2247_v30 = vadd.f32 %v3357_v21, %v4570_v49  ;;  %v3360_v8 = vadd.f32 %v3359_v7, %v3358_v3  ;;  %v3423_v9 = vpop.f32.mrb[71].mxu1 }
 0x183   :  { %v3424_v11 = vadd.f32 %v3423_v9, %v3422_v16 }
 0x184   :  { %v4618_v14 = vadd.f32 %v3421_v4, %v2247_v30  ;;  %v2250_v31 = vadd.f32 %v3360_v8, %v4573_v50 }
 0x186   :  { %v4621_v35 = vadd.f32 %v3424_v11, %v2250_v31  ;;  %v3361_v15 = vpop.f32.mrb[72].mxu0 }
 0x187   :  { %v3425_v17 = vpop.f32.mrb[72].mxu1  ;;  %v3362_v18 = vpop.f32.mrb[73].mxu0 }
 0x188   :  { %v3363_v39 = vadd.f32 %v3362_v18, %v3361_v15  ;;  %v3426_v22 = vpop.f32.mrb[73].mxu1  ;;  %v3364_v23 = vpop.f32.mrb[74].mxu0 }
 0x189   :  { %v3427_v24 = vadd.f32 %v3426_v22, %v3425_v17  ;;  %v3428_v41 = vpop.f32.mrb[74].mxu1  ;;  %v3365_v27 = vpop.f32.mrb[75].mxu0 }
 0x18a   :  { %v2255_v49 = vadd.f32 %v3363_v39, %v4576_v5  ;;  %v3366_v28 = vadd.f32 %v3365_v27, %v3364_v23  ;;  %v3429_v29 = vpop.f32.mrb[75].mxu1 }
 0x18b   :  { %v3430_v36 = vadd.f32 %v3429_v29, %v3428_v41 }
 0x18c   :  { %v4624_v32 = vadd.f32 %v3427_v24, %v2255_v49  ;;  %v2258_v50 = vadd.f32 %v3366_v28, %v4579_v6 }
 0x18e   :  { %v4627_v55 = vadd.f32 %v3430_v36, %v2258_v50  ;;  %v3367_v33 = vpop.f32.mrb[76].mxu0 }
 0x18f   :  { %v3431_v34 = vpop.f32.mrb[76].mxu1  ;;  %v3368_v38 = vpop.f32.mrb[77].mxu0 }
 0x190   :  { %v3369_v58 = vadd.f32 %v3368_v38, %v3367_v33  ;;  %v3432_v42 = vpop.f32.mrb[77].mxu1  ;;  %v3370_v43 = vpop.f32.mrb[78].mxu0 }
 0x191   :  { %v3433_v44 = vadd.f32 %v3432_v42, %v3431_v34  ;;  %v3434_v1 = vpop.f32.mrb[78].mxu1  ;;  %v3371_v46 = vpop.f32.mrb[79].mxu0 }
 0x192   :  { %v2263_v5 = vadd.f32 %v3369_v58, %v4582_v25  ;;  %v3372_v47 = vadd.f32 %v3371_v46, %v3370_v43  ;;  %v3435_v48 = vpop.f32.mrb[79].mxu1 }
 0x193   :  { %v3436_v56 = vadd.f32 %v3435_v48, %v3434_v1 }
 0x194   :  { %v4630_v51 = vadd.f32 %v3433_v44, %v2263_v5  ;;  %v2266_v6 = vadd.f32 %v3372_v47, %v4585_v26 }
 0x196   :  { %v4633_v10 = vadd.f32 %v3436_v56, %v2266_v6  ;;  %v3373_v53 = vpop.f32.mrb[80].mxu0 }
 0x197   :  { %v3437_v54 = vpop.f32.mrb[80].mxu1  ;;  %v3374_v57 = vpop.f32.mrb[81].mxu0 }
 0x198   :  { %v3375_v13 = vadd.f32 %v3374_v57, %v3373_v53  ;;  %v3438_v60 = vpop.f32.mrb[81].mxu1  ;;  %v3376_v61 = vpop.f32.mrb[82].mxu0 }
 0x199   :  { %v3439_v62 = vadd.f32 %v3438_v60, %v3437_v54  ;;  %v3440_v21 = vpop.f32.mrb[82].mxu1  ;;  %v3377_v2 = vpop.f32.mrb[83].mxu0 }
 0x19a   :  { %v2271_v25 = vadd.f32 %v3375_v13, %v4588_v45  ;;  %v3378_v3 = vadd.f32 %v3377_v2, %v3376_v61  ;;  %v3441_v4 = vpop.f32.mrb[83].mxu1 }
 0x19b   :  { %v3442_v16 = vadd.f32 %v3441_v4, %v3440_v21 }
 0x19c   :  { %v4636_v7 = vadd.f32 %v3439_v62, %v2271_v25  ;;  %v2274_v26 = vadd.f32 %v3378_v3, %v4591_v52 }
 0x19e   :  { %v4639_v30 = vadd.f32 %v3442_v16, %v2274_v26  ;;  %v3379_v8 = vpop.f32.mrb[84].mxu0 }
 0x19f   :  { %v3443_v9 = vpop.f32.mrb[84].mxu1  ;;  %v3380_v11 = vpop.f32.mrb[85].mxu0 }
 0x1a0   :  { %v3381_v31 = vadd.f32 %v3380_v11, %v3379_v8  ;;  %v3444_v15 = vpop.f32.mrb[85].mxu1  ;;  %v3382_v17 = vpop.f32.mrb[86].mxu0 }
 0x1a1   :  { %v3445_v18 = vadd.f32 %v3444_v15, %v3443_v9  ;;  %v3446_v39 = vpop.f32.mrb[86].mxu1  ;;  %v3383_v22 = vpop.f32.mrb[87].mxu0 }
 0x1a2   :  { %v2279_v45 = vadd.f32 %v3381_v31, %v4594_v0  ;;  %v3384_v23 = vadd.f32 %v3383_v22, %v3382_v17  ;;  %v3447_v24 = vpop.f32.mrb[87].mxu1 }
 0x1a3   :  { %v3448_v41 = vadd.f32 %v3447_v24, %v3446_v39 }
 0x1a4   :  { %v4642_v27 = vadd.f32 %v3445_v18, %v2279_v45  ;;  %v2282_v52 = vadd.f32 %v3384_v23, %v4597_v12 }
 0x1a6   :  { %v4645_v49 = vadd.f32 %v3448_v41, %v2282_v52  ;;  %v3385_v28 = vpop.f32.mrb[88].mxu0 }
 0x1a7   :  { %v3449_v29 = vpop.f32.mrb[88].mxu1  ;;  %v3386_v36 = vpop.f32.mrb[89].mxu0 }
 0x1a8   :  { %v3387_v50 = vadd.f32 %v3386_v36, %v3385_v28  ;;  %v3450_v33 = vpop.f32.mrb[89].mxu1  ;;  %v3388_v34 = vpop.f32.mrb[90].mxu0 }
 0x1a9   :  { %v3451_v38 = vadd.f32 %v3450_v33, %v3449_v29  ;;  %v3452_v58 = vpop.f32.mrb[90].mxu1  ;;  %v3389_v42 = vpop.f32.mrb[91].mxu0 }
 0x1aa   :  { %v2287_v0 = vadd.f32 %v3387_v50, %v4600_v20  ;;  %v3390_v43 = vadd.f32 %v3389_v42, %v3388_v34  ;;  %v3453_v44 = vpop.f32.mrb[91].mxu1 }
 0x1ab   :  { %v3454_v1 = vadd.f32 %v3453_v44, %v3452_v58 }
 0x1ac   :  { %v4648_v46 = vadd.f32 %v3451_v38, %v2287_v0  ;;  %v2290_v12 = vadd.f32 %v3390_v43, %v4603_v37 }
 0x1ae   :  { %v4651_v5 = vadd.f32 %v3454_v1, %v2290_v12  ;;  %v3391_v47 = vpop.f32.mrb[92].mxu0 }
 0x1af   :  { %v3455_v48 = vpop.f32.mrb[92].mxu1  ;;  %v3392_v56 = vpop.f32.mrb[93].mxu0 }
 0x1b0   :  { %v3393_v6 = vadd.f32 %v3392_v56, %v3391_v47  ;;  %v3456_v53 = vpop.f32.mrb[93].mxu1  ;;  %v3394_v54 = vpop.f32.mrb[94].mxu0 }
 0x1b1   :  { %v3457_v57 = vadd.f32 %v3456_v53, %v3455_v48  ;;  %v3458_v13 = vpop.f32.mrb[94].mxu1  ;;  %v3395_v60 = vpop.f32.mrb[95].mxu0 }
 0x1b2   :  { %v2295_v20 = vadd.f32 %v3393_v6, %v4606_v40  ;;  %v3396_v61 = vadd.f32 %v3395_v60, %v3394_v54  ;;  %v3459_v62 = vpop.f32.mrb[95].mxu1 }
 0x1b3   :  { %v3460_v21 = vadd.f32 %v3459_v62, %v3458_v13 }
 0x1b4   :  { %v4654_v2 = vadd.f32 %v3457_v57, %v2295_v20  ;;  %v2298_v37 = vadd.f32 %v3396_v61, %v4609_v63 }
 0x1b6   :  { %v4657_v25 = vadd.f32 %v3460_v21, %v2298_v37  ;;  %v3477_v3 = vpop.f32.mrb[96].mxu0 }
 0x1b7   :  { %v3541_v4 = vpop.f32.mrb[96].mxu1  ;;  %v3478_v16 = vpop.f32.mrb[97].mxu0 }
 0x1b8   :  { %v3479_v26 = vadd.f32 %v3478_v16, %v3477_v3  ;;  %v3542_v8 = vpop.f32.mrb[97].mxu1  ;;  %v3480_v9 = vpop.f32.mrb[98].mxu0 }
 0x1b9   :  { %v3543_v11 = vadd.f32 %v3542_v8, %v3541_v4  ;;  %v3544_v31 = vpop.f32.mrb[98].mxu1  ;;  %v3481_v15 = vpop.f32.mrb[99].mxu0 }
 0x1ba   :  { %v2433_v40 = vadd.f32 %v3479_v26, %v4612_v59  ;;  %v3482_v17 = vadd.f32 %v3481_v15, %v3480_v9  ;;  %v3545_v18 = vpop.f32.mrb[99].mxu1 }
 0x1bb   :  { %v3546_v39 = vadd.f32 %v3545_v18, %v3544_v31 }
 0x1bc   :  { %v2530_v22 = vadd.f32 %v3543_v11, %v2433_v40  ;;  %v2436_v45 = vadd.f32 %v3482_v17, %v4615_v19 }
 0x1be   :  { %v2533_v63 = vadd.f32 %v3546_v39, %v2436_v45  ;;  %v3483_v23 = vpop.f32.mrb[100].mxu0  ;;  %v2693_v24 = vmul.f32 %v2530_v22, %v2530_v22 }
 0x1bf   :  { %v3547_v41 = vpop.f32.mrb[100].mxu1  ;;  %v3484_v52 = vpop.f32.mrb[101].mxu0 }
 0x1c0   :  { %v3033_v28 = vpack.c.bf16 %v2533_v63, %v2530_v22  ;;  %v2672_v29 = vadd.f32 %v2533_v63, %v2530_v22  ;;  %v2694_v36 = vmul.f32 %v2533_v63, %v2533_v63  ;;  %v3485_v50 = vadd.f32 %v3484_v52, %v3483_v23  ;;  %v3548_v33 = vpop.f32.mrb[101].mxu1  ;;  %v3486_v34 = vpop.f32.mrb[102].mxu0 }
 0x1c1   :  { %v3549_v38 = vadd.f32 %v3548_v33, %v3547_v41  ;;  %v3550_v58 = vpop.f32.mrb[102].mxu1  ;;  %v3487_v59 = vpop.f32.mrb[103].mxu0 }
 0x1c2   :  { %3034 = vst [vmem:[%s4705_s3] sm:$0xff] %v3033_v28   ;;  %v2709_v42 = vadd.f32 %v2694_v36, %v2693_v24  ;;  %v2441_v19 = vadd.f32 %v3485_v50, %v4618_v14  ;;  %v3488_v0 = vadd.f32 %v3487_v59, %v3486_v34  ;;  %v3551_v43 = vpop.f32.mrb[103].mxu1 }
 0x1c3   :  { %v3552_v44 = vadd.f32 %v3551_v43, %v3550_v58 }
 0x1c4   :  { %v2538_v1 = vadd.f32 %v3549_v38, %v2441_v19  ;;  %v2444_v12 = vadd.f32 %v3488_v0, %v4621_v35 }
 0x1c6   :  { %v2673_v47 = vadd.f32 %v2672_v29, %v2538_v1  ;;  %v2695_v48 = vmul.f32 %v2538_v1, %v2538_v1  ;;  %v2541_v56 = vadd.f32 %v3552_v44, %v2444_v12  ;;  %v3489_v6 = vpop.f32.mrb[104].mxu0 }
 0x1c7   :  { %v3553_v53 = vpop.f32.mrb[104].mxu1  ;;  %v3490_v54 = vpop.f32.mrb[105].mxu0 }
 0x1c8   :  { %v2710_v57 = vadd.f32 %v2709_v42, %v2695_v48  ;;  %v3038_v13 = vpack.c.bf16 %v2541_v56, %v2538_v1  ;;  %v2674_v60 = vadd.f32 %v2673_v47, %v2541_v56  ;;  %v2696_v20 = vmul.f32 %v2541_v56, %v2541_v56  ;;  %v3554_v61 = vpop.f32.mrb[105].mxu1  ;;  %v3492_v62 = vpop.f32.mrb[106].mxu0 }
 0x1c9   :  { %v3491_v21 = vadd.f32 %v3490_v54, %v3489_v6  ;;  %v3555_v14 = vadd.f32 %v3554_v61, %v3553_v53  ;;  %v3556_v37 = vpop.f32.mrb[106].mxu1  ;;  %v3493_v3 = vpop.f32.mrb[107].mxu0 }
 0x1ca   :  { %3070 = vst [vmem:[%s4705_s3 + $0x8] sm:$0xff] %v3038_v13   ;;  %v2711_v35 = vadd.f32 %v2710_v57, %v2696_v20  ;;  %v3494_v4 = vadd.f32 %v3493_v3, %v3492_v62  ;;  %v3557_v16 = vpop.f32.mrb[107].mxu1 }
 0x1cb   :  { %v2449_v26 = vadd.f32 %v3491_v21, %v4624_v32  ;;  %v3558_v8 = vadd.f32 %v3557_v16, %v3556_v37 }
 0x1cc   :  { %v2452_v9 = vadd.f32 %v3494_v4, %v4627_v55 }
 0x1cd   :  { %v2546_v11 = vadd.f32 %v3555_v14, %v2449_v26 }
 0x1ce   :  { %v2549_v31 = vadd.f32 %v3558_v8, %v2452_v9  ;;  %v3495_v15 = vpop.f32.mrb[108].mxu0 }
 0x1cf   :  { %v2675_v40 = vadd.f32 %v2674_v60, %v2546_v11  ;;  %v2697_v17 = vmul.f32 %v2546_v11, %v2546_v11  ;;  %v3559_v18 = vpop.f32.mrb[108].mxu1  ;;  %v3496_v39 = vpop.f32.mrb[109].mxu0 }
 0x1d0   :  { %v3043_v22 = vpack.c.bf16 %v2549_v31, %v2546_v11  ;;  %v2698_v45 = vmul.f32 %v2549_v31, %v2549_v31  ;;  %v3497_v63 = vadd.f32 %v3496_v39, %v3495_v15  ;;  %v3560_v23 = vpop.f32.mrb[109].mxu1  ;;  %v3498_v24 = vpop.f32.mrb[110].mxu0 }
 0x1d1   :  { %v2712_v41 = vadd.f32 %v2711_v35, %v2697_v17  ;;  %v2676_v52 = vadd.f32 %v2675_v40, %v2549_v31  ;;  %v3561_v28 = vadd.f32 %v3560_v23, %v3559_v18  ;;  %v3562_v29 = vpop.f32.mrb[110].mxu1  ;;  %v3499_v32 = vpop.f32.mrb[111].mxu0 }
 0x1d2   :  { %3071 = vst [vmem:[%s4705_s3 + $0x10] sm:$0xff] %v3043_v22   ;;  %v2457_v55 = vadd.f32 %v3497_v63, %v4630_v51  ;;  %v3500_v36 = vadd.f32 %v3499_v32, %v3498_v24  ;;  %v3563_v50 = vpop.f32.mrb[111].mxu1 }
 0x1d3   :  { %v2713_v33 = vadd.f32 %v2712_v41, %v2698_v45  ;;  %v3564_v34 = vadd.f32 %v3563_v50, %v3562_v29 }
 0x1d4   :  { %v2554_v38 = vadd.f32 %v3561_v28, %v2457_v55  ;;  %v2460_v58 = vadd.f32 %v3500_v36, %v4633_v10 }
 0x1d6   :  { %v2677_v59 = vadd.f32 %v2676_v52, %v2554_v38  ;;  %v2699_v42 = vmul.f32 %v2554_v38, %v2554_v38  ;;  %v2557_v19 = vadd.f32 %v3564_v34, %v2460_v58  ;;  %v3501_v0 = vpop.f32.mrb[112].mxu0 }
 0x1d7   :  { %v3565_v43 = vpop.f32.mrb[112].mxu1  ;;  %v3502_v44 = vpop.f32.mrb[113].mxu0 }
 0x1d8   :  { %v2714_v1 = vadd.f32 %v2713_v33, %v2699_v42  ;;  %v3048_v12 = vpack.c.bf16 %v2557_v19, %v2554_v38  ;;  %v2678_v47 = vadd.f32 %v2677_v59, %v2557_v19  ;;  %v2700_v48 = vmul.f32 %v2557_v19, %v2557_v19  ;;  %v3566_v56 = vpop.f32.mrb[113].mxu1  ;;  %v3504_v6 = vpop.f32.mrb[114].mxu0 }
 0x1d9   :  { %v3503_v51 = vadd.f32 %v3502_v44, %v3501_v0  ;;  %v3567_v53 = vadd.f32 %v3566_v56, %v3565_v43  ;;  %v3568_v54 = vpop.f32.mrb[114].mxu1  ;;  %v3505_v57 = vpop.f32.mrb[115].mxu0 }
 0x1da   :  { %3072 = vst [vmem:[%s4705_s3 + $0x18] sm:$0xff] %v3048_v12   ;;  %v2715_v10 = vadd.f32 %v2714_v1, %v2700_v48  ;;  %v3506_v13 = vadd.f32 %v3505_v57, %v3504_v6  ;;  %v3569_v60 = vpop.f32.mrb[115].mxu1 }
 0x1db   :  { %v2465_v20 = vadd.f32 %v3503_v51, %v4636_v7  ;;  %v3570_v61 = vadd.f32 %v3569_v60, %v3568_v54 }
 0x1dc   :  { %v2468_v62 = vadd.f32 %v3506_v13, %v4639_v30 }
 0x1dd   :  { %v2562_v21 = vadd.f32 %v3567_v53, %v2465_v20 }
 0x1de   :  { %v2565_v14 = vadd.f32 %v3570_v61, %v2468_v62  ;;  %v3507_v37 = vpop.f32.mrb[116].mxu0 }
 0x1df   :  { %v2679_v3 = vadd.f32 %v2678_v47, %v2562_v21  ;;  %v2701_v35 = vmul.f32 %v2562_v21, %v2562_v21  ;;  %v3571_v4 = vpop.f32.mrb[116].mxu1  ;;  %v3508_v16 = vpop.f32.mrb[117].mxu0 }
 0x1e0   :  { %v3053_v26 = vpack.c.bf16 %v2565_v14, %v2562_v21  ;;  %v2702_v8 = vmul.f32 %v2565_v14, %v2565_v14  ;;  %v3509_v9 = vadd.f32 %v3508_v16, %v3507_v37  ;;  %v3572_v11 = vpop.f32.mrb[117].mxu1  ;;  %v3510_v31 = vpop.f32.mrb[118].mxu0 }
 0x1e1   :  { %v2716_v15 = vadd.f32 %v2715_v10, %v2701_v35  ;;  %v2680_v40 = vadd.f32 %v2679_v3, %v2565_v14  ;;  %v3573_v17 = vadd.f32 %v3572_v11, %v3571_v4  ;;  %v3574_v18 = vpop.f32.mrb[118].mxu1  ;;  %v3511_v7 = vpop.f32.mrb[119].mxu0 }
 0x1e2   :  { %3073 = vst [vmem:[%s4705_s3 + $0x20] sm:$0xff] %v3053_v26   ;;  %v2473_v30 = vadd.f32 %v3509_v9, %v4642_v27  ;;  %v3512_v39 = vadd.f32 %v3511_v7, %v3510_v31  ;;  %v3575_v22 = vpop.f32.mrb[119].mxu1 }
 0x1e3   :  { %v2717_v45 = vadd.f32 %v2716_v15, %v2702_v8  ;;  %v3576_v63 = vadd.f32 %v3575_v22, %v3574_v18 }
 0x1e4   :  { %v2570_v23 = vadd.f32 %v3573_v17, %v2473_v30  ;;  %v2476_v24 = vadd.f32 %v3512_v39, %v4645_v49 }
 0x1e6   :  { %v2681_v41 = vadd.f32 %v2680_v40, %v2570_v23  ;;  %v2703_v52 = vmul.f32 %v2570_v23, %v2570_v23  ;;  %v2573_v28 = vadd.f32 %v3576_v63, %v2476_v24  ;;  %v3513_v29 = vpop.f32.mrb[120].mxu0 }
 0x1e7   :  { %v3577_v32 = vpop.f32.mrb[120].mxu1  ;;  %v3514_v55 = vpop.f32.mrb[121].mxu0 }
 0x1e8   :  { %v2718_v36 = vadd.f32 %v2717_v45, %v2703_v52  ;;  %v3058_v50 = vpack.c.bf16 %v2573_v28, %v2570_v23  ;;  %v2682_v33 = vadd.f32 %v2681_v41, %v2573_v28  ;;  %v2704_v34 = vmul.f32 %v2573_v28, %v2573_v28  ;;  %v3578_v38 = vpop.f32.mrb[121].mxu1  ;;  %v3516_v58 = vpop.f32.mrb[122].mxu0 }
 0x1e9   :  { %v3515_v27 = vadd.f32 %v3514_v55, %v3513_v29  ;;  %v3579_v59 = vadd.f32 %v3578_v38, %v3577_v32  ;;  %v3580_v42 = vpop.f32.mrb[122].mxu1  ;;  %v3517_v19 = vpop.f32.mrb[123].mxu0 }
 0x1ea   :  { %3074 = vst [vmem:[%s4705_s3 + $0x28] sm:$0xff] %v3058_v50   ;;  %v2719_v49 = vadd.f32 %v2718_v36, %v2704_v34  ;;  %v3518_v0 = vadd.f32 %v3517_v19, %v3516_v58  ;;  %v3581_v43 = vpop.f32.mrb[123].mxu1 }
 0x1eb   :  { %v2481_v44 = vadd.f32 %v3515_v27, %v4648_v46  ;;  %v3582_v1 = vadd.f32 %v3581_v43, %v3580_v42 }
 0x1ec   :  { %v2484_v12 = vadd.f32 %v3518_v0, %v4651_v5 }
 0x1ed   :  { %v2578_v47 = vadd.f32 %v3579_v59, %v2481_v44 }
 0x1ee   :  { %v2581_v48 = vadd.f32 %v3582_v1, %v2484_v12  ;;  %v3519_v56 = vpop.f32.mrb[124].mxu0 }
 0x1ef   :  { %v2683_v6 = vadd.f32 %v2682_v33, %v2578_v47  ;;  %v2705_v51 = vmul.f32 %v2578_v47, %v2578_v47  ;;  %v3583_v53 = vpop.f32.mrb[124].mxu1  ;;  %v3520_v54 = vpop.f32.mrb[125].mxu0 }
 0x1f0   :  { %v3063_v57 = vpack.c.bf16 %v2581_v48, %v2578_v47  ;;  %v2706_v10 = vmul.f32 %v2581_v48, %v2581_v48  ;;  %v3521_v13 = vadd.f32 %v3520_v54, %v3519_v56  ;;  %v3584_v60 = vpop.f32.mrb[125].mxu1  ;;  %v3522_v20 = vpop.f32.mrb[126].mxu0 }
 0x1f1   :  { %v2720_v61 = vadd.f32 %v2719_v49, %v2705_v51  ;;  %v2684_v62 = vadd.f32 %v2683_v6, %v2581_v48  ;;  %v3585_v21 = vadd.f32 %v3584_v60, %v3583_v53  ;;  %v3586_v14 = vpop.f32.mrb[126].mxu1  ;;  %v3523_v46 = vpop.f32.mrb[127].mxu0 }
 0x1f2   :  { %3075 = vst [vmem:[%s4705_s3 + $0x30] sm:$0xff] %v3063_v57   ;;  %v2489_v5 = vadd.f32 %v3521_v13, %v4654_v2  ;;  %v3524_v37 = vadd.f32 %v3523_v46, %v3522_v20  ;;  %v3587_v3 = vpop.f32.mrb[127].mxu1 }
 0x1f3   :  { %v2721_v35 = vadd.f32 %v2720_v61, %v2706_v10  ;;  %v3588_v4 = vadd.f32 %v3587_v3, %v3586_v14 }
 0x1f4   :  { %v2586_v16 = vadd.f32 %v3585_v21, %v2489_v5  ;;  %v2492_v26 = vadd.f32 %v3524_v37, %v4657_v25 }
 0x1f6   :  { %v2685_v8 = vadd.f32 %v2684_v62, %v2586_v16  ;;  %v2707_v9 = vmul.f32 %v2586_v16, %v2586_v16  ;;  %v2589_v11 = vadd.f32 %v3588_v4, %v2492_v26 }
 0x1f8   :  { %v2722_v31 = vadd.f32 %v2721_v35, %v2707_v9  ;;  %v3068_v15 = vpack.c.bf16 %v2589_v11, %v2586_v16  ;;  %v2686_v40 = vadd.f32 %v2685_v8, %v2589_v11  ;;  %v2708_v17 = vmul.f32 %v2589_v11, %v2589_v11 }
 0x1fa   :  { %3076 = vst [vmem:[%s4705_s3 + $0x38] sm:$0xff] %v3068_v15   ;;  %v2687_v18 = vrot.slane %v2686_v40, 4  ;;  %v2723_v2 = vadd.f32 %v2722_v31, %v2708_v17 }
 0x1fc   :  { %v2688_v7 = vadd.f32 %v2687_v18, %v2686_v40  ;;  %v2724_v30 = vrot.slane %v2723_v2, 4 }
 0x1fe   :  { %v2689_v39 = vrot.slane %v2688_v7, 2  ;;  %v2725_v22 = vadd.f32 %v2724_v30, %v2723_v2 }
 0x200   :  { %v2690_v45 = vadd.f32 %v2689_v39, %v2688_v7  ;;  %v2726_v63 = vrot.slane %v2725_v22, 2 }
 0x202   :  { %v2691_v25 = vrot.slane %v2690_v45, 1  ;;  %v2727_v23 = vadd.f32 %v2726_v63, %v2725_v22 }
 0x204   :  { %v2728_v24 = vrot.slane %v2727_v23, 1  ;;  %v2692_v41 = vadd.f32 %v2691_v25, %v2690_v45 }
 0x206   :  { %v2729_v52 = vadd.f32 %v2728_v24, %v2727_v23 }
 0x208   :  { %v2731_v28 = vsel %vm2730_vm0, %v2692_v41, %v2729_v52 }
 0x209   :  { %2732 = vst [vmem:[%s4706_s4] sm:$0x3] %v2731_v28 }

// kernel: _forward.7
= control target key start
LH: loop header
LB: loop body
LE: loop exit
PB: predicated region body
PF: predicated region fallthrough
CT: control target
= control target key end

     0   :  { %vm1674_vm0 = vcmask 1040384   ;;  %s2734_s1 = inlined_call_operand.vmem [shape: bf16[2048,128], index: 1, kind: input, shape index: {}]   ;;  %s2735_s0 = inlined_call_operand.vmem [shape: bf16[32,2048], index: 0, kind: input, shape index: {}]   ;;  %s2736_s2 = inlined_call_operand.vmem [shape: f32[1,128], index: 2, kind: input, shape index: {}]   ;;  %s2737_s3 = inlined_call_operand.vmem [shape: bf16[32,128], index: 3, kind: output, shape index: {0}]   ;;  %s2738_s4 = inlined_call_operand.vmem [shape: f32[1,2,128], index: 4, kind: output, shape index: {1}]  }
   0x1   :  { %v2089_v0 = vld [vmem:[%s2734_s1 + $0x40] sm:$0xff]   ;;  %v2093_v4 = vld [vmem:[%s2734_s1 + $0x48] sm:$0xff]   ;;  %v2097_v8 = vld [vmem:[%s2734_s1 + $0x50] sm:$0xff]  }
   0x2   :  { %v2090_v1 = vld [vmem:[%s2734_s1 + $0xc0] sm:$0xff]   ;;  %1865 = vmatprep.subr.bf16.mxu0 %v2089_v0  ;;  %v2094_v5 = vld [vmem:[%s2734_s1 + $0xc8] sm:$0xff]   ;;  %v2098_v9 = vld [vmem:[%s2734_s1 + $0xd0] sm:$0xff]  }
   0x3   :  { %v2091_v2 = vld [vmem:[%s2734_s1] sm:$0xff]   ;;  %1893 = vmatprep.subr.bf16.mxu1 %v2090_v1  ;;  %v2095_v6 = vld [vmem:[%s2734_s1 + $0x8] sm:$0xff]   ;;  %v2099_v10 = vld [vmem:[%s2734_s1 + $0x10] sm:$0xff]  }
   0x4   :  { %v2092_v3 = vld [vmem:[%s2734_s1 + $0x80] sm:$0xff]   ;;  %1866 = vmatpush3.bf16.msra.mxu0 %v2091_v2  ;;  %v2096_v7 = vld [vmem:[%s2734_s1 + $0x88] sm:$0xff]   ;;  %v2100_v11 = vld [vmem:[%s2734_s1 + $0x90] sm:$0xff]  }
   0x5   :  { %1894 = vmatpush3.bf16.msra.mxu1 %v2092_v3  ;;  %1867 = vmatprep.subr.bf16.mxu0 %v2093_v4  ;;  %v2101_v12 = vld [vmem:[%s2734_s1 + $0x58] sm:$0xff]   ;;  %v2105_v16 = vld [vmem:[%s2734_s1 + $0x60] sm:$0xff]   ;;  %v2109_v20 = vld [vmem:[%s2734_s1 + $0x68] sm:$0xff]  }
   0x6   :  { %1895 = vmatprep.subr.bf16.mxu1 %v2094_v5  ;;  %v2102_v13 = vld [vmem:[%s2734_s1 + $0xd8] sm:$0xff]   ;;  %v2106_v17 = vld [vmem:[%s2734_s1 + $0xe0] sm:$0xff]   ;;  %v2110_v21 = vld [vmem:[%s2734_s1 + $0xe8] sm:$0xff]  }
   0x7   :  { %v2103_v14 = vld [vmem:[%s2734_s1 + $0x18] sm:$0xff]   ;;  %v2107_v18 = vld [vmem:[%s2734_s1 + $0x20] sm:$0xff]   ;;  %v2111_v22 = vld [vmem:[%s2734_s1 + $0x28] sm:$0xff]  }
   0x8   :  { %1868 = vmatpush3.bf16.msra.mxu0 %v2095_v6  ;;  %v2104_v15 = vld [vmem:[%s2734_s1 + $0x98] sm:$0xff]   ;;  %v2108_v19 = vld [vmem:[%s2734_s1 + $0xa0] sm:$0xff]   ;;  %v2112_v23 = vld [vmem:[%s2734_s1 + $0xa8] sm:$0xff]  }
   0x9   :  { %1896 = vmatpush3.bf16.msra.mxu1 %v2096_v7  ;;  %1869 = vmatprep.subr.bf16.mxu0 %v2097_v8  ;;  %v2113_v24 = vld [vmem:[%s2734_s1 + $0x70] sm:$0xff]   ;;  %v2117_v28 = vld [vmem:[%s2734_s1 + $0x78] sm:$0xff]   ;;  %v17_v32 = vld [vmem:[%s2735_s0] sm:$0xff] }
   0xa   :  { %1897 = vmatprep.subr.bf16.mxu1 %v2098_v9  ;;  %v2114_v25 = vld [vmem:[%s2734_s1 + $0xf0] sm:$0xff]   ;;  %v2118_v29 = vld [vmem:[%s2734_s1 + $0xf8] sm:$0xff]   ;;  %v25_v33 = vld [vmem:[%s2735_s0 + $0x40] sm:$0xff] }
   0xb   :  { %v2115_v26 = vld [vmem:[%s2734_s1 + $0x30] sm:$0xff]   ;;  %v2119_v30 = vld [vmem:[%s2734_s1 + $0x38] sm:$0xff]   ;;  %v18_v34 = vld [vmem:[%s2735_s0 + $0x8] sm:$0xff]  ;;  %v1686_v35 = vcombine.low %v17_v32, %v25_v33  ;;  %v1687_v36 = vcombine.high %v17_v32, %v25_v33 }
   0xc   :  { %1870 = vmatpush3.bf16.msra.mxu0 %v2099_v10  ;;  %v2116_v27 = vld [vmem:[%s2734_s1 + $0xb0] sm:$0xff]   ;;  %v2120_v31 = vld [vmem:[%s2734_s1 + $0xb8] sm:$0xff]   ;;  %v26_v37 = vld [vmem:[%s2735_s0 + $0x48] sm:$0xff] }
   0xd   :  { %1898 = vmatpush3.bf16.msra.mxu1 %v2100_v11  ;;  %1871 = vmatprep.subr.bf16.mxu0 %v2101_v12  ;;  %v1688_v38 = vcombine.low %v18_v34, %v26_v37  ;;  %v1689_v39 = vcombine.high %v18_v34, %v26_v37  ;;  %v2121_v40 = vld [vmem:[%s2734_s1 + $0x140] sm:$0xff]   ;;  %v2125_v44 = vld [vmem:[%s2734_s1 + $0x148] sm:$0xff]   ;;  %v2129_v48 = vld [vmem:[%s2734_s1 + $0x150] sm:$0xff]  }
   0xe   :  { %1899 = vmatprep.subr.bf16.mxu1 %v2102_v13  ;;  %1272 = vmatprep.mubr.bf16.mxu0 %v1687_v36  ;;  %v2122_v41 = vld [vmem:[%s2734_s1 + $0x1c0] sm:$0xff]   ;;  %v2126_v45 = vld [vmem:[%s2734_s1 + $0x1c8] sm:$0xff]   ;;  %v2130_v49 = vld [vmem:[%s2734_s1 + $0x1d0] sm:$0xff]  }
   0xf   :  { %1321 = vmatprep.mubr.bf16.mxu1 %v1689_v39  ;;  %v2123_v42 = vld [vmem:[%s2734_s1 + $0x100] sm:$0xff]   ;;  %v2127_v46 = vld [vmem:[%s2734_s1 + $0x108] sm:$0xff]   ;;  %v2131_v50 = vld [vmem:[%s2734_s1 + $0x110] sm:$0xff]  }
  0x10   :  { %1872 = vmatpush3.bf16.msra.mxu0 %v2103_v14  ;;  %v2124_v43 = vld [vmem:[%s2734_s1 + $0x180] sm:$0xff]   ;;  %v2128_v47 = vld [vmem:[%s2734_s1 + $0x188] sm:$0xff]   ;;  %v2132_v51 = vld [vmem:[%s2734_s1 + $0x190] sm:$0xff]  }
  0x11   :  { %1900 = vmatpush3.bf16.msra.mxu1 %v2104_v15  ;;  %1873 = vmatprep.subr.bf16.mxu0 %v2105_v16  ;;  %v2133_v52 = vld [vmem:[%s2734_s1 + $0x158] sm:$0xff]   ;;  %v2137_v56 = vld [vmem:[%s2734_s1 + $0x160] sm:$0xff]   ;;  %v2141_v60 = vld [vmem:[%s2734_s1 + $0x168] sm:$0xff]  }
  0x12   :  { %1901 = vmatprep.subr.bf16.mxu1 %v2106_v17  ;;  %v2134_v53 = vld [vmem:[%s2734_s1 + $0x1d8] sm:$0xff]   ;;  %v2138_v57 = vld [vmem:[%s2734_s1 + $0x1e0] sm:$0xff]   ;;  %v2142_v61 = vld [vmem:[%s2734_s1 + $0x1e8] sm:$0xff]  }
  0x13   :  { %v2135_v54 = vld [vmem:[%s2734_s1 + $0x118] sm:$0xff]   ;;  %v2139_v58 = vld [vmem:[%s2734_s1 + $0x120] sm:$0xff]   ;;  %v2143_v1 = vld [vmem:[%s2734_s1 + $0x128] sm:$0xff]  }
  0x14   :  { %1874 = vmatpush3.bf16.msra.mxu0 %v2107_v18  ;;  %v2136_v55 = vld [vmem:[%s2734_s1 + $0x198] sm:$0xff]   ;;  %v2140_v59 = vld [vmem:[%s2734_s1 + $0x1a0] sm:$0xff]   ;;  %v2144_v3 = vld [vmem:[%s2734_s1 + $0x1a8] sm:$0xff]  }
  0x15   :  { %1902 = vmatpush3.bf16.msra.mxu1 %v2108_v19  ;;  %1875 = vmatprep.subr.bf16.mxu0 %v2109_v20  ;;  %v33_v62 = vld [vmem:[%s2735_s0 + $0x80] sm:$0xff]  ;;  %v34_v4 = vld [vmem:[%s2735_s0 + $0x88] sm:$0xff]  ;;  %v2145_v8 = vld [vmem:[%s2734_s1 + $0x170] sm:$0xff]  }
  0x16   :  { %1903 = vmatprep.subr.bf16.mxu1 %v2110_v21  ;;  %v41_v63 = vld [vmem:[%s2735_s0 + $0xc0] sm:$0xff]  ;;  %v42_v5 = vld [vmem:[%s2735_s0 + $0xc8] sm:$0xff]  ;;  %v2146_v9 = vld [vmem:[%s2734_s1 + $0x1f0] sm:$0xff]  }
  0x17   :  { %v1703_v0 = vcombine.high %v33_v62, %v41_v63  ;;  %v1702_v2 = vcombine.low %v33_v62, %v41_v63  ;;  %v1705_v6 = vcombine.high %v34_v4, %v42_v5  ;;  %v1704_v7 = vcombine.low %v34_v4, %v42_v5  ;;  %v2147_v10 = vld [vmem:[%s2734_s1 + $0x130] sm:$0xff]   ;;  %v2149_v12 = vld [vmem:[%s2734_s1 + $0x178] sm:$0xff]   ;;  %v22_v4 = vld [vmem:[%s2735_s0 + $0x28] sm:$0xff] }
  0x18   :  { %1876 = vmatpush3.bf16.msra.mxu0 %v2111_v22  ;;  %v2148_v11 = vld [vmem:[%s2734_s1 + $0x1b0] sm:$0xff]   ;;  %v2150_v13 = vld [vmem:[%s2734_s1 + $0x1f8] sm:$0xff]   ;;  %v30_v5 = vld [vmem:[%s2735_s0 + $0x68] sm:$0xff] }
  0x19   :  { %1904 = vmatpush3.bf16.msra.mxu1 %v2112_v23  ;;  %1877 = vmatprep.subr.bf16.mxu0 %v2113_v24  ;;  %v2151_v14 = vld [vmem:[%s2734_s1 + $0x138] sm:$0xff]   ;;  %v19_v16 = vld [vmem:[%s2735_s0 + $0x10] sm:$0xff]  ;;  %v2153_v24 = vld [vmem:[%s2734_s1 + $0x240] sm:$0xff]  }
  0x1a   :  { %1905 = vmatprep.subr.bf16.mxu1 %v2114_v25  ;;  %v2152_v15 = vld [vmem:[%s2734_s1 + $0x1b8] sm:$0xff]   ;;  %v27_v17 = vld [vmem:[%s2735_s0 + $0x50] sm:$0xff]  ;;  %v2154_v25 = vld [vmem:[%s2734_s1 + $0x2c0] sm:$0xff]  }
  0x1b   :  { %v20_v18 = vld [vmem:[%s2735_s0 + $0x18] sm:$0xff]  ;;  %v1690_v20 = vcombine.low %v19_v16, %v27_v17  ;;  %v1691_v21 = vcombine.high %v19_v16, %v27_v17  ;;  %v35_v32 = vld [vmem:[%s2735_s0 + $0x90] sm:$0xff]  ;;  %v37_v16 = vld [vmem:[%s2735_s0 + $0xa0] sm:$0xff] }
  0x1c   :  { %1878 = vmatpush3.bf16.msra.mxu0 %v2115_v26  ;;  %v28_v19 = vld [vmem:[%s2735_s0 + $0x58] sm:$0xff]  ;;  %v2155_v26 = vld [vmem:[%s2734_s1 + $0x200] sm:$0xff]   ;;  %v43_v33 = vld [vmem:[%s2735_s0 + $0xd0] sm:$0xff] }
  0x1d   :  { %1906 = vmatpush3.bf16.msra.mxu1 %v2116_v27  ;;  %1879 = vmatprep.subr.bf16.mxu0 %v2117_v28  ;;  %v1692_v22 = vcombine.low %v20_v18, %v28_v19  ;;  %v1693_v23 = vcombine.high %v20_v18, %v28_v19  ;;  %v2156_v27 = vld [vmem:[%s2734_s1 + $0x280] sm:$0xff]   ;;  %v2157_v28 = vld [vmem:[%s2734_s1 + $0x248] sm:$0xff]   ;;  %v1707_v34 = vcombine.high %v35_v32, %v43_v33  ;;  %v2161_v36 = vld [vmem:[%s2734_s1 + $0x250] sm:$0xff]  }
  0x1e   :  { %1907 = vmatprep.subr.bf16.mxu1 %v2118_v29  ;;  %v2158_v29 = vld [vmem:[%s2734_s1 + $0x2c8] sm:$0xff]   ;;  %v2162_v37 = vld [vmem:[%s2734_s1 + $0x2d0] sm:$0xff]   ;;  %v44_v39 = vld [vmem:[%s2735_s0 + $0xd8] sm:$0xff] }
  0x1f   :  { %v2183_v62 = vld [vmem:[%s2734_s1 + $0x238] sm:$0xff]   ;;  %v45_v17 = vld [vmem:[%s2735_s0 + $0xe0] sm:$0xff] }
  0x20   :  { %1880 = vmatpush3.bf16.msra.mxu0 %v2119_v30  ;;  %v2159_v30 = vld [vmem:[%s2734_s1 + $0x208] sm:$0xff]   ;;  %v2184_v63 = vld [vmem:[%s2734_s1 + $0x2b8] sm:$0xff]   ;;  %v1711_v18 = vcombine.high %v37_v16, %v45_v17  ;;  %v1710_v19 = vcombine.low %v37_v16, %v45_v17 }
  0x21   :  { %1908 = vmatpush3.bf16.msra.mxu1 %v2120_v31  ;;  %1921 = vmatprep.subr.bf16.mxu0 %v2121_v40  ;;  %v2160_v31 = vld [vmem:[%s2734_s1 + $0x288] sm:$0xff]  }
  0x22   :  { %1949 = vmatprep.subr.bf16.mxu1 %v2122_v41  ;;  %v2163_v41 = vld [vmem:[%s2734_s1 + $0x210] sm:$0xff]  }
  0x23   :  { %1273 = vmatmul.mubr.bf16.vlgmr.msra.gmra.mrb[0].mxu0 %v1686_v35  ;;  %v1706_v35 = vcombine.low %v35_v32, %v43_v33  ;;  %v2201_v32 = vld [vmem:[%s2734_s1 + $0x360] sm:$0xff]  }
  0x24   :  { %1322 = vmatmul.mubr.bf16.vlgmr.msra.gmra.mrb[0].mxu1 %v1688_v38  ;;  %1922 = vmatpush3.bf16.msra.mxu0 %v2123_v42  ;;  %v36_v38 = vld [vmem:[%s2735_s0 + $0x98] sm:$0xff]  ;;  %v2202_v33 = vld [vmem:[%s2734_s1 + $0x3e0] sm:$0xff]  }
  0x25   :  { %1950 = vmatpush3.bf16.msra.mxu1 %v2124_v43  ;;  %1923 = vmatprep.subr.bf16.mxu0 %v2125_v44  ;;  %v1709_v40 = vcombine.high %v36_v38, %v44_v39  ;;  %v1708_v42 = vcombine.low %v36_v38, %v44_v39  ;;  %v2164_v43 = vld [vmem:[%s2734_s1 + $0x290] sm:$0xff]   ;;  %v2165_v44 = vld [vmem:[%s2734_s1 + $0x258] sm:$0xff]   ;;  %v2207_v38 = vld [vmem:[%s2734_s1 + $0x328] sm:$0xff]  }
  0x26   :  { %1951 = vmatprep.subr.bf16.mxu1 %v2126_v45  ;;  %1280 = vmatprep.mubr.bf16.mxu0 %v1703_v0  ;;  %v2166_v45 = vld [vmem:[%s2734_s1 + $0x2d8] sm:$0xff]   ;;  %v21_v0 = vld [vmem:[%s2735_s0 + $0x20] sm:$0xff]  ;;  %v2208_v39 = vld [vmem:[%s2734_s1 + $0x3a8] sm:$0xff]  }
  0x27   :  { %1329 = vmatprep.mubr.bf16.mxu1 %v1705_v6  ;;  %v1696_v6 = vcombine.low %v22_v4, %v30_v5 }
  0x28   :  { %1924 = vmatpush3.bf16.msra.mxu0 %v2127_v46  ;;  %v2167_v46 = vld [vmem:[%s2734_s1 + $0x218] sm:$0xff]  }
  0x29   :  { %1952 = vmatpush3.bf16.msra.mxu1 %v2128_v47  ;;  %1925 = vmatprep.subr.bf16.mxu0 %v2129_v48  ;;  %v2168_v47 = vld [vmem:[%s2734_s1 + $0x298] sm:$0xff]   ;;  %v2169_v48 = vld [vmem:[%s2734_s1 + $0x260] sm:$0xff]  }
  0x2a   :  { %1953 = vmatprep.subr.bf16.mxu1 %v2130_v49  ;;  %v2170_v49 = vld [vmem:[%s2734_s1 + $0x2e0] sm:$0xff]  }
  0x2b   :  { %1281 = vmatmul.mubr.bf16.gmra.mrb[4].mxu0 %v1702_v2 }
  0x2c   :  { %1926 = vmatpush3.bf16.msra.mxu0 %v2131_v50  ;;  %1330 = vmatmul.mubr.bf16.gmra.mrb[4].mxu1 %v1704_v7  ;;  %v2171_v50 = vld [vmem:[%s2734_s1 + $0x220] sm:$0xff]   ;;  %v1697_v7 = vcombine.high %v22_v4, %v30_v5 }
  0x2d   :  { %1954 = vmatpush3.bf16.msra.mxu1 %v2132_v51  ;;  %1927 = vmatprep.subr.bf16.mxu0 %v2133_v52  ;;  %v2172_v51 = vld [vmem:[%s2734_s1 + $0x2a0] sm:$0xff]   ;;  %v2173_v52 = vld [vmem:[%s2734_s1 + $0x268] sm:$0xff]  }
  0x2e   :  { %1955 = vmatprep.subr.bf16.mxu1 %v2134_v53  ;;  %1370 = vmatprep.mubr.bf16.mxu0 %v1691_v21  ;;  %v2174_v53 = vld [vmem:[%s2734_s1 + $0x2e8] sm:$0xff]   ;;  %v2194_v21 = vld [vmem:[%s2734_s1 + $0x3d0] sm:$0xff]  }
  0x2f   :  { %1419 = vmatprep.mubr.bf16.mxu1 %v1693_v23  ;;  %v46_v23 = vld [vmem:[%s2735_s0 + $0xe8] sm:$0xff] }
  0x30   :  { %1928 = vmatpush3.bf16.msra.mxu0 %v2135_v54  ;;  %v2175_v54 = vld [vmem:[%s2734_s1 + $0x228] sm:$0xff]  }
  0x31   :  { %1956 = vmatpush3.bf16.msra.mxu1 %v2136_v55  ;;  %1929 = vmatprep.subr.bf16.mxu0 %v2137_v56  ;;  %v2176_v55 = vld [vmem:[%s2734_s1 + $0x2a8] sm:$0xff]   ;;  %v2177_v56 = vld [vmem:[%s2734_s1 + $0x270] sm:$0xff]  }
  0x32   :  { %1957 = vmatprep.subr.bf16.mxu1 %v2138_v57  ;;  %v2178_v57 = vld [vmem:[%s2734_s1 + $0x2f0] sm:$0xff]  }
  0x34   :  { %1930 = vmatpush3.bf16.msra.mxu0 %v2139_v58  ;;  %v2179_v58 = vld [vmem:[%s2734_s1 + $0x230] sm:$0xff]  }
  0x35   :  { %1958 = vmatpush3.bf16.msra.mxu1 %v2140_v59  ;;  %1931 = vmatprep.subr.bf16.mxu0 %v2141_v60  ;;  %v2180_v59 = vld [vmem:[%s2734_s1 + $0x2b0] sm:$0xff]   ;;  %v2181_v60 = vld [vmem:[%s2734_s1 + $0x278] sm:$0xff]  }
  0x36   :  { %1959 = vmatprep.subr.bf16.mxu1 %v2142_v61  ;;  %v2182_v61 = vld [vmem:[%s2734_s1 + $0x2f8] sm:$0xff]  }
  0x38   :  { %1932 = vmatpush3.bf16.msra.mxu0 %v2143_v1  ;;  %v29_v1 = vld [vmem:[%s2735_s0 + $0x60] sm:$0xff] }
  0x39   :  { %1960 = vmatpush3.bf16.msra.mxu1 %v2144_v3  ;;  %1933 = vmatprep.subr.bf16.mxu0 %v2145_v8  ;;  %v1694_v2 = vcombine.low %v21_v0, %v29_v1  ;;  %v1695_v3 = vcombine.high %v21_v0, %v29_v1  ;;  %v2185_v8 = vld [vmem:[%s2734_s1 + $0x340] sm:$0xff]  }
  0x3a   :  { %1961 = vmatprep.subr.bf16.mxu1 %v2146_v9  ;;  %v2186_v9 = vld [vmem:[%s2734_s1 + $0x3c0] sm:$0xff]  }
  0x3c   :  { %1934 = vmatpush3.bf16.msra.mxu0 %v2147_v10  ;;  %v2187_v10 = vld [vmem:[%s2734_s1 + $0x300] sm:$0xff]  }
  0x3d   :  { %1962 = vmatpush3.bf16.msra.mxu1 %v2148_v11  ;;  %1935 = vmatprep.subr.bf16.mxu0 %v2149_v12  ;;  %v2188_v11 = vld [vmem:[%s2734_s1 + $0x380] sm:$0xff]   ;;  %v2189_v12 = vld [vmem:[%s2734_s1 + $0x348] sm:$0xff]  }
  0x3e   :  { %1963 = vmatprep.subr.bf16.mxu1 %v2150_v13  ;;  %v2190_v13 = vld [vmem:[%s2734_s1 + $0x3c8] sm:$0xff]  }
  0x40   :  { %1936 = vmatpush3.bf16.msra.mxu0 %v2151_v14  ;;  %v2191_v14 = vld [vmem:[%s2734_s1 + $0x308] sm:$0xff]  }
  0x41   :  { %1964 = vmatpush3.bf16.msra.mxu1 %v2152_v15  ;;  %1977 = vmatprep.subr.bf16.mxu0 %v2153_v24  ;;  %v2192_v15 = vld [vmem:[%s2734_s1 + $0x388] sm:$0xff]  }
  0x42   :  { %2005 = vmatprep.subr.bf16.mxu1 %v2154_v25  ;;  %v2195_v25 = vld [vmem:[%s2734_s1 + $0x310] sm:$0xff]  }
  0x43   :  { %1371 = vmatmul.mubr.bf16.vlgmr.msra.gmra.mrb[8].mxu0 %v1690_v20  ;;  %v2193_v20 = vld [vmem:[%s2734_s1 + $0x350] sm:$0xff]  }
  0x44   :  { %1420 = vmatmul.mubr.bf16.vlgmr.msra.gmra.mrb[8].mxu1 %v1692_v22  ;;  %1978 = vmatpush3.bf16.msra.mxu0 %v2155_v26  ;;  %v38_v22 = vld [vmem:[%s2735_s0 + $0xa8] sm:$0xff] }
  0x45   :  { %2006 = vmatpush3.bf16.msra.mxu1 %v2156_v27  ;;  %1979 = vmatprep.subr.bf16.mxu0 %v2157_v28  ;;  %v1713_v24 = vcombine.high %v38_v22, %v46_v23  ;;  %v1712_v26 = vcombine.low %v38_v22, %v46_v23  ;;  %v2196_v27 = vld [vmem:[%s2734_s1 + $0x390] sm:$0xff]   ;;  %v2197_v28 = vld [vmem:[%s2734_s1 + $0x358] sm:$0xff]  }
  0x46   :  { %2007 = vmatprep.subr.bf16.mxu1 %v2158_v29  ;;  %1378 = vmatprep.mubr.bf16.mxu0 %v1707_v34  ;;  %v2198_v29 = vld [vmem:[%s2734_s1 + $0x3d8] sm:$0xff]   ;;  %v2203_v34 = vld [vmem:[%s2734_s1 + $0x320] sm:$0xff]  }
  0x47   :  { %1427 = vmatprep.mubr.bf16.mxu1 %v1709_v40  ;;  %v2209_v40 = vld [vmem:[%s2734_s1 + $0x370] sm:$0xff]  }
  0x48   :  { %1980 = vmatpush3.bf16.msra.mxu0 %v2159_v30  ;;  %v2199_v30 = vld [vmem:[%s2734_s1 + $0x318] sm:$0xff]  }
  0x49   :  { %2008 = vmatpush3.bf16.msra.mxu1 %v2160_v31  ;;  %1981 = vmatprep.subr.bf16.mxu0 %v2161_v36  ;;  %v2200_v31 = vld [vmem:[%s2734_s1 + $0x398] sm:$0xff]   ;;  %v2205_v36 = vld [vmem:[%s2734_s1 + $0x368] sm:$0xff]  }
  0x4a   :  { %2009 = vmatprep.subr.bf16.mxu1 %v2162_v37  ;;  %v2206_v37 = vld [vmem:[%s2734_s1 + $0x3e8] sm:$0xff]  }
  0x4b   :  { %1379 = vmatmul.mubr.bf16.gmra.mrb[12].mxu0 %v1706_v35  ;;  %v2204_v35 = vld [vmem:[%s2734_s1 + $0x3a0] sm:$0xff]  }
  0x4c   :  { %1982 = vmatpush3.bf16.msra.mxu0 %v2163_v41  ;;  %1428 = vmatmul.mubr.bf16.gmra.mrb[12].mxu1 %v1708_v42  ;;  %v2210_v41 = vld [vmem:[%s2734_s1 + $0x3f0] sm:$0xff]  }
  0x4d   :  { %2010 = vmatpush3.bf16.msra.mxu1 %v2164_v43  ;;  %1983 = vmatprep.subr.bf16.mxu0 %v2165_v44  ;;  %v2211_v42 = vld [vmem:[%s2734_s1 + $0x330] sm:$0xff]   ;;  %v2213_v44 = vld [vmem:[%s2734_s1 + $0x378] sm:$0xff]  }
  0x4e   :  { %2011 = vmatprep.subr.bf16.mxu1 %v2166_v45  ;;  %1468 = vmatprep.mubr.bf16.mxu0 %v1695_v3  ;;  %v2212_v43 = vld [vmem:[%s2734_s1 + $0x3b0] sm:$0xff]   ;;  %v2214_v45 = vld [vmem:[%s2734_s1 + $0x3f8] sm:$0xff]  }
  0x4f   :  { %1517 = vmatprep.mubr.bf16.mxu1 %v1697_v7 }
  0x50   :  { %1984 = vmatpush3.bf16.msra.mxu0 %v2167_v46  ;;  %v2215_v46 = vld [vmem:[%s2734_s1 + $0x338] sm:$0xff]  }
  0x51   :  { %2012 = vmatpush3.bf16.msra.mxu1 %v2168_v47  ;;  %1985 = vmatprep.subr.bf16.mxu0 %v2169_v48  ;;  %v2216_v47 = vld [vmem:[%s2734_s1 + $0x3b8] sm:$0xff]   ;;  %v23_v48 = vld [vmem:[%s2735_s0 + $0x30] sm:$0xff] }
  0x52   :  { %2013 = vmatprep.subr.bf16.mxu1 %v2170_v49  ;;  %v31_v49 = vld [vmem:[%s2735_s0 + $0x70] sm:$0xff] }
  0x54   :  { %1986 = vmatpush3.bf16.msra.mxu0 %v2171_v50  ;;  %v24_v50 = vld [vmem:[%s2735_s0 + $0x38] sm:$0xff] }
  0x55   :  { %2014 = vmatpush3.bf16.msra.mxu1 %v2172_v51  ;;  %1987 = vmatprep.subr.bf16.mxu0 %v2173_v52  ;;  %v1698_v51 = vcombine.low %v23_v48, %v31_v49  ;;  %v1699_v52 = vcombine.high %v23_v48, %v31_v49 }
  0x56   :  { %2015 = vmatprep.subr.bf16.mxu1 %v2174_v53  ;;  %v32_v53 = vld [vmem:[%s2735_s0 + $0x78] sm:$0xff] }
  0x58   :  { %1988 = vmatpush3.bf16.msra.mxu0 %v2175_v54  ;;  %v39_v54 = vld [vmem:[%s2735_s0 + $0xb0] sm:$0xff] }
  0x59   :  { %2016 = vmatpush3.bf16.msra.mxu1 %v2176_v55  ;;  %1989 = vmatprep.subr.bf16.mxu0 %v2177_v56  ;;  %v47_v55 = vld [vmem:[%s2735_s0 + $0xf0] sm:$0xff]  ;;  %v1700_v56 = vcombine.low %v24_v50, %v32_v53 }
  0x5a   :  { %2017 = vmatprep.subr.bf16.mxu1 %v2178_v57  ;;  %v1701_v57 = vcombine.high %v24_v50, %v32_v53 }
  0x5c   :  { %1990 = vmatpush3.bf16.msra.mxu0 %v2179_v58  ;;  %v1715_v58 = vcombine.high %v39_v54, %v47_v55 }
  0x5d   :  { %2018 = vmatpush3.bf16.msra.mxu1 %v2180_v59  ;;  %1991 = vmatprep.subr.bf16.mxu0 %v2181_v60  ;;  %v40_v59 = vld [vmem:[%s2735_s0 + $0xb8] sm:$0xff] }
  0x5e   :  { %2019 = vmatprep.subr.bf16.mxu1 %v2182_v61  ;;  %v48_v60 = vld [vmem:[%s2735_s0 + $0xf8] sm:$0xff] }
  0x5f   :  { %v1717_v61 = vcombine.high %v40_v59, %v48_v60 }
  0x60   :  { %1992 = vmatpush3.bf16.msra.mxu0 %v2183_v62  ;;  %v1714_v62 = vcombine.low %v39_v54, %v47_v55 }
  0x61   :  { %2020 = vmatpush3.bf16.msra.mxu1 %v2184_v63  ;;  %2033 = vmatprep.subr.bf16.mxu0 %v2185_v8  ;;  %v1716_v63 = vcombine.low %v40_v59, %v48_v60 }
  0x62   :  { %2061 = vmatprep.subr.bf16.mxu1 %v2186_v9 }
  0x63   :  { %1469 = vmatmul.mubr.bf16.vlgmr.msra.gmra.mrb[16].mxu0 %v1694_v2  ;;  %v1685_v2 = vld [vmem:[%s2736_s2] ss:$0 sm:$0xff] }
  0x64   :  { %1518 = vmatmul.mubr.bf16.vlgmr.msra.gmra.mrb[16].mxu1 %v1696_v6  ;;  %2034 = vmatpush3.bf16.msra.mxu0 %v2187_v10 }
  0x65   :  { %2062 = vmatpush3.bf16.msra.mxu1 %v2188_v11  ;;  %2035 = vmatprep.subr.bf16.mxu0 %v2189_v12 }
  0x66   :  { %2063 = vmatprep.subr.bf16.mxu1 %v2190_v13  ;;  %1476 = vmatprep.mubr.bf16.mxu0 %v1711_v18 }
  0x67   :  { %1525 = vmatprep.mubr.bf16.mxu1 %v1713_v24 }
  0x68   :  { %2036 = vmatpush3.bf16.msra.mxu0 %v2191_v14 }
  0x69   :  { %2064 = vmatpush3.bf16.msra.mxu1 %v2192_v15  ;;  %2037 = vmatprep.subr.bf16.mxu0 %v2193_v20 }
  0x6a   :  { %2065 = vmatprep.subr.bf16.mxu1 %v2194_v21 }
  0x6b   :  { %1477 = vmatmul.mubr.bf16.gmra.mrb[20].mxu0 %v1710_v19 }
  0x6c   :  { %2038 = vmatpush3.bf16.msra.mxu0 %v2195_v25  ;;  %1526 = vmatmul.mubr.bf16.gmra.mrb[20].mxu1 %v1712_v26 }
  0x6d   :  { %2066 = vmatpush3.bf16.msra.mxu1 %v2196_v27  ;;  %2039 = vmatprep.subr.bf16.mxu0 %v2197_v28 }
  0x6e   :  { %2067 = vmatprep.subr.bf16.mxu1 %v2198_v29  ;;  %1566 = vmatprep.mubr.bf16.mxu0 %v1699_v52 }
  0x6f   :  { %1615 = vmatprep.mubr.bf16.mxu1 %v1701_v57 }
  0x70   :  { %2040 = vmatpush3.bf16.msra.mxu0 %v2199_v30 }
  0x71   :  { %2068 = vmatpush3.bf16.msra.mxu1 %v2200_v31  ;;  %2041 = vmatprep.subr.bf16.mxu0 %v2201_v32 }
  0x72   :  { %2069 = vmatprep.subr.bf16.mxu1 %v2202_v33 }
  0x74   :  { %2042 = vmatpush3.bf16.msra.mxu0 %v2203_v34 }
  0x75   :  { %2070 = vmatpush3.bf16.msra.mxu1 %v2204_v35  ;;  %2043 = vmatprep.subr.bf16.mxu0 %v2205_v36 }
  0x76   :  { %2071 = vmatprep.subr.bf16.mxu1 %v2206_v37 }
  0x78   :  { %2044 = vmatpush3.bf16.msra.mxu0 %v2207_v38 }
  0x79   :  { %2072 = vmatpush3.bf16.msra.mxu1 %v2208_v39  ;;  %2045 = vmatprep.subr.bf16.mxu0 %v2209_v40 }
  0x7a   :  { %2073 = vmatprep.subr.bf16.mxu1 %v2210_v41 }
  0x7c   :  { %2046 = vmatpush3.bf16.msra.mxu0 %v2211_v42 }
  0x7d   :  { %2074 = vmatpush3.bf16.msra.mxu1 %v2212_v43  ;;  %2047 = vmatprep.subr.bf16.mxu0 %v2213_v44 }
  0x7e   :  { %2075 = vmatprep.subr.bf16.mxu1 %v2214_v45 }
  0x80   :  { %2048 = vmatpush3.bf16.msra.mxu0 %v2215_v46 }
  0x81   :  { %2076 = vmatpush3.bf16.msra.mxu1 %v2216_v47 }
  0x83   :  { %1567 = vmatmul.mubr.bf16.vlgmr.msra.gmra.mrb[24].mxu0 %v1698_v51 }
  0x84   :  { %1616 = vmatmul.mubr.bf16.vlgmr.msra.gmra.mrb[24].mxu1 %v1700_v56  ;;  %1574 = vmatprep.mubr.bf16.mxu0 %v1715_v58 }
  0x85   :  { %1623 = vmatprep.mubr.bf16.mxu1 %v1717_v61 }
  0x8b   :  { %1575 = vmatmul.mubr.bf16.gmra.mrb[28].mxu0 %v1714_v62 }
  0x8c   :  { %1624 = vmatmul.mubr.bf16.gmra.mrb[28].mxu1 %v1716_v63 }
  0xf6   :  { %v1881_v0 = vpop.f32.mrb[0].mxu0 }
  0xf7   :  { %v1909_v1 = vpop.f32.mrb[0].mxu1  ;;  %v1882_v3 = vpop.f32.mrb[1].mxu0 }
  0xf8   :  { %v1883_v4 = vadd.f32 %v1882_v3, %v1881_v0  ;;  %v1910_v5 = vpop.f32.mrb[1].mxu1  ;;  %v1884_v6 = vpop.f32.mrb[2].mxu0 }
  0xf9   :  { %v1911_v7 = vadd.f32 %v1910_v5, %v1909_v1  ;;  %v1912_v8 = vpop.f32.mrb[2].mxu1  ;;  %v1885_v9 = vpop.f32.mrb[3].mxu0 }
  0xfa   :  { %v1275_v10 = vadd.f32 %v1883_v4, %v1685_v2  ;;  %v1886_v11 = vadd.f32 %v1885_v9, %v1884_v6  ;;  %v1913_v12 = vpop.f32.mrb[3].mxu1 }
  0xfb   :  { %v1914_v13 = vadd.f32 %v1913_v12, %v1912_v8 }
  0xfc   :  { %v1324_v14 = vadd.f32 %v1911_v7, %v1275_v10  ;;  %v1278_v15 = vadd.f32 %v1886_v11, %v1685_v2 }
  0xfe   :  { %v1327_v16 = vadd.f32 %v1914_v13, %v1278_v15  ;;  %v1887_v17 = vpop.f32.mrb[4].mxu0 }
  0xff   :  { %v1888_v18 = vpop.f32.mrb[5].mxu0  ;;  %v1915_v21 = vpop.f32.mrb[4].mxu1 }
 0x100   :  { %v1889_v19 = vadd.f32 %v1888_v18, %v1887_v17  ;;  %v1890_v20 = vpop.f32.mrb[6].mxu0  ;;  %v1916_v25 = vpop.f32.mrb[5].mxu1 }
 0x101   :  { %v1891_v22 = vpop.f32.mrb[7].mxu0  ;;  %v1917_v26 = vadd.f32 %v1916_v25, %v1915_v21  ;;  %v1918_v27 = vpop.f32.mrb[6].mxu1 }
 0x102   :  { %v1283_v23 = vadd.f32 %v1889_v19, %v1685_v2  ;;  %v1892_v24 = vadd.f32 %v1891_v22, %v1890_v20  ;;  %v1919_v29 = vpop.f32.mrb[7].mxu1 }
 0x103   :  { %v1920_v31 = vadd.f32 %v1919_v29, %v1918_v27 }
 0x104   :  { %v1286_v28 = vadd.f32 %v1892_v24, %v1685_v2  ;;  %v1332_v30 = vadd.f32 %v1917_v26, %v1283_v23 }
 0x106   :  { %v1335_v32 = vadd.f32 %v1920_v31, %v1286_v28 }
 0x116   :  { %v1937_v33 = vpop.f32.mrb[8].mxu0 }
 0x117   :  { %v1965_v34 = vpop.f32.mrb[8].mxu1  ;;  %v1938_v35 = vpop.f32.mrb[9].mxu0 }
 0x118   :  { %v1966_v36 = vpop.f32.mrb[9].mxu1  ;;  %v1939_v37 = vadd.f32 %v1938_v35, %v1937_v33  ;;  %v1940_v39 = vpop.f32.mrb[10].mxu0 }
 0x119   :  { %v1967_v38 = vadd.f32 %v1966_v36, %v1965_v34  ;;  %v1968_v40 = vpop.f32.mrb[10].mxu1  ;;  %v1941_v41 = vpop.f32.mrb[11].mxu0 }
 0x11a   :  { %v1969_v42 = vpop.f32.mrb[11].mxu1  ;;  %v1373_v43 = vadd.f32 %v1939_v37, %v1324_v14  ;;  %v1942_v44 = vadd.f32 %v1941_v41, %v1940_v39 }
 0x11b   :  { %v1970_v45 = vadd.f32 %v1969_v42, %v1968_v40 }
 0x11c   :  { %v1422_v46 = vadd.f32 %v1967_v38, %v1373_v43  ;;  %v1376_v47 = vadd.f32 %v1942_v44, %v1327_v16 }
 0x11e   :  { %v1425_v48 = vadd.f32 %v1970_v45, %v1376_v47  ;;  %v1943_v49 = vpop.f32.mrb[12].mxu0 }
 0x11f   :  { %v1944_v50 = vpop.f32.mrb[13].mxu0  ;;  %v1971_v55 = vpop.f32.mrb[12].mxu1 }
 0x120   :  { %v1945_v51 = vadd.f32 %v1944_v50, %v1943_v49  ;;  %v1946_v52 = vpop.f32.mrb[14].mxu0  ;;  %v1972_v57 = vpop.f32.mrb[13].mxu1 }
 0x121   :  { %v1947_v53 = vpop.f32.mrb[15].mxu0  ;;  %v1973_v59 = vadd.f32 %v1972_v57, %v1971_v55  ;;  %v1974_v60 = vpop.f32.mrb[14].mxu1 }
 0x122   :  { %v1381_v54 = vadd.f32 %v1945_v51, %v1332_v30  ;;  %v1948_v56 = vadd.f32 %v1947_v53, %v1946_v52  ;;  %v1975_v61 = vpop.f32.mrb[15].mxu1 }
 0x123   :  { %v1976_v63 = vadd.f32 %v1975_v61, %v1974_v60 }
 0x124   :  { %v1384_v58 = vadd.f32 %v1948_v56, %v1335_v32  ;;  %v1430_v62 = vadd.f32 %v1973_v59, %v1381_v54 }
 0x126   :  { %v1433_v0 = vadd.f32 %v1976_v63, %v1384_v58 }
 0x136   :  { %v1993_v1 = vpop.f32.mrb[16].mxu0 }
 0x137   :  { %v2021_v2 = vpop.f32.mrb[16].mxu1  ;;  %v1994_v3 = vpop.f32.mrb[17].mxu0 }
 0x138   :  { %v1995_v4 = vadd.f32 %v1994_v3, %v1993_v1  ;;  %v2022_v5 = vpop.f32.mrb[17].mxu1  ;;  %v1996_v6 = vpop.f32.mrb[18].mxu0 }
 0x139   :  { %v2023_v7 = vadd.f32 %v2022_v5, %v2021_v2  ;;  %v2024_v8 = vpop.f32.mrb[18].mxu1  ;;  %v1997_v9 = vpop.f32.mrb[19].mxu0 }
 0x13a   :  { %v1471_v10 = vadd.f32 %v1995_v4, %v1422_v46  ;;  %v1998_v11 = vadd.f32 %v1997_v9, %v1996_v6  ;;  %v2025_v12 = vpop.f32.mrb[19].mxu1 }
 0x13b   :  { %v2026_v13 = vadd.f32 %v2025_v12, %v2024_v8 }
 0x13c   :  { %v1520_v14 = vadd.f32 %v2023_v7, %v1471_v10  ;;  %v1474_v15 = vadd.f32 %v1998_v11, %v1425_v48 }
 0x13e   :  { %v1523_v16 = vadd.f32 %v2026_v13, %v1474_v15  ;;  %v1999_v17 = vpop.f32.mrb[20].mxu0 }
 0x13f   :  { %v2000_v18 = vpop.f32.mrb[21].mxu0  ;;  %v2027_v21 = vpop.f32.mrb[20].mxu1 }
 0x140   :  { %v2001_v19 = vadd.f32 %v2000_v18, %v1999_v17  ;;  %v2002_v20 = vpop.f32.mrb[22].mxu0  ;;  %v2028_v25 = vpop.f32.mrb[21].mxu1 }
 0x141   :  { %v2003_v22 = vpop.f32.mrb[23].mxu0  ;;  %v2029_v26 = vadd.f32 %v2028_v25, %v2027_v21  ;;  %v2030_v27 = vpop.f32.mrb[22].mxu1 }
 0x142   :  { %v1479_v23 = vadd.f32 %v2001_v19, %v1430_v62  ;;  %v2004_v24 = vadd.f32 %v2003_v22, %v2002_v20  ;;  %v2031_v29 = vpop.f32.mrb[23].mxu1 }
 0x143   :  { %v2032_v31 = vadd.f32 %v2031_v29, %v2030_v27 }
 0x144   :  { %v1482_v28 = vadd.f32 %v2004_v24, %v1433_v0  ;;  %v1528_v30 = vadd.f32 %v2029_v26, %v1479_v23 }
 0x146   :  { %v1531_v32 = vadd.f32 %v2032_v31, %v1482_v28 }
 0x156   :  { %v2049_v33 = vpop.f32.mrb[24].mxu0 }
 0x157   :  { %v2077_v34 = vpop.f32.mrb[24].mxu1  ;;  %v2050_v35 = vpop.f32.mrb[25].mxu0 }
 0x158   :  { %v2051_v36 = vadd.f32 %v2050_v35, %v2049_v33  ;;  %v2078_v37 = vpop.f32.mrb[25].mxu1  ;;  %v2052_v38 = vpop.f32.mrb[26].mxu0 }
 0x159   :  { %v2079_v39 = vadd.f32 %v2078_v37, %v2077_v34  ;;  %v2080_v40 = vpop.f32.mrb[26].mxu1  ;;  %v2053_v41 = vpop.f32.mrb[27].mxu0 }
 0x15a   :  { %v1569_v42 = vadd.f32 %v2051_v36, %v1520_v14  ;;  %v2054_v43 = vadd.f32 %v2053_v41, %v2052_v38  ;;  %v2081_v44 = vpop.f32.mrb[27].mxu1 }
 0x15b   :  { %v2082_v45 = vadd.f32 %v2081_v44, %v2080_v40 }
 0x15c   :  { %v1618_v46 = vadd.f32 %v2079_v39, %v1569_v42  ;;  %v1572_v47 = vadd.f32 %v2054_v43, %v1523_v16 }
 0x15e   :  { %v1621_v48 = vadd.f32 %v2082_v45, %v1572_v47  ;;  %v2055_v49 = vpop.f32.mrb[28].mxu0  ;;  %v1661_v50 = vmul.f32 %v1618_v46, %v1618_v46 }
 0x15f   :  { %v2083_v51 = vpop.f32.mrb[28].mxu1  ;;  %v2056_v52 = vpop.f32.mrb[29].mxu0 }
 0x160   :  { %v1857_v53 = vpack.c.bf16 %v1621_v48, %v1618_v46  ;;  %v1652_v54 = vadd.f32 %v1621_v48, %v1618_v46  ;;  %v1662_v55 = vmul.f32 %v1621_v48, %v1621_v48  ;;  %v2057_v56 = vadd.f32 %v2056_v52, %v2055_v49  ;;  %v2084_v57 = vpop.f32.mrb[29].mxu1  ;;  %v2058_v58 = vpop.f32.mrb[30].mxu0 }
 0x161   :  { %v2085_v59 = vadd.f32 %v2084_v57, %v2083_v51  ;;  %v2086_v60 = vpop.f32.mrb[30].mxu1  ;;  %v2059_v61 = vpop.f32.mrb[31].mxu0 }
 0x162   :  { %1858 = vst [vmem:[%s2737_s3] sm:$0xff] %v1857_v53   ;;  %v1665_v62 = vadd.f32 %v1662_v55, %v1661_v50  ;;  %v1577_v63 = vadd.f32 %v2057_v56, %v1528_v30  ;;  %v2060_v0 = vadd.f32 %v2059_v61, %v2058_v58  ;;  %v2087_v1 = vpop.f32.mrb[31].mxu1 }
 0x163   :  { %v2088_v2 = vadd.f32 %v2087_v1, %v2086_v60 }
 0x164   :  { %v1626_v3 = vadd.f32 %v2085_v59, %v1577_v63  ;;  %v1580_v4 = vadd.f32 %v2060_v0, %v1531_v32 }
 0x166   :  { %v1653_v5 = vadd.f32 %v1652_v54, %v1626_v3  ;;  %v1663_v6 = vmul.f32 %v1626_v3, %v1626_v3  ;;  %v1629_v7 = vadd.f32 %v2088_v2, %v1580_v4 }
 0x168   :  { %v1666_v8 = vadd.f32 %v1665_v62, %v1663_v6  ;;  %v1862_v9 = vpack.c.bf16 %v1629_v7, %v1626_v3  ;;  %v1654_v10 = vadd.f32 %v1653_v5, %v1629_v7  ;;  %v1664_v11 = vmul.f32 %v1629_v7, %v1629_v7 }
 0x16a   :  { %1864 = vst [vmem:[%s2737_s3 + $0x8] sm:$0xff] %v1862_v9   ;;  %v1655_v12 = vrot.slane %v1654_v10, 4  ;;  %v1667_v13 = vadd.f32 %v1666_v8, %v1664_v11 }
 0x16c   :  { %v1656_v14 = vadd.f32 %v1655_v12, %v1654_v10  ;;  %v1668_v15 = vrot.slane %v1667_v13, 4 }
 0x16e   :  { %v1657_v16 = vrot.slane %v1656_v14, 2  ;;  %v1669_v17 = vadd.f32 %v1668_v15, %v1667_v13 }
 0x170   :  { %v1658_v18 = vadd.f32 %v1657_v16, %v1656_v14  ;;  %v1670_v19 = vrot.slane %v1669_v17, 2 }
 0x172   :  { %v1659_v20 = vrot.slane %v1658_v18, 1  ;;  %v1671_v21 = vadd.f32 %v1670_v19, %v1669_v17 }
 0x174   :  { %v1672_v22 = vrot.slane %v1671_v21, 1  ;;  %v1660_v23 = vadd.f32 %v1659_v20, %v1658_v18 }
 0x176   :  { %v1673_v24 = vadd.f32 %v1672_v22, %v1671_v21 }
 0x178   :  { %v1675_v25 = vsel %vm1674_vm0, %v1660_v23, %v1673_v24 }
 0x179   :  { %1676 = vst [vmem:[%s2738_s4] sm:$0x3] %v1675_v25 }

</bundles_post_ra>
